<compile_context>
chip_gen: v5e
topology: v5e:2x2
jax: 0.10.0
libtpu: 0.0.40
codegen_flags: <defaults>
</compile_context>

<pallas_src>
import jax
import jax.numpy as jnp
from jax.experimental import pallas as pl
from jax.experimental.pallas import tpu as pltpu

# Logical (PyTorch) sizes.
n_input = 33           # len(get_state(env))
n_hidden_1 = 500
n_hidden_2 = 250
n_hidden_3 = 120
n_output = 12          # n_RB(=4) * len(V2V_power_dB_List)(=3)

# Lane-padded sizes.
IN_P = 128
H1P = 512
H2P = 256
H3P = 128
OUT_P = 128

_BN_EPS = 1e-5

# Rows of the packed parameter slab ([8, H1P] f32).
_ROW_G1, _ROW_BE1, _ROW_G2, _ROW_BE2, _ROW_G3, _ROW_BE3, _ROW_B4 = range(7)


def _make_kernel(b_real: int, b_pad: int):
    """Build the fused forward kernel for a given (real, padded) batch size."""
    inv_b = 1.0 / float(b_real)
    need_mask = b_pad != b_real

    def kernel(x_ref, w1_ref, w2_hbm, w3_hbm, w4_hbm, vec_ref,
               q_ref, act_ref,
               xp_ref, w2_buf, w3_buf, w4_buf, sem):
        # --- Kick off w2/w3/w4 HBM->VMEM DMA immediately (overlap w/ layer 1).
        cp2 = pltpu.make_async_copy(w2_hbm, w2_buf, sem.at[0])
        cp3 = pltpu.make_async_copy(w3_hbm, w3_buf, sem.at[1])
        cp4 = pltpu.make_async_copy(w4_hbm, w4_buf, sem.at[2])
        cp2.start()
        cp3.start()
        cp4.start()

        vec = vec_ref[...]  # [8, H1P] f32, loaded once

        if need_mask:
            row_ids = jax.lax.broadcasted_iota(jnp.int32, (b_pad, 1), 0)
            mask = (row_ids < b_real).astype(jnp.float32)

        def bn(h, gamma, beta):
            # One-pass training-mode BatchNorm1d folded into scale/shift.
            # Padded rows of h are exactly zero here, so unmasked sums over the
            # padded batch equal sums over the real batch (no pre-mask needed).
            mu = jnp.sum(h, axis=0, keepdims=True) * inv_b
            ex2 = jnp.sum(h * h, axis=0, keepdims=True) * inv_b
            var = ex2 - mu * mu                      # biased variance
            scale = gamma * jax.lax.rsqrt(var + _BN_EPS)
            shift = beta - mu * scale
            out = h * scale + shift
            if need_mask:
                out = out * mask  # keep padded rows zero for next layer's stats
            return out

        # --- Zero-pad + cast x entirely in VMEM (no wrapper HBM round trip).
        xp_ref[...] = jnp.zeros_like(xp_ref)
        xp_ref[0:b_real, 0:n_input] = x_ref[...]
        x = xp_ref[...].astype(jnp.bfloat16)          # [b_pad, IN_P]

        # Layer 1 (bias cancels exactly under training-mode BN -> omitted).
        h = jnp.dot(x, w1_ref[...], preferred_element_type=jnp.float32)
        h = bn(h, vec[_ROW_G1:_ROW_G1 + 1, :H1P], vec[_ROW_BE1:_ROW_BE1 + 1, :H1P])

        # Layer 2 (wait only when its weights are actually needed).
        cp2.wait()
        h = jnp.dot(h.astype(jnp.bfloat16), w2_buf[...],
                    preferred_element_type=jnp.float32)
        h = bn(h, vec[_ROW_G2:_ROW_G2 + 1, :H2P], vec[_ROW_BE2:_ROW_BE2 + 1, :H2P])

        # Layer 3.
        cp3.wait()
        h = jnp.dot(h.astype(jnp.bfloat16), w3_buf[...],
                    preferred_element_type=jnp.float32)
        h = bn(h, vec[_ROW_G3:_ROW_G3 + 1, :H3P], vec[_ROW_BE3:_ROW_BE3 + 1, :H3P])

        # Layer 4: Linear + ReLU (bias kept — no BN after it).
        cp4.wait()
        h = jnp.dot(h.astype(jnp.bfloat16), w4_buf[...],
                    preferred_element_type=jnp.float32)
        h = h + vec[_ROW_B4:_ROW_B4 + 1, :OUT_P]
        q = jnp.maximum(h, 0.0)
        q_ref[...] = q                                # lane-dense f32 store

        # --- Fused greedy action selection over the 12 real output lanes.
        lane = jax.lax.broadcasted_iota(jnp.int32, (b_pad, OUT_P), 1)
        qm = jnp.where(lane < n_output, q, -jnp.inf)
        row_max = jnp.max(qm, axis=1, keepdims=True)
        idx = jnp.where(qm == row_max, lane, OUT_P)   # first-max tie-break
        act_ref[...] = jnp.min(idx, axis=1, keepdims=True)

    return kernel


def _vmem_limit_bytes(b_real: int, b_pad: int) -> int:
    # Real byte accounting (review fix: no accidental 4x, cap <= 48 MiB).
    weight_bufs = 2 * (H1P * H2P + H2P * H3P + H3P * OUT_P)   # bf16 DMA scratch
    fixed = 2 * IN_P * H1P + 4 * 8 * H1P + 4 * b_real * IN_P  # w1 + vec + x
    per_row = 4 * (IN_P + 2 * H1P + 2 * H2P + 2 * H3P + 2 * OUT_P)  # f32 temps
    est = weight_bufs + fixed + b_pad * per_row + (8 << 20)   # compiler headroom
    return min(max(est, 16 << 20), 48 << 20)


def _round_batch(B: int) -> int:
    if B < 256:
        return max(8, ((B + 7) // 8) * 8)
    # Large batches: round to the MXU row tile (256 on v6e/v7x, 128 on v5e).
    try:
        kind = jax.devices()[0].device_kind.lower()
        tile = 256 if ("v6" in kind or "v7" in kind) else 128
    except Exception:
        tile = 128
    return ((B + tile - 1) // tile) * tile


def dqn_forward(x, params, with_action=False):
    """x: [B, n_input] float32 (B >= 2). Returns [B, n_output] f32 Q-values,
    and optionally the greedy action per row (int32 [B])."""
    B = x.shape[0]
    if B < 2:
        raise ValueError("training-mode BatchNorm requires batch size >= 2")
    B_pad = _round_batch(B)

    vmem = pl.BlockSpec(memory_space=pltpu.MemorySpace.VMEM)
    hbm = pl.BlockSpec(memory_space=pl.ANY)

    q, act = pl.pallas_call(
        _make_kernel(B, B_pad),
        out_shape=(jax.ShapeDtypeStruct((B_pad, OUT_P), jnp.float32),
                   jax.ShapeDtypeStruct((B_pad, 1), jnp.int32)),
        in_specs=[vmem, vmem, hbm, hbm, hbm, vmem],
        out_specs=(vmem, vmem),
        scratch_shapes=[
            pltpu.VMEM((B_pad, IN_P), jnp.float32),    # padded x
            pltpu.VMEM((H1P, H2P), jnp.bfloat16),      # w2 buffer
            pltpu.VMEM((H2P, H3P), jnp.bfloat16),      # w3 buffer
            pltpu.VMEM((H3P, OUT_P), jnp.bfloat16),    # w4 buffer
            pltpu.SemaphoreType.DMA((3,)),
        ],
        compiler_params=pltpu.CompilerParams(
            vmem_limit_bytes=_vmem_limit_bytes(B, B_pad)),
    )(x.astype(jnp.float32), params["w1"], params["w2"], params["w3"],
      params["w4"], params["vec"])

    qv = q[:B, :n_output]
    if with_action:
        return qv, act[:B, 0]
    return qv


def _padded_linear_weight(key, fan_in, fan_out, fi_pad, fo_pad):
    # PyTorch nn.Linear default init: U(-1/sqrt(fan_in), 1/sqrt(fan_in)).
    bound = float(fan_in) ** -0.5
    w = jax.random.uniform(key, (fan_in, fan_out), jnp.float32, -bound, bound)
    wp = jnp.zeros((fi_pad, fo_pad), jnp.float32).at[:fan_in, :fan_out].set(w)
    return wp.astype(jnp.bfloat16)


def init_params(key):
    k1, k2, k3, k4, k5 = jax.random.split(key, 5)
    w1 = _padded_linear_weight(k1, n_input, n_hidden_1, IN_P, H1P)
    w2 = _padded_linear_weight(k2, n_hidden_1, n_hidden_2, H1P, H2P)
    w3 = _padded_linear_weight(k3, n_hidden_2, n_hidden_3, H2P, H3P)
    w4 = _padded_linear_weight(k4, n_hidden_3, n_output, H3P, OUT_P)

    bound4 = float(n_hidden_3) ** -0.5
    b4 = jax.random.uniform(k5, (n_output,), jnp.float32, -bound4, bound4)

    # Packed gamma/beta/b4 slab.  Pad lanes keep gamma=0, beta=0 so padded
    # (identically-zero) features stay exactly zero after each BN.
    vec = jnp.zeros((8, H1P), jnp.float32)
    vec = vec.at[_ROW_G1, :n_hidden_1].set(1.0)
    vec = vec.at[_ROW_G2, :n_hidden_2].set(1.0)
    vec = vec.at[_ROW_G3, :n_hidden_3].set(1.0)
    vec = vec.at[_ROW_B4, :n_output].set(b4)

    # Linear biases b1..b3 intentionally not created — they cancel exactly
    # under training-mode BatchNorm (mean subtraction).
    return {"w1": w1, "w2": w2, "w3": w3, "w4": w4, "vec": vec}


def _reference_forward(x, params):
    """Pure-JAX reference: same bf16 weights, textbook two-pass training BN."""
    def mm(a, w):
        return jnp.dot(a.astype(jnp.bfloat16), w,
                       preferred_element_type=jnp.float32)

    def bn(h, g, be):
        mu = jnp.mean(h, axis=0, keepdims=True)
        var = jnp.mean((h - mu) ** 2, axis=0, keepdims=True)
        return (h - mu) * jax.lax.rsqrt(var + _BN_EPS) * g + be

    vec = params["vec"]
    xp = jnp.zeros((x.shape[0], IN_P), jnp.float32).at[:, :n_input].set(x)

    h = bn(mm(xp, params["w1"]),
           vec[_ROW_G1:_ROW_G1 + 1, :H1P], vec[_ROW_BE1:_ROW_BE1 + 1, :H1P])
    h = bn(mm(h, params["w2"]),
           vec[_ROW_G2:_ROW_G2 + 1, :H2P], vec[_ROW_BE2:_ROW_BE2 + 1, :H2P])
    h = bn(mm(h, params["w3"]),
           vec[_ROW_G3:_ROW_G3 + 1, :H3P], vec[_ROW_BE3:_ROW_BE3 + 1, :H3P])
    h = mm(h, params["w4"]) + vec[_ROW_B4:_ROW_B4 + 1, :OUT_P]
    return jnp.maximum(h, 0.0)[:, :n_output]


if __name__ == "__main__":
    key = jax.random.PRNGKey(0)
    kx, kp = jax.random.split(key)
    params = init_params(kp)

    # MXU-row-aligned batch; still tiny in memory.
    B = 128
    x = jax.random.normal(kx, (B, n_input), dtype=jnp.float32)
    q, act = dqn_forward(x, params, with_action=True)
    jax.block_until_ready((q, act))
    ref = _reference_forward(x, params)
    assert q.shape == (B, n_output) and act.shape == (B,)
    assert jnp.allclose(q, ref, atol=2e-3, rtol=2e-3), "Q mismatch (B=128)"
    # Action check robust to near-ties: ref Q at the chosen action == ref max.
    q_at_act = jnp.take_along_axis(ref, act[:, None].astype(jnp.int32), axis=1)[:, 0]
    assert jnp.allclose(q_at_act, jnp.max(ref, axis=1),
                        atol=2e-3, rtol=2e-3), "action mismatch (B=128)"

    # Non-multiple-of-8 batch exercises the masked / padded-row path.
    B2 = 6
    x2 = jax.random.normal(jax.random.PRNGKey(1), (B2, n_input),
                           dtype=jnp.float32)
    out2 = jax.block_until_ready(dqn_forward(x2, params))
    ref2 = _reference_forward(x2, params)
    assert out2.shape == (B2, n_output)
    assert jnp.allclose(out2, ref2, atol=2e-3, rtol=2e-3), "mismatch (B=6)"

    print("KERNEL_OK")
</pallas_src>

<mosaic_0001>
module attributes {stable_mosaic.version = 11 : i64} {
  func.func @kernel(%arg0: memref<128x33xf32, #tpu.memory_space<vmem>>, %arg1: memref<128x512xbf16, #tpu.memory_space<vmem>>, %arg2: memref<512x256xbf16, #tpu.memory_space<any>>, %arg3: memref<256x128xbf16, #tpu.memory_space<any>>, %arg4: memref<128x128xbf16, #tpu.memory_space<any>>, %arg5: memref<8x512xf32, #tpu.memory_space<vmem>>, %arg6: memref<128x128xf32, #tpu.memory_space<vmem>>, %arg7: memref<128x1xi32, #tpu.memory_space<vmem>>, %arg8: memref<128x128xf32, #tpu.memory_space<vmem>>, %arg9: memref<512x256xbf16, #tpu.memory_space<vmem>>, %arg10: memref<256x128xbf16, #tpu.memory_space<vmem>>, %arg11: memref<128x128xbf16, #tpu.memory_space<vmem>>, %arg12: memref<3x!tpu.dma_semaphore, #tpu.memory_space<semaphore_mem>>) attributes {dimension_semantics = [], scalar_prefetch = 0 : i64, scratch_operands = 5 : i64, tpu.core_type = #tpu.core_type<tc>} {
    %c0_i32 = arith.constant 0 : i32
    %0 = tpu.memref_slice %arg12[%c0_i32] : memref<3x!tpu.dma_semaphore, #tpu.memory_space<semaphore_mem>> -> memref<1x!tpu.dma_semaphore, #tpu.memory_space<semaphore_mem>>
    %1 = tpu.memref_squeeze %0 : memref<1x!tpu.dma_semaphore, #tpu.memory_space<semaphore_mem>> -> memref<!tpu.dma_semaphore, #tpu.memory_space<semaphore_mem>>
    tpu.enqueue_dma source(%arg2 : memref<512x256xbf16, #tpu.memory_space<any>>) target(%arg9 : memref<512x256xbf16, #tpu.memory_space<vmem>>) target_semaphore(%1 : memref<!tpu.dma_semaphore, #tpu.memory_space<semaphore_mem>>)
    %c1_i32 = arith.constant 1 : i32
    %2 = tpu.memref_slice %arg12[%c1_i32] : memref<3x!tpu.dma_semaphore, #tpu.memory_space<semaphore_mem>> -> memref<1x!tpu.dma_semaphore, #tpu.memory_space<semaphore_mem>>
    %3 = tpu.memref_squeeze %2 : memref<1x!tpu.dma_semaphore, #tpu.memory_space<semaphore_mem>> -> memref<!tpu.dma_semaphore, #tpu.memory_space<semaphore_mem>>
    tpu.enqueue_dma source(%arg3 : memref<256x128xbf16, #tpu.memory_space<any>>) target(%arg10 : memref<256x128xbf16, #tpu.memory_space<vmem>>) target_semaphore(%3 : memref<!tpu.dma_semaphore, #tpu.memory_space<semaphore_mem>>)
    %c2_i32 = arith.constant 2 : i32
    %4 = tpu.memref_slice %arg12[%c2_i32] : memref<3x!tpu.dma_semaphore, #tpu.memory_space<semaphore_mem>> -> memref<1x!tpu.dma_semaphore, #tpu.memory_space<semaphore_mem>>
    %5 = tpu.memref_squeeze %4 : memref<1x!tpu.dma_semaphore, #tpu.memory_space<semaphore_mem>> -> memref<!tpu.dma_semaphore, #tpu.memory_space<semaphore_mem>>
    tpu.enqueue_dma source(%arg4 : memref<128x128xbf16, #tpu.memory_space<any>>) target(%arg11 : memref<128x128xbf16, #tpu.memory_space<vmem>>) target_semaphore(%5 : memref<!tpu.dma_semaphore, #tpu.memory_space<semaphore_mem>>)
    %c0 = arith.constant 0 : index
    %c0_0 = arith.constant 0 : index
    %6 = vector.load %arg5[%c0, %c0_0] : memref<8x512xf32, #tpu.memory_space<vmem>>, vector<8x512xf32>
    %cst = arith.constant 0.000000e+00 : f32
    %7 = vector.broadcast %cst : f32 to vector<128x128xf32>
    %c0_1 = arith.constant 0 : index
    %c0_2 = arith.constant 0 : index
    %8 = vector.load %arg8[%c0_1, %c0_2] : memref<128x128xf32, #tpu.memory_space<vmem>>, vector<128x128xf32>
    tpu.vector_store %arg8[%c0_1, %c0_2], %7 {strides = array<i32>} : memref<128x128xf32, #tpu.memory_space<vmem>>, vector<128x128xf32>,
    %c0_3 = arith.constant 0 : index
    %c0_4 = arith.constant 0 : index
    %9 = vector.load %arg0[%c0_3, %c0_4] : memref<128x33xf32, #tpu.memory_space<vmem>>, vector<128x33xf32>
    %c0_5 = arith.constant 0 : index
    %c0_6 = arith.constant 0 : index
    %10 = vector.load %arg8[%c0_5, %c0_6] : memref<128x128xf32, #tpu.memory_space<vmem>>, vector<128x33xf32>
    tpu.vector_store %arg8[%c0_5, %c0_6], %9 {strides = array<i32>} : memref<128x128xf32, #tpu.memory_space<vmem>>, vector<128x33xf32>,
    %c0_7 = arith.constant 0 : index
    %c0_8 = arith.constant 0 : index
    %11 = vector.load %arg8[%c0_7, %c0_8] : memref<128x128xf32, #tpu.memory_space<vmem>>, vector<128x128xf32>
    %12 = arith.truncf %11 : vector<128x128xf32> to vector<128x128xbf16>
    %c0_9 = arith.constant 0 : index
    %c0_10 = arith.constant 0 : index
    %13 = vector.load %arg1[%c0_9, %c0_10] : memref<128x512xbf16, #tpu.memory_space<vmem>>, vector<128x512xbf16>
    %cst_11 = arith.constant dense<0.000000e+00> : vector<128x512xf32>
    %14 = tpu.matmul %12, %13, %cst_11 {dimension_numbers = #tpu.dot_dimension_numbers<[1], [0], [0], [1], [0, 0, 1, 1], [], []>} : vector<128x128xbf16>, vector<128x512xbf16>, vector<128x512xf32> -> vector<128x512xf32>
    %15 = vector.extract_strided_slice %6 {offsets = [0, 0], sizes = [1, 512], strides = [1, 1]} : vector<8x512xf32> to vector<1x512xf32>
    %16 = vector.extract_strided_slice %6 {offsets = [1, 0], sizes = [1, 512], strides = [1, 1]} : vector<8x512xf32> to vector<1x512xf32>
    %cst_12 = arith.constant dense<0.000000e+00> : vector<512xf32>
    %17 = vector.multi_reduction <add>, %14, %cst_12 [0] : vector<128x512xf32> to vector<512xf32>
    %18 = vector.shape_cast %17 : vector<512xf32> to vector<1x512xf32>
    %cst_13 = arith.constant 7.812500e-03 : f32
    %19 = vector.broadcast %cst_13 : f32 to vector<1x512xf32>
    %20 = arith.mulf %18, %19 : vector<1x512xf32>
    %21 = arith.mulf %14, %14 : vector<128x512xf32>
    %cst_14 = arith.constant dense<0.000000e+00> : vector<512xf32>
    %22 = vector.multi_reduction <add>, %21, %cst_14 [0] : vector<128x512xf32> to vector<512xf32>
    %23 = vector.shape_cast %22 : vector<512xf32> to vector<1x512xf32>
    %cst_15 = arith.constant 7.812500e-03 : f32
    %24 = vector.broadcast %cst_15 : f32 to vector<1x512xf32>
    %25 = arith.mulf %23, %24 : vector<1x512xf32>
    %26 = arith.mulf %20, %20 : vector<1x512xf32>
    %27 = arith.subf %25, %26 : vector<1x512xf32>
    %cst_16 = arith.constant 9.99999974E-6 : f32
    %28 = vector.broadcast %cst_16 : f32 to vector<1x512xf32>
    %29 = arith.addf %27, %28 : vector<1x512xf32>
    %30 = math.rsqrt %29 : vector<1x512xf32>
    %31 = arith.mulf %15, %30 : vector<1x512xf32>
    %32 = arith.mulf %20, %31 : vector<1x512xf32>
    %33 = arith.subf %16, %32 : vector<1x512xf32>
    %34 = vector.broadcast %31 : vector<1x512xf32> to vector<128x512xf32>
    %35 = arith.mulf %14, %34 : vector<128x512xf32>
    %36 = vector.broadcast %33 : vector<1x512xf32> to vector<128x512xf32>
    %37 = arith.addf %35, %36 : vector<128x512xf32>
    %c0_i32_17 = arith.constant 0 : i32
    %38 = tpu.memref_slice %arg12[%c0_i32_17] : memref<3x!tpu.dma_semaphore, #tpu.memory_space<semaphore_mem>> -> memref<1x!tpu.dma_semaphore, #tpu.memory_space<semaphore_mem>>
    %39 = tpu.memref_squeeze %38 : memref<1x!tpu.dma_semaphore, #tpu.memory_space<semaphore_mem>> -> memref<!tpu.dma_semaphore, #tpu.memory_space<semaphore_mem>>
    tpu.wait_dma2 semaphore(%39 : memref<!tpu.dma_semaphore, #tpu.memory_space<semaphore_mem>>) src(%arg2 : memref<512x256xbf16, #tpu.memory_space<any>>) dst(%arg9 : memref<512x256xbf16, #tpu.memory_space<vmem>>)
    %40 = arith.truncf %37 : vector<128x512xf32> to vector<128x512xbf16>
    %c0_18 = arith.constant 0 : index
    %c0_19 = arith.constant 0 : index
    %41 = vector.load %arg9[%c0_18, %c0_19] : memref<512x256xbf16, #tpu.memory_space<vmem>>, vector<512x256xbf16>
    %cst_20 = arith.constant dense<0.000000e+00> : vector<128x256xf32>
    %42 = tpu.matmul %40, %41, %cst_20 {dimension_numbers = #tpu.dot_dimension_numbers<[1], [0], [0], [1], [0, 0, 1, 1], [], []>} : vector<128x512xbf16>, vector<512x256xbf16>, vector<128x256xf32> -> vector<128x256xf32>
    %43 = vector.extract_strided_slice %6 {offsets = [2, 0], sizes = [1, 256], strides = [1, 1]} : vector<8x512xf32> to vector<1x256xf32>
    %44 = vector.extract_strided_slice %6 {offsets = [3, 0], sizes = [1, 256], strides = [1, 1]} : vector<8x512xf32> to vector<1x256xf32>
    %cst_21 = arith.constant dense<0.000000e+00> : vector<256xf32>
    %45 = vector.multi_reduction <add>, %42, %cst_21 [0] : vector<128x256xf32> to vector<256xf32>
    %46 = vector.shape_cast %45 : vector<256xf32> to vector<1x256xf32>
    %cst_22 = arith.constant 7.812500e-03 : f32
    %47 = vector.broadcast %cst_22 : f32 to vector<1x256xf32>
    %48 = arith.mulf %46, %47 : vector<1x256xf32>
    %49 = arith.mulf %42, %42 : vector<128x256xf32>
    %cst_23 = arith.constant dense<0.000000e+00> : vector<256xf32>
    %50 = vector.multi_reduction <add>, %49, %cst_23 [0] : vector<128x256xf32> to vector<256xf32>
    %51 = vector.shape_cast %50 : vector<256xf32> to vector<1x256xf32>
    %cst_24 = arith.constant 7.812500e-03 : f32
    %52 = vector.broadcast %cst_24 : f32 to vector<1x256xf32>
    %53 = arith.mulf %51, %52 : vector<1x256xf32>
    %54 = arith.mulf %48, %48 : vector<1x256xf32>
    %55 = arith.subf %53, %54 : vector<1x256xf32>
    %cst_25 = arith.constant 9.99999974E-6 : f32
    %56 = vector.broadcast %cst_25 : f32 to vector<1x256xf32>
    %57 = arith.addf %55, %56 : vector<1x256xf32>
    %58 = math.rsqrt %57 : vector<1x256xf32>
    %59 = arith.mulf %43, %58 : vector<1x256xf32>
    %60 = arith.mulf %48, %59 : vector<1x256xf32>
    %61 = arith.subf %44, %60 : vector<1x256xf32>
    %62 = vector.broadcast %59 : vector<1x256xf32> to vector<128x256xf32>
    %63 = arith.mulf %42, %62 : vector<128x256xf32>
    %64 = vector.broadcast %61 : vector<1x256xf32> to vector<128x256xf32>
    %65 = arith.addf %63, %64 : vector<128x256xf32>
    %c1_i32_26 = arith.constant 1 : i32
    %66 = tpu.memref_slice %arg12[%c1_i32_26] : memref<3x!tpu.dma_semaphore, #tpu.memory_space<semaphore_mem>> -> memref<1x!tpu.dma_semaphore, #tpu.memory_space<semaphore_mem>>
    %67 = tpu.memref_squeeze %66 : memref<1x!tpu.dma_semaphore, #tpu.memory_space<semaphore_mem>> -> memref<!tpu.dma_semaphore, #tpu.memory_space<semaphore_mem>>
    tpu.wait_dma2 semaphore(%67 : memref<!tpu.dma_semaphore, #tpu.memory_space<semaphore_mem>>) src(%arg3 : memref<256x128xbf16, #tpu.memory_space<any>>) dst(%arg10 : memref<256x128xbf16, #tpu.memory_space<vmem>>)
    %68 = arith.truncf %65 : vector<128x256xf32> to vector<128x256xbf16>
    %c0_27 = arith.constant 0 : index
    %c0_28 = arith.constant 0 : index
    %69 = vector.load %arg10[%c0_27, %c0_28] : memref<256x128xbf16, #tpu.memory_space<vmem>>, vector<256x128xbf16>
    %cst_29 = arith.constant dense<0.000000e+00> : vector<128x128xf32>
    %70 = tpu.matmul %68, %69, %cst_29 {dimension_numbers = #tpu.dot_dimension_numbers<[1], [0], [0], [1], [0, 0, 1, 1], [], []>} : vector<128x256xbf16>, vector<256x128xbf16>, vector<128x128xf32> -> vector<128x128xf32>
    %71 = vector.extract_strided_slice %6 {offsets = [4, 0], sizes = [1, 128], strides = [1, 1]} : vector<8x512xf32> to vector<1x128xf32>
    %72 = vector.extract_strided_slice %6 {offsets = [5, 0], sizes = [1, 128], strides = [1, 1]} : vector<8x512xf32> to vector<1x128xf32>
    %cst_30 = arith.constant dense<0.000000e+00> : vector<128xf32>
    %73 = vector.multi_reduction <add>, %70, %cst_30 [0] : vector<128x128xf32> to vector<128xf32>
    %74 = vector.shape_cast %73 : vector<128xf32> to vector<1x128xf32>
    %cst_31 = arith.constant 7.812500e-03 : f32
    %75 = vector.broadcast %cst_31 : f32 to vector<1x128xf32>
    %76 = arith.mulf %74, %75 : vector<1x128xf32>
    %77 = arith.mulf %70, %70 : vector<128x128xf32>
    %cst_32 = arith.constant dense<0.000000e+00> : vector<128xf32>
    %78 = vector.multi_reduction <add>, %77, %cst_32 [0] : vector<128x128xf32> to vector<128xf32>
    %79 = vector.shape_cast %78 : vector<128xf32> to vector<1x128xf32>
    %cst_33 = arith.constant 7.812500e-03 : f32
    %80 = vector.broadcast %cst_33 : f32 to vector<1x128xf32>
    %81 = arith.mulf %79, %80 : vector<1x128xf32>
    %82 = arith.mulf %76, %76 : vector<1x128xf32>
    %83 = arith.subf %81, %82 : vector<1x128xf32>
    %cst_34 = arith.constant 9.99999974E-6 : f32
    %84 = vector.broadcast %cst_34 : f32 to vector<1x128xf32>
    %85 = arith.addf %83, %84 : vector<1x128xf32>
    %86 = math.rsqrt %85 : vector<1x128xf32>
    %87 = arith.mulf %71, %86 : vector<1x128xf32>
    %88 = arith.mulf %76, %87 : vector<1x128xf32>
    %89 = arith.subf %72, %88 : vector<1x128xf32>
    %90 = vector.broadcast %87 : vector<1x128xf32> to vector<128x128xf32>
    %91 = arith.mulf %70, %90 : vector<128x128xf32>
    %92 = vector.broadcast %89 : vector<1x128xf32> to vector<128x128xf32>
    %93 = arith.addf %91, %92 : vector<128x128xf32>
    %c2_i32_35 = arith.constant 2 : i32
    %94 = tpu.memref_slice %arg12[%c2_i32_35] : memref<3x!tpu.dma_semaphore, #tpu.memory_space<semaphore_mem>> -> memref<1x!tpu.dma_semaphore, #tpu.memory_space<semaphore_mem>>
    %95 = tpu.memref_squeeze %94 : memref<1x!tpu.dma_semaphore, #tpu.memory_space<semaphore_mem>> -> memref<!tpu.dma_semaphore, #tpu.memory_space<semaphore_mem>>
    tpu.wait_dma2 semaphore(%95 : memref<!tpu.dma_semaphore, #tpu.memory_space<semaphore_mem>>) src(%arg4 : memref<128x128xbf16, #tpu.memory_space<any>>) dst(%arg11 : memref<128x128xbf16, #tpu.memory_space<vmem>>)
    %96 = arith.truncf %93 : vector<128x128xf32> to vector<128x128xbf16>
    %c0_36 = arith.constant 0 : index
    %c0_37 = arith.constant 0 : index
    %97 = vector.load %arg11[%c0_36, %c0_37] : memref<128x128xbf16, #tpu.memory_space<vmem>>, vector<128x128xbf16>
    %cst_38 = arith.constant dense<0.000000e+00> : vector<128x128xf32>
    %98 = tpu.matmul %96, %97, %cst_38 {dimension_numbers = #tpu.dot_dimension_numbers<[1], [0], [0], [1], [0, 0, 1, 1], [], []>} : vector<128x128xbf16>, vector<128x128xbf16>, vector<128x128xf32> -> vector<128x128xf32>
    %99 = vector.extract_strided_slice %6 {offsets = [6, 0], sizes = [1, 128], strides = [1, 1]} : vector<8x512xf32> to vector<1x128xf32>
    %100 = vector.broadcast %99 : vector<1x128xf32> to vector<128x128xf32>
    %101 = arith.addf %98, %100 : vector<128x128xf32>
    %cst_39 = arith.constant 0.000000e+00 : f32
    %102 = vector.broadcast %cst_39 : f32 to vector<128x128xf32>
    %103 = arith.maximumf %101, %102 : vector<128x128xf32>
    %c0_40 = arith.constant 0 : index
    %c0_41 = arith.constant 0 : index
    %104 = vector.load %arg6[%c0_40, %c0_41] : memref<128x128xf32, #tpu.memory_space<vmem>>, vector<128x128xf32>
    tpu.vector_store %arg6[%c0_40, %c0_41], %103 {strides = array<i32>} : memref<128x128xf32, #tpu.memory_space<vmem>>, vector<128x128xf32>,
    %105 = tpu.iota {dimensions = array<i32: 1>} : vector<128x128xi32>
    %c12_i32 = arith.constant 12 : i32
    %106 = vector.broadcast %c12_i32 : i32 to vector<128x128xi32>
    %107 = arith.cmpi slt, %105, %106 : vector<128x128xi32>
    %cst_42 = arith.constant 0xFF800000 : f32
    %108 = vector.broadcast %cst_42 : f32 to vector<128x128xf32>
    %109 = arith.select %107, %103, %108 : vector<128x128xi1>, vector<128x128xf32>
    %cst_43 = arith.constant dense<0xFF800000> : vector<128xf32>
    %110 = vector.multi_reduction <maximumf>, %109, %cst_43 [1] : vector<128x128xf32> to vector<128xf32>
    %111 = vector.shape_cast %110 : vector<128xf32> to vector<128x1xf32>
    %112 = vector.broadcast %111 : vector<128x1xf32> to vector<128x128xf32>
    %113 = arith.cmpf oeq, %109, %112 : vector<128x128xf32>
    %c128_i32 = arith.constant 128 : i32
    %114 = vector.broadcast %c128_i32 : i32 to vector<128x128xi32>
    %115 = arith.select %113, %105, %114 : vector<128x128xi1>, vector<128x128xi32>
    %cst_44 = arith.constant dense<2147483647> : vector<128xi32>
    %116 = vector.multi_reduction <minsi>, %115, %cst_44 [1] : vector<128x128xi32> to vector<128xi32>
    %117 = vector.shape_cast %116 : vector<128xi32> to vector<128x1xi32>
    %c0_45 = arith.constant 0 : index
    %c0_46 = arith.constant 0 : index
    %118 = vector.load %arg7[%c0_45, %c0_46] : memref<128x1xi32, #tpu.memory_space<vmem>>, vector<128x1xi32>
    tpu.vector_store %arg7[%c0_45, %c0_46], %117 {strides = array<i32>} : memref<128x1xi32, #tpu.memory_space<vmem>>, vector<128x1xi32>,
    return
  }
}

</mosaic_0001>

<bundles_post_ra>
// kernel: tpu_custom_call.1
= control target key start
LH: loop header
LB: loop body
LE: loop exit
PB: predicated region body
PF: predicated region fallthrough
CT: control target
= control target key end

     0   :  { %13 = vsyncpa [#allocation8], 0  ;;  %s5505_s0 = inlined_call_operand.vmem [shape: f32[128,33], index: 0, kind: input, shape index: {}]   ;;  %s5506_s1 = inlined_call_operand.hbm [shape: bf16[128,512], index: 1, kind: input, shape index: {}]   ;;  %s5507_s2 = inlined_call_operand.hbm [shape: bf16[512,256], index: 2, kind: input, shape index: {}]   ;;  %s5508_s3 = inlined_call_operand.vmem [shape: bf16[256,128], index: 3, kind: input, shape index: {}]   ;;  %s5509_s4 = inlined_call_operand.hbm [shape: bf16[128,128], index: 4, kind: input, shape index: {}]   ;;  %s5510_s5 = inlined_call_operand.vmem [shape: f32[8,512], index: 5, kind: input, shape index: {}]   ;;  %s5511_s6 = inlined_call_operand.hbm [shape: f32[128,128], index: 6, kind: output, shape index: {0}]   ;;  %s5512_s7 = inlined_call_operand.vmem [shape: s32[128,1], index: 7, kind: output, shape index: {1}]  }
   0x1   :  { %14 = vsyncpa [#allocation9], 0  ;;  %s21_s26 = sshll.u32 %s5506_s1, 4  ;;  %s3711_s27 = smov [#allocation7]   ;;  %s22_s26 = int_to_ptr.hbm [resolvable:$true] %s21_s26 }
   0x2   :  { %s23_s28 = sshll.u32 %s3711_s27, 4  ;;  %s3712_s29 = smov 256   ;;  %s24_s28 = int_to_ptr.vmem [resolvable:$true] %s23_s28 }
   0x3   :  { %s3713_s30 = smov 16  }
   0x4   :  { %29 = dma.hbm_to_vmem [thread:$0]  %s22_s26, 4096, %s24_s28, [#allocation8], %s3712_s29, %s3712_s29, %s3713_s30  }
   0x5   :  { %3701 = dma.done.wait [#allocation8], 4096  }
   0x6   :  { %3702 = vsyncadd [#allocation8], 4294963200  ;;  %s43_s10 = sshll.u32 %s5507_s2, 4  ;;  %s3714_s11 = smov [#allocation3]   ;;  %v60_v0 = vld [vmem:[%s5508_s3] sm:$0xff]  ;;  %v62_v1 = vld [vmem:[%s5508_s3 + $0x8] sm:$0xff]  ;;  %s44_s10 = int_to_ptr.hbm [resolvable:$true] %s43_s10 }
   0x7   :  { %s45_s12 = sshll.u32 %s3714_s11, 4  ;;  %v64_v2 = vld [vmem:[%s5508_s3 + $0x10] sm:$0xff]  ;;  %61 = vst [vmem:[#allocation4 + $0x30] sm:$0xff] %v60_v0  ;;  %v66_v3 = vld [vmem:[%s5508_s3 + $0x18] sm:$0xff]  ;;  %v68_v4 = vld [vmem:[%s5508_s3 + $0x20] sm:$0xff]  ;;  %vm148_vm0 = vcmask 269312   ;;  %s46_s12 = int_to_ptr.vmem [resolvable:$true] %s45_s12 }
   0x8   :  { %48 = dma.hbm_to_vmem [thread:$0]  %s44_s10, 8192, %s46_s12, [#allocation6]  ;;  %63 = vst [vmem:[#allocation4] sm:$0xff] %v62_v1  ;;  %v70_v5 = vld [vmem:[%s5508_s3 + $0x28] sm:$0xff]  ;;  %v72_v6 = vld [vmem:[%s5508_s3 + $0x30] sm:$0xff]  ;;  %v74_v7 = vld [vmem:[%s5508_s3 + $0x38] sm:$0xff] }
   0x9   :  { %65 = vst [vmem:[#allocation4 + $0x58] sm:$0xff] %v64_v2  ;;  %v76_v8 = vld [vmem:[%s5508_s3 + $0x40] sm:$0xff]  ;;  %v78_v9 = vld [vmem:[%s5508_s3 + $0x48] sm:$0xff]  ;;  %v80_v10 = vld [vmem:[%s5508_s3 + $0x50] sm:$0xff]  ;;  %v3715_v54 = vmov 0.0  }
   0xa   :  { %67 = vst [vmem:[#allocation4 + $0x18] sm:$0xff] %v66_v3  ;;  %v82_v11 = vld [vmem:[%s5508_s3 + $0x58] sm:$0xff]  ;;  %v84_v12 = vld [vmem:[%s5508_s3 + $0x60] sm:$0xff]  ;;  %v86_v13 = vld [vmem:[%s5508_s3 + $0x68] sm:$0xff] }
   0xb   :  { %69 = vst [vmem:[#allocation4 + $0x50] sm:$0xff] %v68_v4  ;;  %v88_v14 = vld [vmem:[%s5508_s3 + $0x70] sm:$0xff]  ;;  %v90_v15 = vld [vmem:[%s5508_s3 + $0x78] sm:$0xff]  ;;  %v3069_v16 = vld [vmem:[#allocation7 + $0xe0] sm:$0xf] }
   0xc   :  { %71 = vst [vmem:[#allocation4 + $0x68] sm:$0xff] %v70_v5  ;;  %v3468_v17 = vld [vmem:[#allocation7 + $0xec] sm:$0xf0]  ;;  %v3466_v18 = vld [vmem:[#allocation7 + $0xe4] sm:$0xf]  ;;  %v133_v55 = vld [vmem:[%s5505_s0 + $0x8] sm:$0xff] }
   0xd   :  { %73 = vst [vmem:[#allocation4 + $0x8] sm:$0xff] %v72_v6  ;;  %v3070_v19 = vor.u32 %v3468_v17, %v3069_v16  ;;  %v3071_v20 = vld [vmem:[#allocation7 + $0xf0] sm:$0xf0]  ;;  %v3053_v21 = vld [vmem:[#allocation7 + $0xc0] sm:$0xf] }
   0xe   :  { %75 = vst [vmem:[#allocation4 + $0x48] sm:$0xff] %v74_v7  ;;  %v3464_v22 = vld [vmem:[#allocation7 + $0xcc] sm:$0xf0]  ;;  %v3814_v23 = vor.u32 %v3466_v18, %v3071_v20  ;;  %v3462_v24 = vld [vmem:[#allocation7 + $0xc4] sm:$0xf] }
   0xf   :  { %77 = vst [vmem:[#allocation4 + $0x40] sm:$0xff] %v76_v8  ;;  %v3055_v25 = vld [vmem:[#allocation7 + $0xd0] sm:$0xf0]  ;;  %381 = vmatpush.bf16.msra.mxu0 %v3070_v19  ;;  %3558 = vmatpush.bf16.msra.mxu3 %v3070_v19  ;;  %v3054_v26 = vor.u32 %v3464_v22, %v3053_v21  ;;  %v3037_v28 = vld [vmem:[#allocation7 + $0xa0] sm:$0xf] }
  0x10   :  { %79 = vst [vmem:[#allocation4 + $0x20] sm:$0xff] %v78_v9  ;;  %3566 = vmatpush.bf16.msra.mxu1 %v3814_v23  ;;  %v3817_v27 = vor.u32 %v3462_v24, %v3055_v25  ;;  %v3460_v29 = vld [vmem:[#allocation7 + $0xac] sm:$0xf0]  ;;  %v3458_v30 = vld [vmem:[#allocation7 + $0xa4] sm:$0xf] }
  0x11   :  { %81 = vst [vmem:[#allocation4 + $0x10] sm:$0xff] %v80_v10  ;;  %v3039_v31 = vld [vmem:[#allocation7 + $0xb0] sm:$0xf0]  ;;  %v3077_v32 = vld [vmem:[#allocation7 + $0xe8] sm:$0xf]  ;;  %v3038_v33 = vor.u32 %v3460_v29, %v3037_v28  ;;  %v132_v52 = vld [vmem:[%s5505_s0] sm:$0xff] }
  0x12   :  { %83 = vst [vmem:[#allocation4 + $0x38] sm:$0xff] %v82_v11  ;;  %v3469_v34 = vld [vmem:[#allocation7 + $0xf4] sm:$0xf0]  ;;  %v3820_v35 = vor.u32 %v3458_v30, %v3039_v31  ;;  %v3021_v36 = vld [vmem:[#allocation7 + $0x80] sm:$0xf] }
  0x13   :  { %85 = vst [vmem:[#allocation4 + $0x60] sm:$0xff] %v84_v12  ;;  %382 = vmatpush.bf16.msra.mxu0 %v3054_v26  ;;  %3559 = vmatpush.bf16.msra.mxu3 %v3054_v26  ;;  %v3456_v37 = vld [vmem:[#allocation7 + $0x8c] sm:$0xf0]  ;;  %v3822_v38 = vor.u32 %v3469_v34, %v3077_v32  ;;  %v3061_v39 = vld [vmem:[#allocation7 + $0xc8] sm:$0xf] }
  0x14   :  { %87 = vst [vmem:[#allocation4 + $0x70] sm:$0xff] %v86_v13  ;;  %3567 = vmatpush.bf16.msra.mxu1 %v3817_v27  ;;  %v3454_v40 = vld [vmem:[#allocation7 + $0x84] sm:$0xf]  ;;  %v3023_v41 = vld [vmem:[#allocation7 + $0x90] sm:$0xf0]  ;;  %v3022_v44 = vor.u32 %v3456_v37, %v3021_v36 }
  0x15   :  { %89 = vst [vmem:[#allocation4 + $0x78] sm:$0xff] %v88_v14  ;;  %v3465_v42 = vld [vmem:[#allocation7 + $0xd4] sm:$0xf0]  ;;  %3574 = vmatpush.bf16.msra.mxu2 %v3822_v38  ;;  %v3045_v45 = vld [vmem:[#allocation7 + $0xa8] sm:$0xf]  ;;  %v3828_v47 = vor.u32 %v3454_v40, %v3023_v41 }
  0x16   :  { %91 = vst [vmem:[#allocation4 + $0x28] sm:$0xff] %v90_v15  ;;  %v3825_v43 = vor.u32 %v3465_v42, %v3061_v39  ;;  %v3461_v46 = vld [vmem:[#allocation7 + $0xb4] sm:$0xf0]  ;;  %v3005_v48 = vld [vmem:[#allocation7 + $0x60] sm:$0xf] }
  0x17   :  { %383 = vmatpush.bf16.msra.mxu0 %v3038_v33  ;;  %3560 = vmatpush.bf16.msra.mxu3 %v3038_v33  ;;  %v3452_v49 = vld [vmem:[#allocation7 + $0x6c] sm:$0xf0]  ;;  %v3450_v50 = vld [vmem:[#allocation7 + $0x64] sm:$0xf]  ;;  %v3007_v51 = vld [vmem:[#allocation7 + $0x70] sm:$0xf0]  ;;  %v3834_v53 = vor.u32 %v3461_v46, %v3045_v45 }
  0x18   :  { %3568 = vmatpush.bf16.msra.mxu1 %v3820_v35  ;;  %116 = vst [vmem:[#allocation2] sm:$0xff] %v3715_v54  ;;  %v3006_v56 = vor.u32 %v3452_v49, %v3005_v48  ;;  %v3029_v57 = vld [vmem:[#allocation7 + $0x88] sm:$0xf]  ;;  %v3457_v58 = vld [vmem:[#allocation7 + $0x94] sm:$0xf0]  ;;  %v3842_v59 = vor.u32 %v3450_v50, %v3007_v51 }
  0x19   :  { %3575 = vmatpush.bf16.msra.mxu2 %v3825_v43  ;;  %117 = vst [vmem:[#allocation2 + $0x8] sm:$0xff] %v3715_v54  ;;  %v2989_v60 = vld [vmem:[#allocation7 + $0x40] sm:$0xf]  ;;  %v3448_v61 = vld [vmem:[#allocation7 + $0x4c] sm:$0xf0]  ;;  %v3847_v1 = vor.u32 %v3457_v58, %v3029_v57 }
  0x1a   :  { %149 = vst.msk [vmem:[#allocation2] sm:$0xff] %vm148_vm0, %v132_v52  ;;  %v3446_v62 = vld [vmem:[#allocation7 + $0x44] sm:$0xf]  ;;  %v2991_v63 = vld [vmem:[#allocation7 + $0x50] sm:$0xf0]  ;;  %v2990_v2 = vor.u32 %v3448_v61, %v2989_v60 }
  0x1b   :  { %384 = vmatpush.bf16.msra.mxu0 %v3022_v44  ;;  %3561 = vmatpush.bf16.msra.mxu3 %v3022_v44  ;;  %150 = vst.msk [vmem:[#allocation2 + $0x8] sm:$0xff] %vm148_vm0, %v133_v55  ;;  %v2973_v0 = vld [vmem:[#allocation7 + $0x20] sm:$0xf]  ;;  %v3013_v3 = vld [vmem:[#allocation7 + $0x68] sm:$0xf]  ;;  %v3852_v5 = vor.u32 %v3446_v62, %v2991_v63 }
  0x1c   :  { %3569 = vmatpush.bf16.msra.mxu1 %v3828_v47  ;;  %118 = vst [vmem:[#allocation2 + $0x10] sm:$0xff] %v3715_v54  ;;  %v3453_v4 = vld [vmem:[#allocation7 + $0x74] sm:$0xf0]  ;;  %v3444_v6 = vld [vmem:[#allocation7 + $0x2c] sm:$0xf0] }
  0x1d   :  { %3576 = vmatpush.bf16.msra.mxu2 %v3834_v53  ;;  %119 = vst [vmem:[#allocation2 + $0x18] sm:$0xff] %v3715_v54 }
  0x1e   :  { %120 = vst [vmem:[#allocation2 + $0x20] sm:$0xff] %v3715_v54 }
  0x1f   :  { %385 = vmatpush.bf16.msra.mxu0 %v3006_v56  ;;  %3562 = vmatpush.bf16.msra.mxu3 %v3006_v56 }
  0x20   :  { %3570 = vmatpush.bf16.msra.mxu1 %v3842_v59 }
  0x21   :  { %97 = vsyncadd [#allocation6 + $0x1], 2048  ;;  %v3442_v7 = vld [vmem:[#allocation7 + $0x24] sm:$0xf]  ;;  %v2975_v8 = vld [vmem:[#allocation7 + $0x30] sm:$0xf0]  ;;  %3577 = vmatpush.bf16.msra.mxu2 %v3847_v1  ;;  %v3858_v11 = vor.u32 %v3453_v4, %v3013_v3  ;;  %v2974_v12 = vor.u32 %v3444_v6, %v2973_v0 }
  0x22   :  { %121 = vst [vmem:[#allocation2 + $0x28] sm:$0xff] %v3715_v54  ;;  %v2957_v9 = vld [vmem:[#allocation7] sm:$0xf]  ;;  %v3440_v10 = vld [vmem:[#allocation7 + $0xc] sm:$0xf0]  ;;  %v3862_v15 = vor.u32 %v3442_v7, %v2975_v8  ;;  %v166_v25 = vld [vmem:[#allocation2 + $0x8] sm:$0xff] }
  0x23   :  { %122 = vst [vmem:[#allocation2 + $0x30] sm:$0xff] %v3715_v54  ;;  %386 = vmatpush.bf16.msra.mxu0 %v2990_v2  ;;  %3563 = vmatpush.bf16.msra.mxu3 %v2990_v2  ;;  %v2997_v13 = vld [vmem:[#allocation7 + $0x48] sm:$0xf]  ;;  %v3449_v14 = vld [vmem:[#allocation7 + $0x54] sm:$0xf0]  ;;  %v2958_v22 = vor.u32 %v3440_v10, %v2957_v9  ;;  %v165_v24 = vld [vmem:[#allocation2] sm:$0xff] }
  0x24   :  { %123 = vst [vmem:[#allocation2 + $0x38] sm:$0xff] %v3715_v54  ;;  %3571 = vmatpush.bf16.msra.mxu1 %v3852_v5  ;;  %v3438_v16 = vld [vmem:[#allocation7 + $0x4] sm:$0xf]  ;;  %v2959_v17 = vld [vmem:[#allocation7 + $0x10] sm:$0xf0]  ;;  %v3868_v20 = vor.u32 %v3449_v14, %v2997_v13  ;;  %v3879_v33 = vpack.c.bf16 %v166_v25, %v165_v24  ;;  %v137_v34 = vld [vmem:[%s5505_s0 + $0x28] sm:$0xff] }
  0x25   :  { %124 = vst [vmem:[#allocation2 + $0x40] sm:$0xff] %v3715_v54  ;;  %v3467_v18 = vld [vmem:[#allocation7 + $0xec] sm:$0xf]  ;;  %v3079_v19 = vld [vmem:[#allocation7 + $0xf8] sm:$0xf0]  ;;  %3578 = vmatpush.bf16.msra.mxu2 %v3858_v11  ;;  %v3872_v28 = vor.u32 %v3438_v16, %v2959_v17  ;;  %v136_v30 = vld [vmem:[%s5505_s0 + $0x20] sm:$0xff] }
  0x26   :  { %125 = vst [vmem:[#allocation2 + $0x48] sm:$0xff] %v3715_v54  ;;  %v2981_v21 = vld [vmem:[#allocation7 + $0x28] sm:$0xf]  ;;  %v3445_v26 = vld [vmem:[#allocation7 + $0x34] sm:$0xf0]  ;;  %v3082_v29 = vor.u32 %v3467_v18, %v3079_v19  ;;  %v134_v40 = vld [vmem:[%s5505_s0 + $0x10] sm:$0xff] }
  0x27   :  { %126 = vst [vmem:[#allocation2 + $0x50] sm:$0xff] %v3715_v54  ;;  %387 = vmatpush.bf16.msra.mxu0 %v2974_v12  ;;  %3564 = vmatpush.bf16.msra.mxu3 %v2974_v12  ;;  %v3463_v31 = vld [vmem:[#allocation7 + $0xcc] sm:$0xf]  ;;  %v3063_v32 = vld [vmem:[#allocation7 + $0xd8] sm:$0xf0]  ;;  %v3886_v36 = vor.u32 %v3445_v26, %v2981_v21  ;;  %v138_v44 = vld [vmem:[%s5505_s0 + $0x30] sm:$0xff] }
  0x28   :  { %127 = vst [vmem:[#allocation2 + $0x58] sm:$0xff] %v3715_v54  ;;  %3572 = vmatpush.bf16.msra.mxu1 %v3862_v15  ;;  %v2965_v37 = vld [vmem:[#allocation7 + $0x8] sm:$0xf]  ;;  %v3441_v39 = vld [vmem:[#allocation7 + $0x14] sm:$0xf0]  ;;  %v3066_v41 = vor.u32 %v3463_v31, %v3063_v32  ;;  %v142_v61 = vld [vmem:[%s5505_s0 + $0x50] sm:$0xff] }
  0x29   :  { %128 = vst [vmem:[#allocation2 + $0x60] sm:$0xff] %v3715_v54  ;;  %3579 = vmatpush.bf16.msra.mxu2 %v3868_v20  ;;  %v135_v42 = vld [vmem:[%s5505_s0 + $0x18] sm:$0xff]  ;;  %v3459_v45 = vld [vmem:[#allocation7 + $0xac] sm:$0xf]  ;;  %v3904_v48 = vor.u32 %v3441_v39, %v2965_v37  ;;  %v144_v7 = vld [vmem:[%s5505_s0 + $0x60] sm:$0xff]  ;;  %s106_s28 = sshll.u32 %s5509_s4, 4  ;;  %s107_s28 = int_to_ptr.hbm [resolvable:$true] %s106_s28 }
  0x2a   :  { %129 = vst [vmem:[#allocation2 + $0x68] sm:$0xff] %v3715_v54  ;;  %v3047_v46 = vld [vmem:[#allocation7 + $0xb8] sm:$0xf0]  ;;  %v141_v51 = vld [vmem:[%s5505_s0 + $0x48] sm:$0xff]  ;;  %v146_v14 = vld [vmem:[%s5505_s0 + $0x70] sm:$0xff]  ;;  %s3716_s29 = smov [#allocation5]  }
  0x2b   :  { %130 = vst [vmem:[#allocation2 + $0x70] sm:$0xff] %v3715_v54  ;;  %388 = vmatpush.bf16.msra.mxu0 %v2958_v22  ;;  %3565 = vmatpush.bf16.msra.mxu3 %v2958_v22  ;;  %v139_v49 = vld [vmem:[%s5505_s0 + $0x38] sm:$0xff]  ;;  %v3050_v50 = vor.u32 %v3459_v45, %v3047_v46  ;;  %v3455_v57 = vld [vmem:[#allocation7 + $0x8c] sm:$0xf]  ;;  %s108_s30 = sshll.u32 %s3716_s29, 4  ;;  %s109_s30 = int_to_ptr.vmem [resolvable:$true] %s108_s30 }
  0x2c   :  { %131 = vst [vmem:[#allocation2 + $0x78] sm:$0xff] %v3715_v54  ;;  %3573 = vmatpush.bf16.msra.mxu1 %v3872_v28  ;;  %v3031_v58 = vld [vmem:[#allocation7 + $0x98] sm:$0xf0]  ;;  %v3447_v4 = vld [vmem:[#allocation7 + $0x4c] sm:$0xf] }
  0x2d   :  { %153 = vst.msk [vmem:[#allocation2 + $0x20] sm:$0xff] %vm148_vm0, %v136_v30  ;;  %3580 = vmatpush.bf16.msra.mxu2 %v3886_v36  ;;  %v3034_v60 = vor.u32 %v3455_v57, %v3031_v58  ;;  %v143_v62 = vld [vmem:[%s5505_s0 + $0x58] sm:$0xff]  ;;  %v3439_v17 = vld [vmem:[#allocation7 + $0xc] sm:$0xf]  ;;  %111 = dma.hbm_to_vmem [thread:$0]  %s107_s28, 1024, %s109_s30, [#allocation6 + $0x2] }
  0x2e   :  { %154 = vst.msk [vmem:[#allocation2 + $0x28] sm:$0xff] %vm148_vm0, %v137_v34  ;;  %389 = vmatmul.bf16.vlgmr.msra.gmra.mxu0 %v3879_v33  ;;  %v3015_v3 = vld [vmem:[#allocation7 + $0x78] sm:$0xf0] }
  0x2f   :  { %528 = vmatpush.bf16.msrb.mxu3 %v3082_v29  ;;  %430 = vmatpush.bf16.msrb.mxu0 %v3814_v23  ;;  %151 = vst.msk [vmem:[#allocation2 + $0x10] sm:$0xff] %vm148_vm0, %v134_v40  ;;  %v140_v23 = vld [vmem:[%s5505_s0 + $0x40] sm:$0xff]  ;;  %v2999_v6 = vld [vmem:[#allocation7 + $0x58] sm:$0xf0] }
  0x30   :  { %152 = vst.msk [vmem:[#allocation2 + $0x18] sm:$0xff] %vm148_vm0, %v135_v42  ;;  %v3002_v8 = vor.u32 %v3447_v4, %v2999_v6  ;;  %v2983_v13 = vld [vmem:[#allocation7 + $0x38] sm:$0xf0] }
  0x31   :  { %155 = vst.msk [vmem:[#allocation2 + $0x30] sm:$0xff] %vm148_vm0, %v138_v44  ;;  %3581 = vmatpush.bf16.msra.mxu2 %v3904_v48  ;;  %v2967_v18 = vld [vmem:[#allocation7 + $0x18] sm:$0xf0] }
  0x32   :  { %156 = vst.msk [vmem:[#allocation2 + $0x38] sm:$0xff] %vm148_vm0, %v139_v49 }
  0x33   :  { %529 = vmatpush.bf16.msrb.mxu3 %v3066_v41  ;;  %431 = vmatpush.bf16.msrb.mxu0 %v3817_v27  ;;  %157 = vst.msk [vmem:[#allocation2 + $0x40] sm:$0xff] %vm148_vm0, %v140_v23 }
  0x34   :  { %v169_v52 = vld [vmem:[#allocation2 + $0x20] sm:$0xff]  ;;  %158 = vst.msk [vmem:[#allocation2 + $0x48] sm:$0xff] %vm148_vm0, %v141_v51 }
  0x35   :  { %v170_v54 = vld [vmem:[#allocation2 + $0x28] sm:$0xff]  ;;  %159 = vst.msk [vmem:[#allocation2 + $0x50] sm:$0xff] %vm148_vm0, %v142_v61 }
  0x36   :  { %v3923_v55 = vpack.c.bf16 %v170_v54, %v169_v52  ;;  %v167_v56 = vld [vmem:[#allocation2 + $0x10] sm:$0xff]  ;;  %160 = vst.msk [vmem:[#allocation2 + $0x58] sm:$0xff] %vm148_vm0, %v143_v62 }
  0x37   :  { %530 = vmatpush.bf16.msrb.mxu3 %v3050_v50  ;;  %432 = vmatpush.bf16.msrb.mxu0 %v3820_v35  ;;  %v168_v27 = vld [vmem:[#allocation2 + $0x18] sm:$0xff]  ;;  %161 = vst.msk [vmem:[#allocation2 + $0x60] sm:$0xff] %vm148_vm0, %v144_v7 }
  0x38   :  { %399 = vmatmul.bf16.vlgmr.msra.gmra.mxu3 %v3923_v55  ;;  %448 = vmatmul.bf16.vlgmr.msra.gmra.mxu1 %v3923_v55  ;;  %v3937_v35 = vpack.c.bf16 %v168_v27, %v167_v56  ;;  %v171_v63 = vld [vmem:[#allocation2 + $0x30] sm:$0xff]  ;;  %163 = vst.msk [vmem:[#allocation2 + $0x70] sm:$0xff] %vm148_vm0, %v146_v14 }
  0x39   :  { %497 = vmatmul.bf16.vlgmr.msra.gmra.mxu2 %v3923_v55  ;;  %v172_v0 = vld [vmem:[#allocation2 + $0x38] sm:$0xff] }
  0x3a   :  { %v3943_v2 = vpack.c.bf16 %v172_v0, %v171_v63  ;;  %v173_v9 = vld [vmem:[#allocation2 + $0x40] sm:$0xff] }
  0x3b   :  { %433 = vmatpush.bf16.msrb.mxu0 %v3828_v47  ;;  %531 = vmatpush.bf16.msrb.mxu3 %v3034_v60  ;;  %v3451_v47 = vld [vmem:[#allocation7 + $0x6c] sm:$0xf] }
  0x3c   :  { %v174_v10 = vld [vmem:[#allocation2 + $0x48] sm:$0xff] }
  0x3d   :  { %v3961_v12 = vpack.c.bf16 %v174_v10, %v173_v9  ;;  %v176_v16 = vld [vmem:[#allocation2 + $0x58] sm:$0xff] }
  0x3e   :  { %394 = vmatmul.bf16.gmra.mxu0 %v3937_v35  ;;  %v177_v19 = vld [vmem:[#allocation2 + $0x60] sm:$0xff] }
  0x3f   :  { %434 = vmatpush.bf16.msrb.mxu0 %v3842_v59  ;;  %v3018_v59 = vor.u32 %v3451_v47, %v3015_v3  ;;  %v179_v22 = vld [vmem:[#allocation2 + $0x70] sm:$0xff] }
  0x41   :  { %532 = vmatpush.bf16.msrb.mxu3 %v3018_v59 }
  0x43   :  { %435 = vmatpush.bf16.msrb.mxu0 %v3852_v5  ;;  %v145_v5 = vld [vmem:[%s5505_s0 + $0x68] sm:$0xff] }
  0x44   :  { %162 = vst.msk [vmem:[#allocation2 + $0x68] sm:$0xff] %vm148_vm0, %v145_v5 }
  0x45   :  { %533 = vmatpush.bf16.msrb.mxu3 %v3002_v8 }
  0x47   :  { %436 = vmatpush.bf16.msrb.mxu0 %v3862_v15  ;;  %v147_v15 = vld [vmem:[%s5505_s0 + $0x78] sm:$0xff] }
  0x48   :  { %404 = vmatmul.bf16.gmra.mxu3 %v3943_v2  ;;  %453 = vmatmul.bf16.gmra.mxu1 %v3943_v2  ;;  %164 = vst.msk [vmem:[#allocation2 + $0x78] sm:$0xff] %vm148_vm0, %v147_v15 }
  0x49   :  { %502 = vmatmul.bf16.gmra.mxu2 %v3943_v2 }
  0x4b   :  { %437 = vmatpush.bf16.msrb.mxu0 %v3872_v28 }
  0x4e   :  { %438 = vmatmul.bf16.vlgmr.msrb.gmra.mxu0 %v3879_v33 }
  0x4f   :  { %479 = vmatpush.bf16.msra.mxu0 %v3822_v38  ;;  %v3443_v38 = vld [vmem:[#allocation7 + $0x2c] sm:$0xf]  ;;  %v180_v24 = vld [vmem:[#allocation2 + $0x78] sm:$0xff] }
  0x50   :  { %v3993_v25 = vpack.c.bf16 %v180_v24, %v179_v22 }
  0x53   :  { %480 = vmatpush.bf16.msra.mxu0 %v3825_v43  ;;  %v2986_v43 = vor.u32 %v3443_v38, %v2983_v13 }
  0x55   :  { %534 = vmatpush.bf16.msrb.mxu3 %v2986_v43 }
  0x57   :  { %481 = vmatpush.bf16.msra.mxu0 %v3834_v53  ;;  %v175_v53 = vld [vmem:[#allocation2 + $0x50] sm:$0xff] }
  0x58   :  { %409 = vmatmul.bf16.gmra.mxu3 %v3961_v12  ;;  %458 = vmatmul.bf16.gmra.mxu1 %v3961_v12 }
  0x59   :  { %507 = vmatmul.bf16.gmra.mxu2 %v3961_v12 }
  0x5b   :  { %482 = vmatpush.bf16.msra.mxu0 %v3847_v1  ;;  %v3979_v1 = vpack.c.bf16 %v176_v16, %v175_v53 }
  0x5e   :  { %443 = vmatmul.bf16.gmra.mxu0 %v3937_v35 }
  0x5f   :  { %483 = vmatpush.bf16.msra.mxu0 %v3858_v11  ;;  %v2970_v11 = vor.u32 %v3439_v17, %v2967_v18 }
  0x61   :  { %535 = vmatpush.bf16.msrb.mxu3 %v2970_v11 }
  0x63   :  { %484 = vmatpush.bf16.msra.mxu0 %v3868_v20  ;;  %v178_v20 = vld [vmem:[#allocation2 + $0x68] sm:$0xff] }
  0x64   :  { %v3987_v21 = vpack.c.bf16 %v178_v20, %v177_v19 }
  0x67   :  { %485 = vmatpush.bf16.msra.mxu0 %v3886_v36 }
  0x68   :  { %414 = vmatmul.bf16.gmra.mxu3 %v3979_v1  ;;  %463 = vmatmul.bf16.gmra.mxu1 %v3979_v1 }
  0x69   :  { %512 = vmatmul.bf16.gmra.mxu2 %v3979_v1 }
  0x6b   :  { %486 = vmatpush.bf16.msra.mxu0 %v3904_v48 }
  0x6e   :  { %487 = vmatmul.bf16.vlgmr.msra.gmra.mxu0 %v3879_v33 }
  0x78   :  { %419 = vmatmul.bf16.gmra.mxu3 %v3987_v21  ;;  %468 = vmatmul.bf16.gmra.mxu1 %v3987_v21 }
  0x79   :  { %517 = vmatmul.bf16.gmra.mxu2 %v3987_v21 }
  0x7e   :  { %492 = vmatmul.bf16.gmra.mxu0 %v3937_v35 }
  0x88   :  { %424 = vmatmul.bf16.gmra.mxu3 %v3993_v25  ;;  %473 = vmatmul.bf16.gmra.mxu1 %v3993_v25 }
  0x89   :  { %522 = vmatmul.bf16.gmra.mxu2 %v3993_v25 }
  0x98   :  { %536 = vmatmul.bf16.vlgmr.msrb.gmra.mxu3 %v3879_v33 }
  0xa8   :  { %541 = vmatmul.bf16.gmra.mxu3 %v3937_v35 }
  0xab   :  { %v4000_v26 = vpop.f32.mrf.mxu0 }
  0xac   :  { %v665_v6 = vmul.f32 %v4000_v26, %v4000_v26 }
  0xb3   :  { %v4002_v28 = vpop.f32.mrf.mxu0 }
  0xb4   :  { %v669_v7 = vmul.f32 %v4002_v28, %v4002_v28  ;;  %v577_v13 = vadd.f32 %v4002_v28, %v4000_v26 }
  0xb5   :  { %v4004_v29 = vpop.f32.mrf.mxu1 }
  0xb6   :  { %v682_v63 = vmul.f32 %v4004_v29, %v4004_v29  ;;  %v729_v53 = vadd.f32 %v669_v7, %v665_v6 }
  0xb8   :  { %546 = vmatmul.bf16.gmra.mxu3 %v3923_v55 }
  0xbb   :  { %v4007_v30 = vpop.f32.mrf.mxu3  ;;  %v4009_v31 = vpop.f32.mrf.mxu0 }
  0xbc   :  { %v4011_v32 = vpop.f32.mrf.mxu2  ;;  %v673_v16 = vmul.f32 %v4009_v31, %v4009_v31  ;;  %v578_v11 = vadd.f32 %v577_v13, %v4009_v31 }
  0xbd   :  { %5532 = vst [vmem:[#allocation23_spill] sm:$0xff] %v4011_v32  ;;  %v4013_v34 = vpop.f32.mrf.mxu1 }
  0xbe   :  { %v686_v3 = vmul.f32 %v4013_v34, %v4013_v34  ;;  %v730_v22 = vadd.f32 %v729_v53, %v673_v16 }
  0xc3   :  { %v4015_v36 = vpop.f32.mrf.mxu3  ;;  %v4017_v33 = vpop.f32.mrf.mxu0 }
  0xc4   :  { %v4019_v37 = vpop.f32.mrf.mxu2  ;;  %v677_v24 = vmul.f32 %v4017_v33, %v4017_v33 }
  0xc5   :  { %5533 = vst [vmem:[#allocation24_spill] sm:$0xff] %v4019_v37  ;;  %v4021_v39 = vpop.f32.mrf.mxu1 }
  0xc6   :  { %v690_v5 = vmul.f32 %v4021_v39, %v4021_v39 }
  0xc8   :  { %551 = vmatmul.bf16.gmra.mxu3 %v3943_v2 }
  0xcb   :  { %v4024_v40 = vpop.f32.mrf.mxu3  ;;  %v4026_v41 = vpop.f32.mrf.mxu0 }
  0xcc   :  { %v4028_v42 = vpop.f32.mrf.mxu2  ;;  %v666_v23 = vmul.f32 %v4026_v41, %v4026_v41 }
  0xcd   :  { %5534 = vst [vmem:[#allocation25_spill] sm:$0xff] %v4028_v42  ;;  %v4030_v44 = vpop.f32.mrf.mxu1 }
  0xce   :  { %v694_v14 = vmul.f32 %v4030_v44, %v4030_v44 }
  0xd3   :  { %v4032_v45 = vpop.f32.mrf.mxu3  ;;  %v4034_v46 = vpop.f32.mrf.mxu0 }
  0xd4   :  { %v4036_v48 = vpop.f32.mrf.mxu2  ;;  %v670_v51 = vmul.f32 %v4034_v46, %v4034_v46  ;;  %v598_v55 = vadd.f32 %v4034_v46, %v4026_v41 }
  0xd5   :  { %5535 = vst [vmem:[#allocation26_spill] sm:$0xff] %v4036_v48  ;;  %v4038_v49 = vpop.f32.mrf.mxu1 }
  0xd6   :  { %v750_v27 = vadd.f32 %v670_v51, %v666_v23  ;;  %v698_v19 = vmul.f32 %v4038_v49, %v4038_v49 }
  0xd8   :  { %556 = vmatmul.bf16.gmra.mxu3 %v3961_v12 }
  0xdb   :  { %v4043_v50 = vpop.f32.mrf.mxu3  ;;  %v4047_v52 = vpop.f32.mrf.mxu0 }
  0xdc   :  { %v4049_v54 = vpop.f32.mrf.mxu2  ;;  %v674_v57 = vmul.f32 %v4047_v52, %v4047_v52  ;;  %v599_v58 = vadd.f32 %v598_v55, %v4047_v52  ;;  %v579_v55 = vadd.f32 %v578_v11, %v4017_v33 }
  0xdd   :  { %5536 = vst [vmem:[#allocation27_spill] sm:$0xff] %v4049_v54  ;;  %v4053_v56 = vpop.f32.mrf.mxu1 }
  0xde   :  { %v751_v61 = vadd.f32 %v750_v27, %v674_v57  ;;  %v702_v27 = vmul.f32 %v4053_v56, %v4053_v56 }
  0xe3   :  { %v4058_v60 = vpop.f32.mrf.mxu3  ;;  %v4060_v62 = vpop.f32.mrf.mxu0 }
  0xe4   :  { %v4062_v35 = vpop.f32.mrf.mxu2  ;;  %v600_v2 = vadd.f32 %v599_v58, %v4060_v62  ;;  %v678_v47 = vmul.f32 %v4060_v62, %v4060_v62 }
  0xe5   :  { %5537 = vst [vmem:[#allocation28_spill] sm:$0xff] %v4062_v35  ;;  %v4066_v0 = vpop.f32.mrf.mxu1 }
  0xe6   :  { %v601_v4 = vadd.f32 %v600_v2, %v4004_v29  ;;  %v752_v59 = vadd.f32 %v751_v61, %v678_v47 }
  0xe8   :  { %561 = vmatmul.bf16.gmra.mxu3 %v3979_v1  ;;  %v602_v8 = vadd.f32 %v601_v4, %v4013_v34  ;;  %v753_v9 = vadd.f32 %v752_v59, %v682_v63  ;;  %v731_v63 = vadd.f32 %v730_v22, %v677_v24  ;;  %v580_v4 = vadd.f32 %v579_v55, %v4007_v30 }
  0xe9   :  { %v706_v59 = vmul.f32 %v4066_v0, %v4066_v0 }
  0xea   :  { %v603_v12 = vadd.f32 %v602_v8, %v4021_v39  ;;  %v754_v38 = vadd.f32 %v753_v9, %v686_v3  ;;  %v681_v3 = vmul.f32 %v4007_v30, %v4007_v30  ;;  %v685_v8 = vmul.f32 %v4015_v36, %v4015_v36 }
  0xeb   :  { %v4082_v10 = vpop.f32.mrf.mxu3  ;;  %v4089_v43 = vpop.f32.mrf.mxu0  ;;  %v581_v13 = vadd.f32 %v580_v4, %v4015_v36  ;;  %v697_v4 = vmul.f32 %v4043_v50, %v4043_v50 }
  0xec   :  { %v4091_v15 = vpop.f32.mrf.mxu2  ;;  %v755_v1 = vadd.f32 %v754_v38, %v690_v5  ;;  %v604_v18 = vadd.f32 %v603_v12, %v4030_v44  ;;  %v732_v7 = vadd.f32 %v731_v63, %v681_v3  ;;  %v667_v9 = vmul.f32 %v4089_v43, %v4089_v43 }
  0xed   :  { %5538 = vst [vmem:[#allocation29_spill] sm:$0xff] %v4091_v15  ;;  %v4095_v17 = vpop.f32.mrf.mxu1  ;;  %v693_v3 = vmul.f32 %v4032_v45, %v4032_v45 }
  0xee   :  { %v756_v20 = vadd.f32 %v755_v1, %v694_v14  ;;  %v605_v23 = vadd.f32 %v604_v18, %v4038_v49  ;;  %v710_v14 = vmul.f32 %v4095_v17, %v4095_v17  ;;  %v733_v1 = vadd.f32 %v732_v7, %v685_v8 }
  0xef   :  { %v683_v7 = vmul.f32 %v4011_v32, %v4011_v32 }
  0xf0   :  { %v757_v57 = vadd.f32 %v756_v20, %v698_v19  ;;  %v606_v47 = vadd.f32 %v605_v23, %v4053_v56  ;;  %v689_v20 = vmul.f32 %v4024_v40, %v4024_v40  ;;  %v582_v23 = vadd.f32 %v581_v13, %v4024_v40 }
  0xf2   :  { %v758_v6 = vadd.f32 %v757_v57, %v702_v27  ;;  %v607_v5 = vadd.f32 %v606_v47, %v4066_v0  ;;  %v734_v57 = vadd.f32 %v733_v1, %v689_v20  ;;  %v687_v20 = vmul.f32 %v4019_v37, %v4019_v37 }
  0xf3   :  { %v4104_v51 = vpop.f32.mrf.mxu3  ;;  %v4109_v58 = vpop.f32.mrf.mxu0 }
  0xf4   :  { %v4111_v61 = vpop.f32.mrf.mxu2  ;;  %v671_v38 = vmul.f32 %v4109_v58, %v4109_v58  ;;  %v619_v11 = vadd.f32 %v4109_v58, %v4089_v43  ;;  %v608_v19 = vadd.f32 %v607_v5, %v4095_v17  ;;  %v583_v5 = vadd.f32 %v582_v23, %v4032_v45 }
  0xf5   :  { %5539 = vst [vmem:[#allocation30_spill] sm:$0xff] %v4111_v61  ;;  %v4113_v2 = vpop.f32.mrf.mxu1 }
  0xf6   :  { %v771_v22 = vadd.f32 %v671_v38, %v667_v9  ;;  %v714_v27 = vmul.f32 %v4113_v2, %v4113_v2  ;;  %v609_v47 = vadd.f32 %v608_v19, %v4113_v2 }
  0xf8   :  { %566 = vmatmul.bf16.gmra.mxu3 %v3987_v21  ;;  %v759_v21 = vadd.f32 %v758_v6, %v706_v59 }
  0xfa   :  { %v760_v55 = vadd.f32 %v759_v21, %v710_v14  ;;  %v735_v14 = vadd.f32 %v734_v57, %v693_v3  ;;  %v701_v21 = vmul.f32 %v4058_v60, %v4058_v60 }
  0xfb   :  { %v4127_v12 = vpop.f32.mrf.mxu3  ;;  %v4134_v53 = vpop.f32.mrf.mxu0 }
  0xfc   :  { %5540 = vst [vmem:[#allocation31_spill] sm:$0xff] %v4134_v53  ;;  %v4136_v16 = vpop.f32.mrf.mxu2  ;;  %v675_v24 = vmul.f32 %v4134_v53, %v4134_v53  ;;  %v620_v63 = vadd.f32 %v619_v11, %v4134_v53  ;;  %v761_v8 = vadd.f32 %v760_v55, %v714_v27  ;;  %v736_v23 = vadd.f32 %v735_v14, %v697_v4 }
  0xfd   :  { %5541 = vst [vmem:[#allocation32_spill] sm:$0xff] %v4136_v16  ;;  %v4138_v18 = vpop.f32.mrf.mxu1  ;;  %v705_v55 = vmul.f32 %v4082_v10, %v4082_v10 }
  0xfe   :  { %v772_v6 = vadd.f32 %v771_v22, %v675_v24  ;;  %v718_v9 = vmul.f32 %v4138_v18, %v4138_v18  ;;  %v584_v22 = vadd.f32 %v583_v5, %v4043_v50  ;;  %v610_v24 = vadd.f32 %v609_v47, %v4138_v18 }
  0xff   :  { %v737_v5 = vadd.f32 %v736_v23, %v701_v21  ;;  %v709_v47 = vmul.f32 %v4104_v51, %v4104_v51  ;;  %v699_v23 = vmul.f32 %v4049_v54, %v4049_v54 }
 0x100   :  { %v585_v3 = vadd.f32 %v584_v22, %v4058_v60 }
 0x103   :  { %v4156_v59 = vpop.f32.mrf.mxu3  ;;  %v4163_v38 = vpop.f32.mrf.mxu0 }
 0x104   :  { %5542 = vst [vmem:[#allocation33_spill] sm:$0xff] %v4163_v38  ;;  %v4165_v13 = vpop.f32.mrf.mxu2  ;;  %v621_v11 = vadd.f32 %v620_v63, %v4163_v38  ;;  %v679_v19 = vmul.f32 %v4163_v38, %v4163_v38  ;;  %v691_v63 = vmul.f32 %v4028_v42, %v4028_v42  ;;  %v762_v38 = vadd.f32 %v761_v8, %v718_v9 }
 0x105   :  { %5543 = vst [vmem:[#allocation34_spill] sm:$0xff] %v4165_v13  ;;  %v4169_v1 = vpop.f32.mrf.mxu1  ;;  %v738_v8 = vadd.f32 %v737_v5, %v705_v55  ;;  %v713_v9 = vmul.f32 %v4127_v12, %v4127_v12 }
 0x106   :  { %v622_v27 = vadd.f32 %v621_v11, %v4011_v32  ;;  %v773_v57 = vadd.f32 %v772_v6, %v679_v19  ;;  %v722_v53 = vmul.f32 %v4169_v1, %v4169_v1  ;;  %v695_v6 = vmul.f32 %v4036_v48, %v4036_v48 }
 0x107   :  { %v586_v11 = vadd.f32 %v585_v3, %v4082_v10  ;;  %v611_v19 = vadd.f32 %v610_v24, %v4169_v1  ;;  %v717_v3 = vmul.f32 %v4156_v59, %v4156_v59 }
 0x108   :  { %571 = vmatmul.bf16.gmra.mxu3 %v3993_v25  ;;  %v623_v4 = vadd.f32 %v622_v27, %v4019_v37  ;;  %v774_v14 = vadd.f32 %v773_v57, %v683_v7  ;;  %v763_v27 = vadd.f32 %v762_v38, %v722_v53  ;;  %v739_v57 = vadd.f32 %v738_v8, %v709_v47 }
 0x109   :  { %v587_v7 = vadd.f32 %v586_v11, %v4104_v51  ;;  %v703_v37 = vmul.f32 %v4062_v35, %v4062_v35 }
 0x10a   :  { %v624_v25 = vadd.f32 %v623_v4, %v4028_v42  ;;  %v775_v21 = vadd.f32 %v774_v14, %v687_v20  ;;  %v740_v38 = vadd.f32 %v739_v57, %v713_v9 }
 0x10b   :  { %v4196_v22 = vpop.f32.mrf.mxu3  ;;  %v588_v20 = vadd.f32 %v587_v7, %v4127_v12  ;;  %v707_v7 = vmul.f32 %v4091_v15, %v4091_v15 }
 0x10c   :  { %v625_v55 = vadd.f32 %v624_v25, %v4036_v48  ;;  %v776_v5 = vadd.f32 %v775_v21, %v691_v63  ;;  %v4213_v53 = vpop.f32.mrf.mxu2  ;;  %v721_v47 = vmul.f32 %v4196_v22, %v4196_v22 }
 0x10d   :  { %v4204_v24 = vpop.f32.mrf.mxu1  ;;  %5544 = vst [vmem:[#allocation35_spill] sm:$0xff] %v4213_v53  ;;  %v589_v63 = vadd.f32 %v588_v20, %v4156_v59 }
 0x10e   :  { %v612_v4 = vadd.f32 %v611_v19, %v4204_v24  ;;  %v726_v14 = vmul.f32 %v4204_v24, %v4204_v24  ;;  %v777_v11 = vadd.f32 %v776_v5, %v695_v6  ;;  %v626_v8 = vadd.f32 %v625_v55, %v4049_v54 }
 0x10f   :  { %v741_v19 = vadd.f32 %v740_v38, %v717_v3  ;;  %v590_v32 = vadd.f32 %v589_v63, %v4196_v22  ;;  %v711_v6 = vmul.f32 %v4111_v61, %v4111_v61 }
 0x110   :  { %v613_v25 = vrot.slane %v612_v4, 4  ;;  %v764_v21 = vadd.f32 %v763_v27, %v726_v14  ;;  %v627_v48 = vadd.f32 %v626_v8, %v4062_v35  ;;  %v778_v42 = vadd.f32 %v777_v11, %v699_v23 }
 0x111   :  { %v742_v5 = vadd.f32 %v741_v19, %v721_v47 }
 0x112   :  { %v614_v9 = vadd.f32 %v613_v25, %v612_v4  ;;  %v765_v57 = vrot.slane %v764_v21, 4  ;;  %v628_v55 = vadd.f32 %v627_v48, %v4091_v15  ;;  %v779_v20 = vadd.f32 %v778_v42, %v703_v37 }
 0x113   :  { %v4226_v54 = vpop.f32.mrf.mxu3  ;;  %v715_v4 = vmul.f32 %v4136_v16, %v4136_v16  ;;  %v719_v25 = vmul.f32 %v4165_v13, %v4165_v13 }
 0x114   :  { %v615_v27 = vrot.slane %v614_v9, 2  ;;  %v766_v14 = vadd.f32 %v765_v57, %v764_v21  ;;  %v591_v3 = vadd.f32 %v590_v32, %v4226_v54  ;;  %v725_v23 = vmul.f32 %v4226_v54, %v4226_v54  ;;  %v4237_v15 = vpop.f32.mrf.mxu2 }
 0x115   :  { %v629_v38 = vadd.f32 %v628_v55, %v4111_v61  ;;  %v780_v11 = vadd.f32 %v779_v20, %v707_v7  ;;  %v723_v7 = vmul.f32 %v4213_v53, %v4213_v53 }
 0x116   :  { %v616_v8 = vadd.f32 %v615_v27, %v614_v9  ;;  %v767_v47 = vrot.slane %v766_v14, 2  ;;  %v592_v63 = vrot.slane %v591_v3, 4  ;;  %v743_v48 = vadd.f32 %v742_v5, %v725_v23 }
 0x117   :  { %v630_v37 = vadd.f32 %v629_v38, %v4136_v16  ;;  %v781_v42 = vadd.f32 %v780_v11, %v711_v6 }
 0x118   :  { %v617_v32 = vrot.slane %v616_v8, 1  ;;  %v768_v21 = vadd.f32 %v767_v47, %v766_v14  ;;  %v593_v19 = vadd.f32 %v592_v63, %v591_v3  ;;  %v744_v57 = vrot.slane %v743_v48, 4 }
 0x119   :  { %v782_v55 = vadd.f32 %v781_v42, %v715_v4  ;;  %v631_v61 = vadd.f32 %v630_v37, %v4165_v13  ;;  %v727_v14 = vmul.f32 %v4237_v15, %v4237_v15 }
 0x11a   :  { %v618_v9 = vadd.f32 %v617_v32, %v616_v8  ;;  %v769_v5 = vrot.slane %v768_v21, 1  ;;  %v594_v20 = vrot.slane %v593_v19, 2  ;;  %v745_v27 = vadd.f32 %v744_v57, %v743_v48 }
 0x11b   :  { %v783_v6 = vadd.f32 %v782_v55, %v719_v25  ;;  %v4242_v23 = vpop.f32.mrf.mxu3  ;;  %v632_v38 = vadd.f32 %v631_v61, %v4213_v53 }
 0x11c   :  { %5545 = vst [vmem:[#allocation36_spill] sm:$0xff] %v4242_v23  ;;  %v662_v3 = vmul.f32 0.0078125, %v618_v9  ;;  %v770_v11 = vadd.f32 %v769_v5, %v768_v21  ;;  %v595_v4 = vadd.f32 %v594_v20, %v593_v19  ;;  %v746_v47 = vrot.slane %v745_v27, 2 }
 0x11d   :  { %v784_v63 = vadd.f32 %v783_v6, %v723_v7  ;;  %v633_v37 = vadd.f32 %v632_v38, %v4237_v15 }
 0x11e   :  { %v814_v42 = vmul.f32 0.0078125, %v770_v11  ;;  %v818_v8 = vmul.f32 %v662_v3, %v662_v3  ;;  %v596_v32 = vrot.slane %v595_v4, 1  ;;  %v747_v13 = vadd.f32 %v746_v47, %v745_v27 }
 0x11f   :  { %v634_v48 = vrot.slane %v633_v37, 4  ;;  %v785_v25 = vadd.f32 %v784_v63, %v727_v14 }
 0x120   :  { %v822_v57 = vsub.f32 %v814_v42, %v818_v8  ;;  %v597_v55 = vadd.f32 %v596_v32, %v595_v4  ;;  %v748_v23 = vrot.slane %v747_v13, 1 }
 0x121   :  { %v635_v61 = vadd.f32 %v634_v48, %v633_v37  ;;  %v786_v53 = vrot.slane %v785_v25, 4 }
 0x122   :  { %v826_v16 = vadd.f32 1e-05, %v822_v57  ;;  %v4248_v35 = vmul.f32 0.0078125, %v597_v55  ;;  %v749_v21 = vadd.f32 %v748_v23, %v747_v13 }
 0x123   :  { %v4250_v19 = vpop.f32.mrf.mxu3  ;;  %v636_v7 = vrot.slane %v635_v61, 2  ;;  %v787_v9 = vadd.f32 %v786_v53, %v785_v25 }
 0x124   :  { %3591 = vrsqrt.f32 %v826_v16  ;;  %v813_v5 = vmul.f32 0.0078125, %v749_v21  ;;  %v817_v20 = vmul.f32 %v4248_v35, %v4248_v35  ;;  %vm845_vm1 = vweird.f32 %v826_v16 }
 0x125   :  { %v637_v27 = vadd.f32 %v636_v7, %v635_v61  ;;  %v788_v6 = vrot.slane %v787_v9, 2 }
 0x126   :  { %v821_v38 = vsub.f32 %v813_v5, %v817_v20 }
 0x127   :  { %v638_v14 = vrot.slane %v637_v27, 1  ;;  %v789_v11 = vadd.f32 %v788_v6, %v787_v9  ;;  %v4265_v9 = vld [vmem:[%s5510_s5 + $0x8] sm:$0xff] }
 0x128   :  { %v825_v4 = vadd.f32 1e-05, %v821_v38  ;;  %5546 = vst [vmem:[#allocation37_spill] sm:$0xff] %v4265_v9 }
 0x129   :  { %v639_v47 = vadd.f32 %v638_v14, %v637_v27  ;;  %v790_v63 = vrot.slane %v789_v11, 1 }
 0x12a   :  { %v3592_v37 = vpop.eup %3591  ;;  %3593 = vrsqrt.f32 %v825_v4  ;;  %vm835_vm4 = vweird.f32 %v825_v4 }
 0x12b   :  { %v840_v13 = vmul.f32 %v3592_v37, %v826_v16  ;;  %v4254_v23 = vmul.f32 0.0078125, %v639_v47  ;;  %v791_v42 = vadd.f32 %v790_v63, %v789_v11  ;;  %v4256_v53 = vpop.f32.mrf.mxu3  ;;  %vm846_vm2 = vweird.f32 %v3592_v37 }
 0x12c   :  { %vm847_vm3 = vmor %vm845_vm1, %vm846_vm2 }
 0x12d   :  { %v841_v8 = vmul.f32 %v3592_v37, %v840_v13  ;;  %v815_v32 = vmul.f32 0.0078125, %v791_v42  ;;  %v819_v48 = vmul.f32 %v4254_v23, %v4254_v23 }
 0x12f   :  { %v842_v25 = vmul.f32 0.5, %v841_v8  ;;  %v823_v57 = vsub.f32 %v815_v32, %v819_v48 }
 0x130   :  { %v3594_v55 = vpop.eup %3593 }
 0x131   :  { %v843_v61 = vsub.f32 1.5, %v842_v25  ;;  %v830_v21 = vmul.f32 %v3594_v55, %v825_v4  ;;  %v4260_v7 = vadd.f32 1e-05, %v823_v57  ;;  %vm836_vm5 = vweird.f32 %v3594_v55 }
 0x132   :  { %vm837_vm6 = vmor %vm835_vm4, %vm836_vm5 }
 0x133   :  { %v844_v5 = vmul.f32 %v3592_v37, %v843_v61  ;;  %v831_v20 = vmul.f32 %v3594_v55, %v830_v21  ;;  %v4267_v27 = vpop.f32.mrf.mxu3  ;;  %3595 = vrsqrt.f32 %v4260_v7  ;;  %vm855_vm7 = vweird.f32 %v4260_v7 }
 0x135   :  { %v848_v6 = vsel %vm847_vm3, %v3592_v37, %v844_v5  ;;  %v832_v38 = vmul.f32 0.5, %v831_v20 }
 0x136   :  { %v870_v16 = vmul.f32 %v848_v6, %v4265_v9 }
 0x137   :  { %v833_v14 = vsub.f32 1.5, %v832_v38 }
 0x138   :  { %v874_v11 = vmul.f32 %v870_v16, %v662_v3  ;;  %v894_v47 = vperm.slane %v870_v16, 0 }
 0x139   :  { %v834_v42 = vmul.f32 %v3594_v55, %v833_v14  ;;  %v4278_v57 = vpop.eup %3595 }
 0x13a   :  { %v882_v63 = vrot.slane %v874_v11, 7  ;;  %v898_v13 = vmul.f32 %v894_v47, %v4026_v41  ;;  %v902_v8 = vmul.f32 %v894_v47, %v4034_v46  ;;  %v906_v32 = vmul.f32 %v894_v47, %v4047_v52  ;;  %v4287_v46 = vld [vmem:[%s5510_s5] sm:$0xff] }
 0x13b   :  { %v910_v37 = vmul.f32 %v894_v47, %v4060_v62  ;;  %v914_v48 = vmul.f32 %v894_v47, %v4004_v29  ;;  %v4276_v25 = vpop.f32.mrf.mxu3  ;;  %v918_v61 = vmul.f32 %v894_v47, %v4013_v34  ;;  %v922_v41 = vmul.f32 %v894_v47, %v4021_v39  ;;  %5547 = vst [vmem:[#allocation38_spill] sm:$0xff] %v4287_v46 }
 0x13c   :  { %v890_v3 = vsub.f32 %v4265_v9, %v882_v63  ;;  %v926_v21 = vmul.f32 %v894_v47, %v4030_v44  ;;  %v930_v52 = vmul.f32 %v894_v47, %v4038_v49  ;;  %v934_v29 = vmul.f32 %v894_v47, %v4053_v56 }
 0x13d   :  { %v938_v62 = vmul.f32 %v894_v47, %v4066_v0  ;;  %v942_v5 = vmul.f32 %v894_v47, %v4095_v17  ;;  %v946_v34 = vmul.f32 %v894_v47, %v4113_v2  ;;  %v950_v39 = vmul.f32 %v894_v47, %v4138_v18 }
 0x13e   :  { %v962_v44 = vperm.slane %v890_v3, 1  ;;  %v838_v20 = vsel %vm837_vm6, %v3594_v55, %v834_v42  ;;  %v954_v6 = vmul.f32 %v894_v47, %v4169_v1  ;;  %v958_v38 = vmul.f32 %v894_v47, %v4204_v24 }
 0x13f   :  { %v869_v49 = vmul.f32 %v838_v20, %v4287_v46  ;;  %v850_v56 = vmul.f32 %v4278_v57, %v4260_v7  ;;  %vm856_vm8 = vweird.f32 %v4278_v57 }
 0x140   :  { %v4302_v0 = vadd.f32 %v962_v44, %v898_v13  ;;  %v4304_v17 = vadd.f32 %v962_v44, %v902_v8  ;;  %v4306_v4 = vadd.f32 %v962_v44, %v906_v32  ;;  %v4308_v2 = vadd.f32 %v962_v44, %v910_v37  ;;  %vm857_vm9 = vmor %vm855_vm7, %vm856_vm8 }
 0x141   :  { %v4310_v18 = vadd.f32 %v962_v44, %v914_v48  ;;  %v4312_v55 = vadd.f32 %v962_v44, %v918_v61  ;;  %v4314_v1 = vadd.f32 %v962_v44, %v922_v41  ;;  %v4316_v24 = vadd.f32 %v962_v44, %v926_v21 }
 0x142   :  { %v4318_v16 = vadd.f32 %v962_v44, %v930_v52  ;;  %v4320_v14 = vadd.f32 %v962_v44, %v934_v29  ;;  %v4322_v11 = vadd.f32 %v962_v44, %v938_v62  ;;  %v4324_v47 = vadd.f32 %v962_v44, %v942_v5 }
 0x143   :  { %v4326_v63 = vadd.f32 %v962_v44, %v946_v34  ;;  %v4328_v13 = vadd.f32 %v962_v44, %v950_v39  ;;  %v4330_v42 = vadd.f32 %v962_v44, %v954_v6  ;;  %v4332_v8 = vadd.f32 %v962_v44, %v958_v38  ;;  %v4334_v32 = vpop.f32.mrf.mxu3 }
 0x144   :  { %5548 = vst [vmem:[#allocation39_spill] sm:$0xff] %v4318_v16  ;;  %v873_v37 = vmul.f32 %v869_v49, %v4248_v35  ;;  %v893_v48 = vperm.slane %v869_v49, 0  ;;  %v851_v52 = vmul.f32 %v4278_v57, %v850_v56 }
 0x145   :  { %5549 = vst [vmem:[#allocation40_spill] sm:$0xff] %v4320_v14 }
 0x146   :  { %5550 = vst [vmem:[#allocation41_spill] sm:$0xff] %v4322_v11  ;;  %v881_v3 = vrot.slane %v873_v37, 7  ;;  %v897_v61 = vmul.f32 %v893_v48, %v4000_v26  ;;  %v901_v41 = vmul.f32 %v893_v48, %v4002_v28  ;;  %v905_v21 = vmul.f32 %v893_v48, %v4009_v31 }
 0x147   :  { %5551 = vst [vmem:[#allocation42_spill] sm:$0xff] %v4324_v47  ;;  %v909_v62 = vmul.f32 %v893_v48, %v4017_v33  ;;  %v913_v35 = vmul.f32 %v893_v48, %v4007_v30  ;;  %v917_v5 = vmul.f32 %v893_v48, %v4015_v36  ;;  %v921_v34 = vmul.f32 %v893_v48, %v4024_v40 }
 0x148   :  { %5552 = vst [vmem:[#allocation43_spill] sm:$0xff] %v4326_v63  ;;  %v889_v29 = vsub.f32 %v4287_v46, %v881_v3  ;;  %v925_v39 = vmul.f32 %v893_v48, %v4032_v45  ;;  %v929_v26 = vmul.f32 %v893_v48, %v4043_v50  ;;  %v933_v28 = vmul.f32 %v893_v48, %v4058_v60 }
 0x149   :  { %5553 = vst [vmem:[#allocation44_spill] sm:$0xff] %v4328_v13  ;;  %v937_v31 = vmul.f32 %v893_v48, %v4082_v10  ;;  %v953_v33 = vmul.f32 %v893_v48, %v4196_v22  ;;  %v957_v30 = vmul.f32 %v893_v48, %v4226_v54  ;;  %v941_v36 = vmul.f32 %v893_v48, %v4104_v51 }
 0x14a   :  { %5554 = vst [vmem:[#allocation45_spill] sm:$0xff] %v4330_v42  ;;  %v961_v44 = vperm.slane %v889_v29, 1  ;;  %v945_v40 = vmul.f32 %v893_v48, %v4127_v12  ;;  %v949_v45 = vmul.f32 %v893_v48, %v4156_v59  ;;  %v852_v50 = vmul.f32 0.5, %v851_v52  ;;  %v114_v52 = vld [vmem:[%s5510_s5 + $0x10] sm:$0xff] }
 0x14b   :  { %5555 = vst [vmem:[#allocation46_spill] sm:$0xff] %v4332_v8  ;;  %v4360_v60 = vpop.f32.mrf.mxu3  ;;  %v688_v63 = vmul.f32 %v4334_v32, %v4334_v32 }
 0x14c   :  { %v4362_v20 = vadd.f32 %v961_v44, %v897_v61  ;;  %v4364_v10 = vadd.f32 %v961_v44, %v901_v41  ;;  %v4366_v22 = vadd.f32 %v961_v44, %v905_v21  ;;  %v4368_v54 = vadd.f32 %v961_v44, %v909_v62 }
 0x14d   :  { %v4370_v6 = vadd.f32 %v961_v44, %v913_v35  ;;  %v4372_v51 = vadd.f32 %v961_v44, %v917_v5  ;;  %v4374_v12 = vadd.f32 %v961_v44, %v921_v34  ;;  %v4376_v59 = vadd.f32 %v961_v44, %v925_v39 }
 0x14e   :  { %v4378_v38 = vadd.f32 %v961_v44, %v929_v26  ;;  %v4380_v49 = vadd.f32 %v961_v44, %v933_v28  ;;  %v4382_v56 = vadd.f32 %v961_v44, %v937_v31  ;;  %v4384_v37 = vadd.f32 %v961_v44, %v941_v36 }
 0x14f   :  { %v4386_v48 = vadd.f32 %v961_v44, %v945_v40  ;;  %v4388_v3 = vadd.f32 %v961_v44, %v949_v45  ;;  %v4390_v61 = vadd.f32 %v961_v44, %v953_v33  ;;  %v4392_v41 = vadd.f32 %v961_v44, %v957_v30  ;;  %v5563_v33 = vld [vmem:[#allocation31_spill] sm:$0xff]  ;;  %v5564_v44 = vld [vmem:[#allocation33_spill] sm:$0xff] }
 0x150   :  { %5556 = vst [vmem:[#allocation47_spill] sm:$0xff] %v4380_v49  ;;  %v853_v21 = vsub.f32 1.5, %v852_v50  ;;  %v5565_v40 = vld [vmem:[#allocation23_spill] sm:$0xff] }
 0x151   :  { %5557 = vst [vmem:[#allocation48_spill] sm:$0xff] %v4382_v56 }
 0x152   :  { %5558 = vst [vmem:[#allocation49_spill] sm:$0xff] %v4384_v37  ;;  %v854_v29 = vmul.f32 %v4278_v57, %v853_v21  ;;  %v5566_v21 = vld [vmem:[#allocation24_spill] sm:$0xff] }
 0x153   :  { %5559 = vst [vmem:[#allocation50_spill] sm:$0xff] %v4386_v48  ;;  %v4402_v62 = vpop.f32.mrf.mxu3 }
 0x154   :  { %5560 = vst [vmem:[#allocation51_spill] sm:$0xff] %v4388_v3  ;;  %v858_v35 = vsel %vm857_vm9, %v4278_v57, %v854_v29  ;;  %v5567_v29 = vld [vmem:[#allocation25_spill] sm:$0xff] }
 0x155   :  { %5561 = vst [vmem:[#allocation52_spill] sm:$0xff] %v4390_v61  ;;  %v871_v5 = vmul.f32 %v858_v35, %v114_v52  ;;  %v5575_v61 = vld [vmem:[#allocation35_spill] sm:$0xff] }
 0x156   :  { %5562 = vst [vmem:[#allocation53_spill] sm:$0xff] %v4392_v41 }
 0x157   :  { %v875_v34 = vmul.f32 %v871_v5, %v4254_v23  ;;  %v895_v39 = vperm.slane %v871_v5, 0  ;;  %v5568_v23 = vld [vmem:[#allocation26_spill] sm:$0xff] }
 0x159   :  { %v883_v26 = vrot.slane %v875_v34, 7  ;;  %v899_v28 = vmul.f32 %v895_v39, %v4089_v43  ;;  %v903_v7 = vmul.f32 %v895_v39, %v4109_v58  ;;  %v907_v30 = vmul.f32 %v895_v39, %v5563_v33  ;;  %v5569_v34 = vld [vmem:[#allocation27_spill] sm:$0xff]  ;;  %v5570_v43 = vld [vmem:[#allocation28_spill] sm:$0xff]  ;;  %v5571_v58 = vld [vmem:[#allocation29_spill] sm:$0xff] }
 0x15a   :  { %v911_v36 = vmul.f32 %v895_v39, %v5564_v44  ;;  %v915_v45 = vmul.f32 %v895_v39, %v5565_v40  ;;  %v919_v57 = vmul.f32 %v895_v39, %v5566_v21  ;;  %v923_v35 = vmul.f32 %v895_v39, %v5567_v29  ;;  %v5573_v44 = vld [vmem:[#allocation32_spill] sm:$0xff]  ;;  %v5574_v40 = vld [vmem:[#allocation34_spill] sm:$0xff] }
 0x15b   :  { %v891_v31 = vsub.f32 %v114_v52, %v883_v26  ;;  %v4411_v50 = vpop.f32.mrf.mxu3  ;;  %v927_v5 = vmul.f32 %v895_v39, %v5568_v23  ;;  %v931_v9 = vmul.f32 %v895_v39, %v5569_v34  ;;  %v935_v46 = vmul.f32 %v895_v39, %v5570_v43  ;;  %v5572_v26 = vld [vmem:[#allocation30_spill] sm:$0xff] }
 0x15c   :  { %v939_v52 = vmul.f32 %v895_v39, %v5571_v58  ;;  %v943_v33 = vmul.f32 %v895_v39, %v5572_v26  ;;  %v947_v42 = vmul.f32 %v895_v39, %v5573_v44  ;;  %v951_v41 = vmul.f32 %v895_v39, %v5574_v40 }
 0x15d   :  { %v963_v8 = vperm.slane %v891_v31, 1  ;;  %v955_v13 = vmul.f32 %v895_v39, %v5575_v61  ;;  %v959_v21 = vmul.f32 %v895_v39, %v4237_v15 }
 0x15f   :  { %v4424_v29 = vadd.f32 %v963_v8, %v899_v28  ;;  %v4426_v23 = vadd.f32 %v963_v8, %v903_v7  ;;  %v4428_v34 = vadd.f32 %v963_v8, %v907_v30  ;;  %v4430_v43 = vadd.f32 %v963_v8, %v911_v36 }
 0x160   :  { %v4432_v58 = vadd.f32 %v963_v8, %v915_v45  ;;  %v4434_v26 = vadd.f32 %v963_v8, %v919_v57  ;;  %v4436_v31 = vadd.f32 %v963_v8, %v923_v35  ;;  %v4438_v44 = vadd.f32 %v963_v8, %v927_v5  ;;  %v5584_v35 = vld [vmem:[#allocation36_spill] sm:$0xff] }
 0x161   :  { %v4440_v40 = vadd.f32 %v963_v8, %v931_v9  ;;  %v4442_v61 = vadd.f32 %v963_v8, %v935_v46  ;;  %v4444_v15 = vadd.f32 %v963_v8, %v939_v52  ;;  %v4446_v39 = vadd.f32 %v963_v8, %v943_v33 }
 0x162   :  { %v4448_v28 = vadd.f32 %v963_v8, %v947_v42  ;;  %v4450_v7 = vadd.f32 %v963_v8, %v951_v41  ;;  %v4452_v30 = vadd.f32 %v963_v8, %v955_v13  ;;  %v4454_v36 = vadd.f32 %v963_v8, %v959_v21 }
 0x163   :  { %5576 = vst [vmem:[#allocation31_spill] sm:$0xff] %v4440_v40  ;;  %v4456_v45 = vpop.f32.mrf.mxu3  ;;  %v672_v46 = vmul.f32 %v4250_v19, %v4250_v19  ;;  %v668_v5 = vmul.f32 %v5584_v35, %v5584_v35  ;;  %v640_v42 = vadd.f32 %v4250_v19, %v5584_v35  ;;  %v676_v13 = vmul.f32 %v4256_v53, %v4256_v53 }
 0x164   :  { %5577 = vst [vmem:[#allocation33_spill] sm:$0xff] %v4442_v61  ;;  %v680_v52 = vmul.f32 %v4267_v27, %v4267_v27 }
 0x165   :  { %5578 = vst [vmem:[#allocation23_spill] sm:$0xff] %v4444_v15  ;;  %v792_v8 = vadd.f32 %v672_v46, %v668_v5  ;;  %v641_v41 = vadd.f32 %v640_v42, %v4256_v53  ;;  %v692_v42 = vmul.f32 %v4360_v60, %v4360_v60 }
 0x166   :  { %5579 = vst [vmem:[#allocation24_spill] sm:$0xff] %v4446_v39 }
 0x167   :  { %5580 = vst [vmem:[#allocation25_spill] sm:$0xff] %v4448_v28  ;;  %v793_v21 = vadd.f32 %v792_v8, %v676_v13  ;;  %v696_v8 = vmul.f32 %v4402_v62, %v4402_v62 }
 0x168   :  { %5581 = vst [vmem:[#allocation26_spill] sm:$0xff] %v4450_v7 }
 0x169   :  { %5582 = vst [vmem:[#allocation27_spill] sm:$0xff] %v4452_v30  ;;  %v684_v30 = vmul.f32 %v4276_v25, %v4276_v25  ;;  %v794_v7 = vadd.f32 %v793_v21, %v680_v52  ;;  %v700_v21 = vmul.f32 %v4411_v50, %v4411_v50 }
 0x16a   :  { %5583 = vst [vmem:[#allocation28_spill] sm:$0xff] %v4454_v36  ;;  %v642_v36 = vadd.f32 %v641_v41, %v4267_v27 }
 0x16b   :  { %v4458_v57 = vpop.f32.mrf.mxu3  ;;  %v795_v46 = vadd.f32 %v794_v7, %v684_v30  ;;  %v704_v30 = vmul.f32 %v4456_v45, %v4456_v45 }
 0x16c   :  { %v643_v28 = vadd.f32 %v642_v36, %v4276_v25 }
 0x16d   :  { %v796_v3 = vadd.f32 %v795_v46, %v688_v63 }
 0x16e   :  { %v644_v5 = vadd.f32 %v643_v28, %v4334_v32 }
 0x16f   :  { %v797_v52 = vadd.f32 %v796_v3, %v692_v42 }
 0x170   :  { %v645_v13 = vadd.f32 %v644_v5, %v4360_v60  ;;  %v708_v5 = vmul.f32 %v4458_v57, %v4458_v57 }
 0x171   :  { %v798_v7 = vadd.f32 %v797_v52, %v696_v8 }
 0x172   :  { %v646_v36 = vadd.f32 %v645_v13, %v4402_v62 }
 0x173   :  { %v4460_v9 = vpop.f32.mrf.mxu3  ;;  %v799_v63 = vadd.f32 %v798_v7, %v700_v21 }
 0x174   :  { %v647_v28 = vadd.f32 %v646_v36, %v4411_v50  ;;  %v712_v42 = vmul.f32 %v4460_v9, %v4460_v9 }
 0x175   :  { %v800_v48 = vadd.f32 %v799_v63, %v704_v30 }
 0x176   :  { %v648_v46 = vadd.f32 %v647_v28, %v4456_v45 }
 0x177   :  { %v801_v8 = vadd.f32 %v800_v48, %v708_v5 }
 0x178   :  { %v649_v3 = vadd.f32 %v648_v46, %v4458_v57 }
 0x179   :  { %v802_v21 = vadd.f32 %v801_v8, %v712_v42 }
 0x17a   :  { %v650_v52 = vadd.f32 %v649_v3, %v4460_v9 }
 0x17b   :  { %v4473_v33 = vpop.f32.mrf.mxu3 }
 0x17c   :  { %v716_v36 = vmul.f32 %v4473_v33, %v4473_v33  ;;  %v651_v7 = vadd.f32 %v650_v52, %v4473_v33 }
 0x17e   :  { %v803_v30 = vadd.f32 %v802_v21, %v716_v36 }
 0x183   :  { %v4487_v41 = vpop.f32.mrf.mxu3 }
 0x184   :  { %v720_v28 = vmul.f32 %v4487_v41, %v4487_v41  ;;  %v652_v63 = vadd.f32 %v651_v7, %v4487_v41 }
 0x186   :  { %v804_v39 = vadd.f32 %v803_v30, %v720_v28 }
 0x18b   :  { %v4501_v13 = vpop.f32.mrf.mxu3 }
 0x18c   :  { %v724_v46 = vmul.f32 %v4501_v13, %v4501_v13  ;;  %v653_v48 = vadd.f32 %v652_v63, %v4501_v13 }
 0x18e   :  { %v805_v3 = vadd.f32 %v804_v39, %v724_v46 }
 0x193   :  { %v574_v5 = vpop.f32.mrf.mxu3 }
 0x194   :  { %v654_v15 = vadd.f32 %v653_v48, %v574_v5  ;;  %v728_v47 = vmul.f32 %v574_v5, %v574_v5 }
 0x196   :  { %v655_v11 = vrot.slane %v654_v15, 4  ;;  %v806_v42 = vadd.f32 %v805_v3, %v728_v47 }
 0x198   :  { %v656_v8 = vadd.f32 %v655_v11, %v654_v15  ;;  %v807_v52 = vrot.slane %v806_v42, 4 }
 0x19a   :  { %v657_v37 = vrot.slane %v656_v8, 2  ;;  %v808_v56 = vadd.f32 %v807_v52, %v806_v42 }
 0x19c   :  { %v658_v61 = vadd.f32 %v657_v37, %v656_v8  ;;  %v809_v36 = vrot.slane %v808_v56, 2  ;;  %v115_v37 = vld [vmem:[%s5510_s5 + $0x18] sm:$0xff] }
 0x19e   :  { %v659_v21 = vrot.slane %v658_v61, 1  ;;  %v810_v7 = vadd.f32 %v809_v36, %v808_v56 }
 0x1a0   :  { %v660_v40 = vadd.f32 %v659_v21, %v658_v61  ;;  %v811_v14 = vrot.slane %v810_v7, 1 }
 0x1a2   :  { %v664_v16 = vmul.f32 0.0078125, %v660_v40  ;;  %v812_v28 = vadd.f32 %v811_v14, %v810_v7 }
 0x1a4   :  { %v816_v30 = vmul.f32 0.0078125, %v812_v28  ;;  %v820_v63 = vmul.f32 %v664_v16, %v664_v16 }
 0x1a6   :  { %v824_v49 = vsub.f32 %v816_v30, %v820_v63 }
 0x1a8   :  { %v828_v39 = vadd.f32 1e-05, %v824_v49 }
 0x1aa   :  { %3597 = vrsqrt.f32 %v828_v39  ;;  %vm865_vm11 = vweird.f32 %v828_v39 }
 0x1b0   :  { %v3598_v46 = vpop.eup %3597 }
 0x1b1   :  { %v860_v48 = vmul.f32 %v3598_v46, %v828_v39  ;;  %vm866_vm10 = vweird.f32 %v3598_v46 }
 0x1b2   :  { %vm867_vm12 = vmor %vm865_vm11, %vm866_vm10 }
 0x1b3   :  { %v861_v47 = vmul.f32 %v3598_v46, %v860_v48 }
 0x1b5   :  { %v862_v11 = vmul.f32 0.5, %v861_v47 }
 0x1b7   :  { %v863_v15 = vsub.f32 1.5, %v862_v11 }
 0x1b9   :  { %v864_v56 = vmul.f32 %v3598_v46, %v863_v15 }
 0x1bb   :  { %v868_v40 = vsel %vm867_vm12, %v3598_v46, %v864_v56 }
 0x1bc   :  { %v872_v14 = vmul.f32 %v868_v40, %v115_v37 }
 0x1be   :  { %v876_v61 = vmul.f32 %v872_v14, %v664_v16  ;;  %v896_v3 = vperm.slane %v872_v14, 0 }
 0x1c0   :  { %v884_v42 = vrot.slane %v876_v61, 7  ;;  %v900_v49 = vmul.f32 %v896_v3, %v5584_v35  ;;  %v904_v8 = vmul.f32 %v896_v3, %v4250_v19  ;;  %v908_v36 = vmul.f32 %v896_v3, %v4256_v53 }
 0x1c1   :  { %v912_v21 = vmul.f32 %v896_v3, %v4267_v27  ;;  %v916_v7 = vmul.f32 %v896_v3, %v4276_v25  ;;  %v920_v28 = vmul.f32 %v896_v3, %v4334_v32  ;;  %v924_v30 = vmul.f32 %v896_v3, %v4360_v60 }
 0x1c2   :  { %v892_v52 = vsub.f32 %v115_v37, %v884_v42  ;;  %v928_v63 = vmul.f32 %v896_v3, %v4402_v62  ;;  %v932_v16 = vmul.f32 %v896_v3, %v4411_v50  ;;  %v936_v39 = vmul.f32 %v896_v3, %v4456_v45 }
 0x1c3   :  { %v940_v35 = vmul.f32 %v896_v3, %v4458_v57  ;;  %v944_v19 = vmul.f32 %v896_v3, %v4460_v9  ;;  %v948_v53 = vmul.f32 %v896_v3, %v4473_v33  ;;  %v952_v27 = vmul.f32 %v896_v3, %v4487_v41 }
 0x1c4   :  { %v964_v46 = vperm.slane %v892_v52, 1  ;;  %v956_v25 = vmul.f32 %v896_v3, %v4501_v13  ;;  %v960_v32 = vmul.f32 %v896_v3, %v574_v5 }
 0x1c6   :  { %v4531_v48 = vadd.f32 %v964_v46, %v900_v49  ;;  %v4533_v60 = vadd.f32 %v964_v46, %v904_v8  ;;  %v4535_v62 = vadd.f32 %v964_v46, %v908_v36  ;;  %v4537_v50 = vadd.f32 %v964_v46, %v912_v21 }
 0x1c7   :  { %v4539_v45 = vadd.f32 %v964_v46, %v916_v7  ;;  %v4541_v57 = vadd.f32 %v964_v46, %v920_v28  ;;  %v4543_v9 = vadd.f32 %v964_v46, %v924_v30  ;;  %v4545_v33 = vadd.f32 %v964_v46, %v928_v63 }
 0x1c8   :  { %v4547_v41 = vadd.f32 %v964_v46, %v932_v16  ;;  %v4549_v13 = vadd.f32 %v964_v46, %v936_v39  ;;  %v4551_v5 = vadd.f32 %v964_v46, %v940_v35  ;;  %v4553_v47 = vadd.f32 %v964_v46, %v944_v19 }
 0x1c9   :  { %v4555_v11 = vadd.f32 %v964_v46, %v948_v53  ;;  %v4557_v15 = vadd.f32 %v964_v46, %v952_v27  ;;  %v4559_v37 = vadd.f32 %v964_v46, %v956_v25  ;;  %v4561_v56 = vadd.f32 %v964_v46, %v960_v32 }
 0x1cb   :  { %5585 = vst [vmem:[#allocation29_spill] sm:$0xff] %v4555_v11 }
 0x1cc   :  { %5586 = vst [vmem:[#allocation30_spill] sm:$0xff] %v4557_v15 }
 0x1cd   :  { %5587 = vst [vmem:[#allocation32_spill] sm:$0xff] %v4559_v37 }
 0x1ce   :  { %5588 = vst [vmem:[#allocation34_spill] sm:$0xff] %v4561_v56 }
 0x1cf   :  { %3703 = dma.done.wait [#allocation6], 8192 }
 0x1d0   :  { %3704 = vsyncadd [#allocation6], 4294959104  ;;  %v3141_v40 = vld [vmem:[#allocation3 + $0x70] sm:$0xf]  ;;  %v3485_v14 = vld [vmem:[#allocation3 + $0x74] sm:$0xf0] }
 0x1d1   :  { %v3205_v61 = vld [vmem:[#allocation3 + $0xf0] sm:$0xf]  ;;  %v3142_v3 = vor.u32 %v3485_v14, %v3141_v40  ;;  %v3501_v42 = vld [vmem:[#allocation3 + $0xf4] sm:$0xf0]  ;;  %v3133_v28 = vld [vmem:[#allocation3 + $0x60] sm:$0xf] }
 0x1d2   :  { %v3269_v49 = vld [vmem:[#allocation3 + $0x170] sm:$0xf]  ;;  %v3517_v8 = vld [vmem:[#allocation3 + $0x174] sm:$0xf0]  ;;  %v3206_v52 = vor.u32 %v3501_v42, %v3205_v61  ;;  %v3483_v63 = vld [vmem:[#allocation3 + $0x64] sm:$0xf0] }
 0x1d3   :  { %v3270_v36 = vor.u32 %v3517_v8, %v3269_v49  ;;  %v3333_v21 = vld [vmem:[#allocation3 + $0x1f0] sm:$0xf]  ;;  %v3533_v7 = vld [vmem:[#allocation3 + $0x1f4] sm:$0xf0]  ;;  %1449 = vmatpush.bf16.msrb.mxu0 %v3142_v3  ;;  %v3197_v16 = vld [vmem:[#allocation3 + $0xe0] sm:$0xf]  ;;  %v3134_v35 = vor.u32 %v3483_v63, %v3133_v28 }
 0x1d4   :  { %v3334_v30 = vor.u32 %v3533_v7, %v3333_v21  ;;  %v3499_v39 = vld [vmem:[#allocation3 + $0xe4] sm:$0xf0]  ;;  %1498 = vmatpush.bf16.msrb.mxu1 %v3206_v52  ;;  %v3261_v46 = vld [vmem:[#allocation3 + $0x160] sm:$0xf]  ;;  %v3125_v40 = vld [vmem:[#allocation3 + $0x50] sm:$0xf] }
 0x1d5   :  { %1547 = vmatpush.bf16.msrb.mxu2 %v3270_v36  ;;  %v3198_v19 = vor.u32 %v3499_v39, %v3197_v16  ;;  %v3515_v53 = vld [vmem:[#allocation3 + $0x164] sm:$0xf0]  ;;  %v3325_v27 = vld [vmem:[#allocation3 + $0x1e0] sm:$0xf]  ;;  %v3481_v14 = vld [vmem:[#allocation3 + $0x54] sm:$0xf0] }
 0x1d6   :  { %1596 = vmatpush.bf16.msra.mxu3 %v3334_v30  ;;  %v3262_v25 = vor.u32 %v3515_v53, %v3261_v46  ;;  %v3531_v32 = vld [vmem:[#allocation3 + $0x1e4] sm:$0xf0]  ;;  %v3189_v42 = vld [vmem:[#allocation3 + $0xd0] sm:$0xf]  ;;  %v3497_v49 = vld [vmem:[#allocation3 + $0xd4] sm:$0xf0]  ;;  %v3126_v8 = vor.u32 %v3481_v14, %v3125_v40 }
 0x1d7   :  { %v3326_v61 = vor.u32 %v3531_v32, %v3325_v27  ;;  %v3253_v3 = vld [vmem:[#allocation3 + $0x150] sm:$0xf]  ;;  %1450 = vmatpush.bf16.msrb.mxu0 %v3134_v35  ;;  %v3513_v21 = vld [vmem:[#allocation3 + $0x154] sm:$0xf0]  ;;  %v3190_v36 = vor.u32 %v3497_v49, %v3189_v42  ;;  %v3117_v63 = vld [vmem:[#allocation3 + $0x40] sm:$0xf] }
 0x1d8   :  { %v3317_v7 = vld [vmem:[#allocation3 + $0x1d0] sm:$0xf]  ;;  %v3529_v52 = vld [vmem:[#allocation3 + $0x1d4] sm:$0xf0]  ;;  %1499 = vmatpush.bf16.msrb.mxu1 %v3198_v19  ;;  %v3254_v28 = vor.u32 %v3513_v21, %v3253_v3  ;;  %v3479_v16 = vld [vmem:[#allocation3 + $0x44] sm:$0xf0] }
 0x1d9   :  { %1548 = vmatpush.bf16.msrb.mxu2 %v3262_v25  ;;  %v3181_v30 = vld [vmem:[#allocation3 + $0xc0] sm:$0xf]  ;;  %v3318_v39 = vor.u32 %v3529_v52, %v3317_v7  ;;  %v3495_v46 = vld [vmem:[#allocation3 + $0xc4] sm:$0xf0]  ;;  %v3118_v35 = vor.u32 %v3479_v16, %v3117_v63  ;;  %v3109_v19 = vld [vmem:[#allocation3 + $0x30] sm:$0xf] }
 0x1da   :  { %1597 = vmatpush.bf16.msra.mxu3 %v3326_v61  ;;  %v3245_v53 = vld [vmem:[#allocation3 + $0x140] sm:$0xf]  ;;  %v3511_v27 = vld [vmem:[#allocation3 + $0x144] sm:$0xf0]  ;;  %v3182_v40 = vor.u32 %v3495_v46, %v3181_v30  ;;  %v3477_v25 = vld [vmem:[#allocation3 + $0x34] sm:$0xf0] }
 0x1db   :  { %v3309_v32 = vld [vmem:[#allocation3 + $0x1c0] sm:$0xf]  ;;  %v3527_v56 = vld [vmem:[#allocation3 + $0x1c4] sm:$0xf0]  ;;  %1451 = vmatpush.bf16.msrb.mxu0 %v3126_v8  ;;  %v3246_v14 = vor.u32 %v3511_v27, %v3245_v53  ;;  %v3173_v42 = vld [vmem:[#allocation3 + $0xb0] sm:$0xf]  ;;  %v3110_v37 = vor.u32 %v3477_v25, %v3109_v19 }
 0x1dc   :  { %1500 = vmatpush.bf16.msrb.mxu1 %v3190_v36  ;;  %v3310_v49 = vor.u32 %v3527_v56, %v3309_v32  ;;  %v3493_v3 = vld [vmem:[#allocation3 + $0xb4] sm:$0xf0]  ;;  %v3237_v21 = vld [vmem:[#allocation3 + $0x130] sm:$0xf]  ;;  %v3101_v36 = vld [vmem:[#allocation3 + $0x20] sm:$0xf] }
 0x1dd   :  { %1549 = vmatpush.bf16.msrb.mxu2 %v3254_v28  ;;  %v3509_v61 = vld [vmem:[#allocation3 + $0x134] sm:$0xf0]  ;;  %v3301_v7 = vld [vmem:[#allocation3 + $0x1b0] sm:$0xf]  ;;  %v3174_v8 = vor.u32 %v3493_v3, %v3173_v42  ;;  %v3475_v28 = vld [vmem:[#allocation3 + $0x24] sm:$0xf0] }
 0x1de   :  { %1598 = vmatpush.bf16.msra.mxu3 %v3318_v39  ;;  %v3525_v52 = vld [vmem:[#allocation3 + $0x1b4] sm:$0xf0]  ;;  %v3238_v63 = vor.u32 %v3509_v61, %v3237_v21  ;;  %v3165_v16 = vld [vmem:[#allocation3 + $0xa0] sm:$0xf]  ;;  %v3491_v46 = vld [vmem:[#allocation3 + $0xa4] sm:$0xf0]  ;;  %v3102_v32 = vor.u32 %v3475_v28, %v3101_v36 }
 0x1df   :  { %1452 = vmatpush.bf16.msrb.mxu0 %v3118_v35  ;;  %v3302_v30 = vor.u32 %v3525_v52, %v3301_v7  ;;  %v3229_v53 = vld [vmem:[#allocation3 + $0x120] sm:$0xf]  ;;  %v3507_v39 = vld [vmem:[#allocation3 + $0x124] sm:$0xf0]  ;;  %v3166_v35 = vor.u32 %v3491_v46, %v3165_v16  ;;  %v3157_v25 = vld [vmem:[#allocation3 + $0x90] sm:$0xf] }
 0x1e0   :  { %1501 = vmatpush.bf16.msrb.mxu1 %v3182_v40  ;;  %v3293_v56 = vld [vmem:[#allocation3 + $0x1a0] sm:$0xf]  ;;  %v3523_v27 = vld [vmem:[#allocation3 + $0x1a4] sm:$0xf0]  ;;  %v3230_v19 = vor.u32 %v3507_v39, %v3229_v53  ;;  %v3093_v40 = vld [vmem:[#allocation3 + $0x10] sm:$0xf] }
 0x1e1   :  { %1550 = vmatpush.bf16.msrb.mxu2 %v3246_v14  ;;  %v3473_v14 = vld [vmem:[#allocation3 + $0x14] sm:$0xf0]  ;;  %v3294_v42 = vor.u32 %v3523_v27, %v3293_v56  ;;  %v3221_v21 = vld [vmem:[#allocation3 + $0x110] sm:$0xf]  ;;  %v3085_v15 = vld [vmem:[#allocation3] sm:$0xf] }
 0x1e2   :  { %1599 = vmatpush.bf16.msra.mxu3 %v3310_v49  ;;  %v3489_v3 = vld [vmem:[#allocation3 + $0x94] sm:$0xf0]  ;;  %v3285_v61 = vld [vmem:[#allocation3 + $0x190] sm:$0xf]  ;;  %v3094_v52 = vor.u32 %v3473_v14, %v3093_v40  ;;  %v3149_v36 = vld [vmem:[#allocation3 + $0x80] sm:$0xf] }
 0x1e3   :  { %1453 = vmatpush.bf16.msrb.mxu0 %v3110_v37  ;;  %v3505_v49 = vld [vmem:[#allocation3 + $0x114] sm:$0xf0]  ;;  %v3158_v37 = vor.u32 %v3489_v3, %v3157_v25  ;;  %v3487_v28 = vld [vmem:[#allocation3 + $0x84] sm:$0xf0]  ;;  %v3213_v46 = vld [vmem:[#allocation3 + $0x100] sm:$0xf] }
 0x1e4   :  { %1502 = vmatpush.bf16.msrb.mxu1 %v3174_v8  ;;  %v3521_v7 = vld [vmem:[#allocation3 + $0x194] sm:$0xf0]  ;;  %v3222_v8 = vor.u32 %v3505_v49, %v3221_v21  ;;  %v3277_v53 = vld [vmem:[#allocation3 + $0x180] sm:$0xf]  ;;  %v3519_v39 = vld [vmem:[#allocation3 + $0x184] sm:$0xf0]  ;;  %v4565_v49 = vpack.c.bf16 %v4364_v10, %v4362_v20  ;;  %v4577_v20 = vpack.c.bf16 %v4533_v60, %v4531_v48 }
 0x1e5   :  { %1551 = vmatpush.bf16.msrb.mxu2 %v3238_v63  ;;  %v3471_v63 = vld [vmem:[#allocation3 + $0x4] sm:$0xf0]  ;;  %v3286_v16 = vor.u32 %v3521_v7, %v3285_v61  ;;  %v3516_v56 = vld [vmem:[#allocation3 + $0x174] sm:$0xf]  ;;  %v3271_v27 = vld [vmem:[#allocation3 + $0x178] sm:$0xf0]  ;;  %v3278_v14 = vor.u32 %v3519_v39, %v3277_v53 }
 0x1e6   :  { %1600 = vmatpush.bf16.msra.mxu3 %v3302_v30  ;;  %v3503_v30 = vld [vmem:[#allocation3 + $0x104] sm:$0xf0]  ;;  %v3086_v11 = vor.u32 %v3471_v63, %v3085_v15  ;;  %v3335_v40 = vld [vmem:[#allocation3 + $0x1f8] sm:$0xf0]  ;;  %v3274_v25 = vor.u32 %v3516_v56, %v3271_v27  ;;  %v3484_v3 = vld [vmem:[#allocation3 + $0x74] sm:$0xf] }
 0x1e7   :  { %1454 = vmatpush.bf16.msrb.mxu0 %v3102_v32  ;;  %v3532_v32 = vld [vmem:[#allocation3 + $0x1f4] sm:$0xf]  ;;  %v3207_v7 = vld [vmem:[#allocation3 + $0xf8] sm:$0xf0]  ;;  %v3263_v15 = vld [vmem:[#allocation3 + $0x168] sm:$0xf0] }
 0x1e8   :  { %1503 = vmatpush.bf16.msrb.mxu1 %v3166_v35  ;;  %v3150_v35 = vor.u32 %v3487_v28, %v3149_v36  ;;  %v3500_v21 = vld [vmem:[#allocation3 + $0xf4] sm:$0xf]  ;;  %v3338_v61 = vor.u32 %v3532_v32, %v3335_v40  ;;  %v3530_v63 = vld [vmem:[#allocation3 + $0x1e4] sm:$0xf]  ;;  %v3327_v36 = vld [vmem:[#allocation3 + $0x1e8] sm:$0xf0] }
 0x1e9   :  { %1552 = vmatpush.bf16.msrb.mxu2 %v3230_v19  ;;  %v3214_v19 = vor.u32 %v3503_v30, %v3213_v46  ;;  %v3512_v60 = vld [vmem:[#allocation3 + $0x154] sm:$0xf]  ;;  %v3255_v46 = vld [vmem:[#allocation3 + $0x158] sm:$0xf0] }
 0x1ea   :  { %1601 = vmatpush.bf16.msra.mxu3 %v3294_v42  ;;  %v3143_v42 = vld [vmem:[#allocation3 + $0x78] sm:$0xf0]  ;;  %v3528_v30 = vld [vmem:[#allocation3 + $0x1d4] sm:$0xf]  ;;  %v3258_v39 = vor.u32 %v3512_v60, %v3255_v46  ;;  %v4633_v60 = vpack.c.bf16 %v4438_v44, %v4436_v31  ;;  %v4637_v46 = vpack.c.bf16 %v4545_v33, %v4543_v9  ;;  %v3103_v31 = vld [vmem:[#allocation3 + $0x28] sm:$0xf0] }
 0x1eb   :  { %1455 = vmatpush.bf16.msrb.mxu0 %v3094_v52  ;;  %v3514_v52 = vld [vmem:[#allocation3 + $0x164] sm:$0xf]  ;;  %v3146_v10 = vor.u32 %v3484_v3, %v3143_v42  ;;  %v3319_v56 = vld [vmem:[#allocation3 + $0x1d8] sm:$0xf0]  ;;  %v3480_v27 = vld [vmem:[#allocation3 + $0x54] sm:$0xf]  ;;  %v4585_v3 = vpack.c.bf16 %v4368_v54, %v4366_v22  ;;  %v4589_v42 = vpack.c.bf16 %v4308_v2, %v4306_v4 }
 0x1ec   :  { %1504 = vmatpush.bf16.msrb.mxu1 %v3158_v37  ;;  %v4569_v37 = vpack.c.bf16 %v4304_v17, %v4302_v0  ;;  %v3266_v28 = vor.u32 %v3514_v52, %v3263_v15  ;;  %v3135_v0 = vld [vmem:[#allocation3 + $0x68] sm:$0xf0]  ;;  %v3330_v17 = vor.u32 %v3530_v63, %v3327_v36  ;;  %v3127_v32 = vld [vmem:[#allocation3 + $0x58] sm:$0xf0]  ;;  %v3322_v40 = vor.u32 %v3528_v30, %v3319_v56  ;;  %v3510_v22 = vld [vmem:[#allocation3 + $0x144] sm:$0xf] }
 0x1ed   :  { %1553 = vmatpush.bf16.msrb.mxu2 %v3222_v8  ;;  %v4573_v8 = vpack.c.bf16 %v4426_v23, %v4424_v29  ;;  %v3498_v29 = vld [vmem:[#allocation3 + $0xe4] sm:$0xf]  ;;  %v3199_v23 = vld [vmem:[#allocation3 + $0xe8] sm:$0xf0]  ;;  %v4605_v36 = vpack.c.bf16 %v4372_v51, %v4370_v6  ;;  %v3508_v6 = vld [vmem:[#allocation3 + $0x134] sm:$0xf] }
 0x1ee   :  { %1602 = vmatpush.bf16.msra.mxu3 %v3286_v16  ;;  %v3482_v16 = vld [vmem:[#allocation3 + $0x64] sm:$0xf]  ;;  %v3202_v53 = vor.u32 %v3498_v29, %v3199_v23  ;;  %v3247_v54 = vld [vmem:[#allocation3 + $0x148] sm:$0xf0]  ;;  %v3239_v51 = vld [vmem:[#allocation3 + $0x138] sm:$0xf0]  ;;  %v4625_v23 = vpack.c.bf16 %v4376_v59, %v4374_v12 }
 0x1ef   :  { %1456 = vmatpush.bf16.msrb.mxu0 %v3086_v11  ;;  %v3210_v11 = vor.u32 %v3500_v21, %v3207_v7  ;;  %v3138_v48 = vor.u32 %v3482_v16, %v3135_v0  ;;  %v4593_v21 = vpack.c.bf16 %v4430_v43, %v4428_v34  ;;  %v3526_v4 = vld [vmem:[#allocation3 + $0x1c4] sm:$0xf]  ;;  %v3250_v2 = vor.u32 %v3510_v22, %v3247_v54  ;;  %v3311_v7 = vld [vmem:[#allocation3 + $0x1c8] sm:$0xf0]  ;;  %v3303_v16 = vld [vmem:[#allocation3 + $0x1b8] sm:$0xf0] }
 0x1f0   :  { %1505 = vmatpush.bf16.msrb.mxu1 %v3150_v35  ;;  %v3496_v35 = vld [vmem:[#allocation3 + $0xd4] sm:$0xf]  ;;  %v3478_v52 = vld [vmem:[#allocation3 + $0x44] sm:$0xf]  ;;  %v3119_v34 = vld [vmem:[#allocation3 + $0x48] sm:$0xf0]  ;;  %v3314_v43 = vor.u32 %v3526_v4, %v3311_v7  ;;  %v4657_v54 = vpack.c.bf16 %v4549_v13, %v4547_v41 }
 0x1f1   :  { %1554 = vmatpush.bf16.msrb.mxu2 %v3214_v19  ;;  %v3191_v19 = vld [vmem:[#allocation3 + $0xd8] sm:$0xf0]  ;;  %v3122_v15 = vor.u32 %v3478_v52, %v3119_v34  ;;  %v3494_v63 = vld [vmem:[#allocation3 + $0xc4] sm:$0xf]  ;;  %v3476_v0 = vld [vmem:[#allocation3 + $0x34] sm:$0xf] }
 0x1f2   :  { %1603 = vmatpush.bf16.msra.mxu3 %v3278_v14  ;;  %1457 = vmatmul.bf16.vlgmr.msrb.gmra.mxu0 %v4565_v49  ;;  %v3130_v14 = vor.u32 %v3480_v27, %v3127_v32  ;;  %v3492_v29 = vld [vmem:[#allocation3 + $0xb4] sm:$0xf]  ;;  %v3506_v12 = vld [vmem:[#allocation3 + $0x124] sm:$0xf]  ;;  %v3231_v59 = vld [vmem:[#allocation3 + $0x128] sm:$0xf0] }
 0x1f3   :  { %1506 = vmatmul.bf16.vlgmr.msrb.gmra.mxu1 %v4569_v37  ;;  %1645 = vmatpush.bf16.msra.mxu0 %v3146_v10  ;;  %v4609_v10 = vpack.c.bf16 %v4312_v55, %v4310_v18  ;;  %v3524_v18 = vld [vmem:[#allocation3 + $0x1b4] sm:$0xf]  ;;  %v3242_v55 = vor.u32 %v3508_v6, %v3239_v51  ;;  %v3295_v30 = vld [vmem:[#allocation3 + $0x1a8] sm:$0xf0]  ;;  %v3490_v56 = vld [vmem:[#allocation3 + $0xa4] sm:$0xf] }
 0x1f4   :  { %1555 = vmatmul.bf16.vlgmr.msrb.gmra.mxu2 %v4573_v8  ;;  %1694 = vmatpush.bf16.msra.mxu1 %v3210_v11  ;;  %v4613_v11 = vpack.c.bf16 %v4434_v26, %v4432_v58  ;;  %v3111_v58 = vld [vmem:[#allocation3 + $0x38] sm:$0xf0]  ;;  %v3306_v26 = vor.u32 %v3524_v18, %v3303_v16  ;;  %v3167_v9 = vld [vmem:[#allocation3 + $0xa8] sm:$0xf0]  ;;  %v5589_v27 = vld [vmem:[#allocation47_spill] sm:$0xff] }
 0x1f5   :  { %1743 = vmatpush.bf16.msra.mxu2 %v3274_v25  ;;  %1604 = vmatmul.bf16.vlgmr.msra.gmra.mxu3 %v4577_v20  ;;  %v3194_v25 = vor.u32 %v3496_v35, %v3191_v19  ;;  %v3170_v33 = vor.u32 %v3490_v56, %v3167_v9  ;;  %v4645_v32 = vpack.c.bf16 %v5589_v27, %v4378_v38  ;;  %v5591_v35 = vld [vmem:[#allocation40_spill] sm:$0xff]  ;;  %v3504_v38 = vld [vmem:[#allocation3 + $0x114] sm:$0xf]  ;;  %v3223_v4 = vld [vmem:[#allocation3 + $0x118] sm:$0xf0] }
 0x1f6   :  { %1792 = vmatpush.bf16.msrb.mxu3 %v3338_v61  ;;  %v4597_v61 = vpack.c.bf16 %v4537_v50, %v4535_v62  ;;  %v3183_v62 = vld [vmem:[#allocation3 + $0xc8] sm:$0xf0]  ;;  %v3226_v7 = vor.u32 %v3504_v38, %v3223_v4  ;;  %v3287_v52 = vld [vmem:[#allocation3 + $0x198] sm:$0xf0]  ;;  %v3472_v34 = vld [vmem:[#allocation3 + $0x14] sm:$0xf] }
 0x1f7   :  { %1646 = vmatpush.bf16.msra.mxu0 %v3138_v48  ;;  %v3186_v50 = vor.u32 %v3494_v63, %v3183_v62  ;;  %v4629_v48 = vpack.c.bf16 %v4316_v24, %v4314_v1  ;;  %v3522_v1 = vld [vmem:[#allocation3 + $0x1a4] sm:$0xf]  ;;  %v3234_v24 = vor.u32 %v3506_v12, %v3231_v59  ;;  %v3488_v62 = vld [vmem:[#allocation3 + $0x94] sm:$0xf]  ;;  %v3159_v41 = vld [vmem:[#allocation3 + $0x98] sm:$0xf0] }
 0x1f8   :  { %1695 = vmatpush.bf16.msra.mxu1 %v3202_v53  ;;  %v3474_v53 = vld [vmem:[#allocation3 + $0x24] sm:$0xf]  ;;  %v3298_v44 = vor.u32 %v3522_v1, %v3295_v30  ;;  %v3162_v13 = vor.u32 %v3488_v62, %v3159_v41  ;;  %v5595_v6 = vld [vmem:[#allocation49_spill] sm:$0xff]  ;;  %v3279_v59 = vld [vmem:[#allocation3 + $0x188] sm:$0xf0] }
 0x1f9   :  { %1744 = vmatpush.bf16.msra.mxu2 %v3266_v28  ;;  %v4617_v28 = vpack.c.bf16 %v4541_v57, %v4539_v45  ;;  %v3175_v45 = vld [vmem:[#allocation3 + $0xb8] sm:$0xf0]  ;;  %v5596_v18 = vld [vmem:[#allocation41_spill] sm:$0xff]  ;;  %v3470_v1 = vld [vmem:[#allocation3 + $0x4] sm:$0xf] }
 0x1fa   :  { %1793 = vmatpush.bf16.msrb.mxu3 %v3330_v17  ;;  %v3114_v17 = vor.u32 %v3476_v0, %v3111_v58  ;;  %v3178_v57 = vor.u32 %v3492_v29, %v3175_v45  ;;  %v5598_v0 = vld [vmem:[#allocation23_spill] sm:$0xff]  ;;  %v5599_v58 = vld [vmem:[#allocation24_spill] sm:$0xff]  ;;  %v5607_v38 = vld [vmem:[#allocation30_spill] sm:$0xff] }
 0x1fb   :  { %1647 = vmatpush.bf16.msra.mxu0 %v3130_v14  ;;  %v5592_v14 = vld [vmem:[#allocation31_spill] sm:$0xff]  ;;  %v3215_v45 = vld [vmem:[#allocation3 + $0x108] sm:$0xf0] }
 0x1fc   :  { %1696 = vmatpush.bf16.msra.mxu1 %v3194_v25  ;;  %v5593_v25 = vld [vmem:[#allocation33_spill] sm:$0xff]  ;;  %v3502_v29 = vld [vmem:[#allocation3 + $0x104] sm:$0xf]  ;;  %v5613_v62 = vld [vmem:[#allocation28_spill] sm:$0xff] }
 0x1fd   :  { %1745 = vmatpush.bf16.msra.mxu2 %v3258_v39  ;;  %v3106_v39 = vor.u32 %v3474_v53, %v3103_v31  ;;  %v4653_v22 = vpack.c.bf16 %v5593_v25, %v5592_v14  ;;  %v3218_v12 = vor.u32 %v3502_v29, %v3215_v45  ;;  %v3486_v31 = vld [vmem:[#allocation3 + $0x84] sm:$0xf]  ;;  %v5606_v25 = vld [vmem:[#allocation29_spill] sm:$0xff] }
 0x1fe   :  { %1794 = vmatpush.bf16.msrb.mxu3 %v3322_v40  ;;  %v5590_v40 = vld [vmem:[#allocation39_spill] sm:$0xff]  ;;  %v4697_v4 = vpack.c.bf16 %v5607_v38, %v5606_v25 }
 0x1ff   :  { %1648 = vmatpush.bf16.msra.mxu0 %v3122_v15  ;;  %v4649_v19 = vpack.c.bf16 %v5591_v35, %v5590_v40  ;;  %v5602_v9 = vld [vmem:[#allocation43_spill] sm:$0xff]  ;;  %v5604_v40 = vld [vmem:[#allocation25_spill] sm:$0xff]  ;;  %v5605_v35 = vld [vmem:[#allocation26_spill] sm:$0xff] }
 0x200   :  { %1697 = vmatpush.bf16.msra.mxu1 %v3186_v50  ;;  %v5594_v50 = vld [vmem:[#allocation48_spill] sm:$0xff]  ;;  %v4693_v14 = vpack.c.bf16 %v5605_v35, %v5604_v40 }
 0x201   :  { %1746 = vmatpush.bf16.msra.mxu2 %v3250_v2  ;;  %v3520_v2 = vld [vmem:[#allocation3 + $0x194] sm:$0xf]  ;;  %v4665_v51 = vpack.c.bf16 %v5595_v6, %v5594_v50  ;;  %v5615_v50 = vld [vmem:[#allocation34_spill] sm:$0xff] }
 0x202   :  { %1462 = vmatmul.bf16.gmra.mxu0 %v4585_v3  ;;  %1795 = vmatpush.bf16.msrb.mxu3 %v3314_v43  ;;  %v3095_v43 = vld [vmem:[#allocation3 + $0x18] sm:$0xf0]  ;;  %v3290_v15 = vor.u32 %v3520_v2, %v3287_v52  ;;  %v5608_v2 = vld [vmem:[#allocation52_spill] sm:$0xff] }
 0x203   :  { %1511 = vmatmul.bf16.gmra.mxu1 %v4589_v42  ;;  %1649 = vmatpush.bf16.msra.mxu0 %v3114_v17  ;;  %v3098_v63 = vor.u32 %v3472_v34, %v3095_v43  ;;  %v4677_v17 = vpack.c.bf16 %v4553_v47, %v4551_v5  ;;  %v3151_v5 = vld [vmem:[#allocation3 + $0x88] sm:$0xf0]  ;;  %v5610_v34 = vld [vmem:[#allocation45_spill] sm:$0xff]  ;;  %v5611_v43 = vld [vmem:[#allocation46_spill] sm:$0xff] }
 0x204   :  { %1560 = vmatmul.bf16.gmra.mxu2 %v4593_v21  ;;  %1698 = vmatpush.bf16.msra.mxu1 %v3178_v57  ;;  %v3518_v57 = vld [vmem:[#allocation3 + $0x184] sm:$0xf]  ;;  %v3154_v47 = vor.u32 %v3486_v31, %v3151_v5 }
 0x205   :  { %1609 = vmatmul.bf16.gmra.mxu3 %v4597_v61  ;;  %1747 = vmatpush.bf16.msra.mxu2 %v3242_v55  ;;  %v5597_v55 = vld [vmem:[#allocation42_spill] sm:$0xff]  ;;  %v3282_v30 = vor.u32 %v3518_v57, %v3279_v59 }
 0x206   :  { %1796 = vmatpush.bf16.msrb.mxu3 %v3306_v26  ;;  %v4669_v16 = vpack.c.bf16 %v5597_v55, %v5596_v18  ;;  %v4673_v26 = vpack.c.bf16 %v5599_v58, %v5598_v0 }
 0x207   :  { %1650 = vmatpush.bf16.msra.mxu0 %v3106_v39  ;;  %v5601_v39 = vld [vmem:[#allocation51_spill] sm:$0xff] }
 0x208   :  { %1699 = vmatpush.bf16.msra.mxu1 %v3170_v33  ;;  %v5603_v33 = vld [vmem:[#allocation44_spill] sm:$0xff] }
 0x209   :  { %1748 = vmatpush.bf16.msra.mxu2 %v3234_v24  ;;  %v3087_v24 = vld [vmem:[#allocation3 + $0x8] sm:$0xf0]  ;;  %v4689_v27 = vpack.c.bf16 %v5603_v33, %v5602_v9 }
 0x20a   :  { %1797 = vmatpush.bf16.msrb.mxu3 %v3298_v44  ;;  %v3090_v53 = vor.u32 %v3470_v1, %v3087_v24  ;;  %v5600_v44 = vld [vmem:[#allocation50_spill] sm:$0xff] }
 0x20b   :  { %1651 = vmatpush.bf16.msra.mxu0 %v3098_v63  ;;  %v4685_v56 = vpack.c.bf16 %v5601_v39, %v5600_v44  ;;  %v5612_v63 = vld [vmem:[#allocation27_spill] sm:$0xff] }
 0x20c   :  { %1700 = vmatpush.bf16.msra.mxu1 %v3162_v13  ;;  %v4713_v41 = vpack.c.bf16 %v5613_v62, %v5612_v63  ;;  %v5614_v13 = vld [vmem:[#allocation32_spill] sm:$0xff] }
 0x20d   :  { %1749 = vmatpush.bf16.msra.mxu2 %v3226_v7  ;;  %v5609_v7 = vld [vmem:[#allocation53_spill] sm:$0xff]  ;;  %v4717_v6 = vpack.c.bf16 %v5615_v50, %v5614_v13 }
 0x20e   :  { %1798 = vmatpush.bf16.msrb.mxu3 %v3290_v15  ;;  %v4705_v52 = vpack.c.bf16 %v5609_v7, %v5608_v2  ;;  %v4709_v15 = vpack.c.bf16 %v5611_v43, %v5610_v34 }
 0x20f   :  { %1652 = vmatpush.bf16.msra.mxu0 %v3090_v53 }
 0x210   :  { %1701 = vmatpush.bf16.msra.mxu1 %v3154_v47 }
 0x211   :  { %1750 = vmatpush.bf16.msra.mxu2 %v3218_v12 }
 0x212   :  { %1467 = vmatmul.bf16.gmra.mxu0 %v4605_v36  ;;  %1799 = vmatpush.bf16.msrb.mxu3 %v3282_v30 }
 0x213   :  { %1516 = vmatmul.bf16.gmra.mxu1 %v4609_v10 }
 0x214   :  { %1565 = vmatmul.bf16.gmra.mxu2 %v4613_v11 }
 0x215   :  { %1614 = vmatmul.bf16.gmra.mxu3 %v4617_v28 }
 0x222   :  { %1472 = vmatmul.bf16.gmra.mxu0 %v4625_v23 }
 0x223   :  { %1521 = vmatmul.bf16.gmra.mxu1 %v4629_v48 }
 0x224   :  { %1570 = vmatmul.bf16.gmra.mxu2 %v4633_v60 }
 0x225   :  { %1619 = vmatmul.bf16.gmra.mxu3 %v4637_v46 }
 0x232   :  { %1477 = vmatmul.bf16.gmra.mxu0 %v4645_v32 }
 0x233   :  { %1526 = vmatmul.bf16.gmra.mxu1 %v4649_v19 }
 0x234   :  { %1575 = vmatmul.bf16.gmra.mxu2 %v4653_v22 }
 0x235   :  { %1624 = vmatmul.bf16.gmra.mxu3 %v4657_v54 }
 0x242   :  { %1482 = vmatmul.bf16.gmra.mxu0 %v4665_v51 }
 0x243   :  { %1531 = vmatmul.bf16.gmra.mxu1 %v4669_v16 }
 0x244   :  { %1580 = vmatmul.bf16.gmra.mxu2 %v4673_v26 }
 0x245   :  { %1629 = vmatmul.bf16.gmra.mxu3 %v4677_v17 }
 0x252   :  { %1487 = vmatmul.bf16.gmra.mxu0 %v4685_v56 }
 0x253   :  { %1536 = vmatmul.bf16.gmra.mxu1 %v4689_v27 }
 0x254   :  { %1585 = vmatmul.bf16.gmra.mxu2 %v4693_v14 }
 0x255   :  { %1634 = vmatmul.bf16.gmra.mxu3 %v4697_v4 }
 0x262   :  { %1492 = vmatmul.bf16.gmra.mxu0 %v4705_v52 }
 0x263   :  { %1541 = vmatmul.bf16.gmra.mxu1 %v4709_v15 }
 0x264   :  { %1590 = vmatmul.bf16.gmra.mxu2 %v4713_v41 }
 0x265   :  { %1639 = vmatmul.bf16.gmra.mxu3 %v4717_v6 }
 0x26f   :  { %v1458_v18 = vpop.f32.mrf.mxu0 }
 0x270   :  { %v1507_v55 = vpop.f32.mrf.mxu1 }
 0x271   :  { %v1508_v0 = vadd.f32 %v1507_v55, %v1458_v18 }
 0x272   :  { %1653 = vmatmul.bf16.vlgmr.msra.gmra.mxu0 %v4565_v49 }
 0x273   :  { %1702 = vmatmul.bf16.vlgmr.msra.gmra.mxu1 %v4569_v37 }
 0x274   :  { %1751 = vmatmul.bf16.vlgmr.msra.gmra.mxu2 %v4573_v8 }
 0x275   :  { %1800 = vmatmul.bf16.vlgmr.msrb.gmra.mxu3 %v4577_v20 }
 0x277   :  { %v1556_v58 = vpop.f32.mrf.mxu2  ;;  %v1460_v57 = vpop.f32.mrf.mxu0 }
 0x278   :  { %v1557_v29 = vadd.f32 %v1556_v58, %v1508_v0  ;;  %v1605_v45 = vpop.f32.mrf.mxu3  ;;  %v1509_v12 = vpop.f32.mrf.mxu1 }
 0x279   :  { %v1510_v1 = vadd.f32 %v1509_v12, %v1460_v57 }
 0x27a   :  { %v4727_v59 = vadd.f32 %v1605_v45, %v1557_v29 }
 0x27f   :  { %v1558_v24 = vpop.f32.mrf.mxu2  ;;  %v1463_v31 = vpop.f32.mrf.mxu0 }
 0x280   :  { %v1559_v30 = vadd.f32 %v1558_v24, %v1510_v1  ;;  %v1607_v53 = vpop.f32.mrf.mxu3  ;;  %v1512_v5 = vpop.f32.mrf.mxu1 }
 0x281   :  { %v1513_v37 = vadd.f32 %v1512_v5, %v1463_v31 }
 0x282   :  { %v4729_v49 = vadd.f32 %v1607_v53, %v1559_v30  ;;  %1658 = vmatmul.bf16.gmra.mxu0 %v4585_v3 }
 0x283   :  { %1707 = vmatmul.bf16.gmra.mxu1 %v4589_v42 }
 0x284   :  { %1756 = vmatmul.bf16.gmra.mxu2 %v4593_v21  ;;  %v1887_v1 = vmul.f32 %v4729_v49, %v4729_v49 }
 0x285   :  { %1805 = vmatmul.bf16.gmra.mxu3 %v4597_v61 }
 0x287   :  { %v1561_v8 = vpop.f32.mrf.mxu2  ;;  %v1465_v44 = vpop.f32.mrf.mxu0 }
 0x288   :  { %v1562_v20 = vadd.f32 %v1561_v8, %v1513_v37  ;;  %v1610_v47 = vpop.f32.mrf.mxu3  ;;  %v1514_v39 = vpop.f32.mrf.mxu1 }
 0x289   :  { %v1515_v33 = vadd.f32 %v1514_v39, %v1465_v44 }
 0x28a   :  { %v4735_v9 = vadd.f32 %v1610_v47, %v1562_v20 }
 0x28f   :  { %v1563_v40 = vpop.f32.mrf.mxu2  ;;  %v1468_v38 = vpop.f32.mrf.mxu0 }
 0x290   :  { %v1564_v35 = vadd.f32 %v1563_v40, %v1515_v33  ;;  %v1612_v25 = vpop.f32.mrf.mxu3  ;;  %v1517_v2 = vpop.f32.mrf.mxu1 }
 0x291   :  { %v1518_v42 = vadd.f32 %v1517_v2, %v1468_v38 }
 0x292   :  { %v4737_v3 = vadd.f32 %v1612_v25, %v1564_v35  ;;  %1663 = vmatmul.bf16.gmra.mxu0 %v4605_v36 }
 0x293   :  { %1712 = vmatmul.bf16.gmra.mxu1 %v4609_v10 }
 0x294   :  { %1761 = vmatmul.bf16.gmra.mxu2 %v4613_v11  ;;  %v1891_v53 = vmul.f32 %v4737_v3, %v4737_v3 }
 0x295   :  { %1810 = vmatmul.bf16.gmra.mxu3 %v4617_v28 }
 0x297   :  { %v1566_v21 = vpop.f32.mrf.mxu2  ;;  %v1470_v34 = vpop.f32.mrf.mxu0 }
 0x298   :  { %v1567_v61 = vadd.f32 %v1566_v21, %v1518_v42  ;;  %v1615_v7 = vpop.f32.mrf.mxu3  ;;  %v1519_v43 = vpop.f32.mrf.mxu1 }
 0x299   :  { %v1520_v62 = vadd.f32 %v1519_v43, %v1470_v34 }
 0x29a   :  { %v4743_v63 = vadd.f32 %v1615_v7, %v1567_v61 }
 0x29c   :  { %v1893_v44 = vmul.f32 %v4743_v63, %v4743_v63 }
 0x29f   :  { %v1568_v13 = vpop.f32.mrf.mxu2  ;;  %v1473_v55 = vpop.f32.mrf.mxu0 }
 0x2a0   :  { %v1569_v50 = vadd.f32 %v1568_v13, %v1520_v62  ;;  %v1617_v18 = vpop.f32.mrf.mxu3  ;;  %v1522_v0 = vpop.f32.mrf.mxu1 }
 0x2a1   :  { %v1523_v10 = vadd.f32 %v1522_v0, %v1473_v55 }
 0x2a2   :  { %v4745_v36 = vadd.f32 %v1617_v18, %v1569_v50  ;;  %1668 = vmatmul.bf16.gmra.mxu0 %v4625_v23  ;;  %v1885_v23 = vmul.f32 %v4727_v59, %v4727_v59 }
 0x2a3   :  { %1717 = vmatmul.bf16.gmra.mxu1 %v4629_v48  ;;  %v1889_v48 = vmul.f32 %v4735_v9, %v4735_v9 }
 0x2a4   :  { %1766 = vmatmul.bf16.gmra.mxu2 %v4633_v60  ;;  %v1841_v60 = vadd.f32 %v4729_v49, %v4727_v59  ;;  %v1895_v25 = vmul.f32 %v4745_v36, %v4745_v36 }
 0x2a5   :  { %1815 = vmatmul.bf16.gmra.mxu3 %v4637_v46  ;;  %v1917_v46 = vadd.f32 %v1887_v1, %v1885_v23 }
 0x2a6   :  { %v1842_v30 = vadd.f32 %v1841_v60, %v4735_v9 }
 0x2a7   :  { %v1571_v11 = vpop.f32.mrf.mxu2  ;;  %v1475_v29 = vpop.f32.mrf.mxu0  ;;  %v1918_v8 = vadd.f32 %v1917_v46, %v1889_v48 }
 0x2a8   :  { %v1572_v28 = vadd.f32 %v1571_v11, %v1523_v10  ;;  %v1620_v58 = vpop.f32.mrf.mxu3  ;;  %v1524_v45 = vpop.f32.mrf.mxu1  ;;  %v1843_v47 = vadd.f32 %v1842_v30, %v4737_v3 }
 0x2a9   :  { %v1525_v12 = vadd.f32 %v1524_v45, %v1475_v29  ;;  %v1919_v40 = vadd.f32 %v1918_v8, %v1891_v53 }
 0x2aa   :  { %v4751_v57 = vadd.f32 %v1620_v58, %v1572_v28  ;;  %v1844_v35 = vadd.f32 %v1843_v47, %v4743_v63 }
 0x2ab   :  { %v1920_v38 = vadd.f32 %v1919_v40, %v1893_v44 }
 0x2ac   :  { %v1845_v2 = vadd.f32 %v1844_v35, %v4745_v36  ;;  %v1897_v42 = vmul.f32 %v4751_v57, %v4751_v57 }
 0x2ae   :  { %v1846_v61 = vadd.f32 %v1845_v2, %v4751_v57 }
 0x2af   :  { %v1573_v24 = vpop.f32.mrf.mxu2  ;;  %v1478_v37 = vpop.f32.mrf.mxu0 }
 0x2b0   :  { %v1574_v31 = vadd.f32 %v1573_v24, %v1525_v12  ;;  %v1622_v5 = vpop.f32.mrf.mxu3  ;;  %v1527_v20 = vpop.f32.mrf.mxu1 }
 0x2b1   :  { %v1528_v33 = vadd.f32 %v1527_v20, %v1478_v37 }
 0x2b2   :  { %v4767_v39 = vadd.f32 %v1622_v5, %v1574_v31  ;;  %1673 = vmatmul.bf16.gmra.mxu0 %v4645_v32  ;;  %v1921_v32 = vadd.f32 %v1920_v38, %v1895_v25 }
 0x2b3   :  { %1722 = vmatmul.bf16.gmra.mxu1 %v4649_v19 }
 0x2b4   :  { %1771 = vmatmul.bf16.gmra.mxu2 %v4653_v22  ;;  %v1899_v7 = vmul.f32 %v4767_v39, %v4767_v39  ;;  %v1922_v22 = vadd.f32 %v1921_v32, %v1897_v42 }
 0x2b5   :  { %1820 = vmatmul.bf16.gmra.mxu3 %v4657_v54  ;;  %v1847_v54 = vadd.f32 %v1846_v61, %v4767_v39 }
 0x2b6   :  { %v1923_v18 = vadd.f32 %v1922_v22, %v1899_v7 }
 0x2b7   :  { %v1576_v21 = vpop.f32.mrf.mxu2  ;;  %v1480_v19 = vpop.f32.mrf.mxu0 }
 0x2b8   :  { %v1577_v34 = vadd.f32 %v1576_v21, %v1528_v33  ;;  %v1625_v43 = vpop.f32.mrf.mxu3  ;;  %v1529_v62 = vpop.f32.mrf.mxu1 }
 0x2b9   :  { %v1530_v50 = vadd.f32 %v1529_v62, %v1480_v19 }
 0x2ba   :  { %v4783_v13 = vadd.f32 %v1625_v43, %v1577_v34 }
 0x2bc   :  { %v1848_v55 = vadd.f32 %v1847_v54, %v4783_v13  ;;  %v1901_v0 = vmul.f32 %v4783_v13, %v4783_v13 }
 0x2be   :  { %v1924_v10 = vadd.f32 %v1923_v18, %v1901_v0 }
 0x2bf   :  { %v1578_v11 = vpop.f32.mrf.mxu2  ;;  %v1483_v29 = vpop.f32.mrf.mxu0 }
 0x2c0   :  { %v1579_v28 = vadd.f32 %v1578_v11, %v1530_v50  ;;  %v1627_v58 = vpop.f32.mrf.mxu3  ;;  %v1532_v45 = vpop.f32.mrf.mxu1 }
 0x2c1   :  { %v1533_v1 = vadd.f32 %v1532_v45, %v1483_v29 }
 0x2c2   :  { %v4788_v12 = vadd.f32 %v1627_v58, %v1579_v28  ;;  %1678 = vmatmul.bf16.gmra.mxu0 %v4665_v51 }
 0x2c3   :  { %1727 = vmatmul.bf16.gmra.mxu1 %v4669_v16 }
 0x2c4   :  { %v1849_v23 = vadd.f32 %v1848_v55, %v4788_v12  ;;  %v1903_v48 = vmul.f32 %v4788_v12, %v4788_v12  ;;  %1776 = vmatmul.bf16.gmra.mxu2 %v4673_v26 }
 0x2c5   :  { %1825 = vmatmul.bf16.gmra.mxu3 %v4677_v17 }
 0x2c6   :  { %v1925_v60 = vadd.f32 %v1924_v10, %v1903_v48 }
 0x2c7   :  { %v1581_v46 = vpop.f32.mrf.mxu2  ;;  %v1485_v53 = vpop.f32.mrf.mxu0 }
 0x2c8   :  { %v1582_v24 = vadd.f32 %v1581_v46, %v1533_v1  ;;  %v1630_v30 = vpop.f32.mrf.mxu3  ;;  %v1534_v31 = vpop.f32.mrf.mxu1 }
 0x2c9   :  { %v1535_v51 = vadd.f32 %v1534_v31, %v1485_v53 }
 0x2ca   :  { %v4797_v5 = vadd.f32 %v1630_v30, %v1582_v24 }
 0x2cc   :  { %v1850_v37 = vadd.f32 %v1849_v23, %v4797_v5  ;;  %v1905_v8 = vmul.f32 %v4797_v5, %v4797_v5 }
 0x2ce   :  { %v1926_v20 = vadd.f32 %v1925_v60, %v1905_v8 }
 0x2cf   :  { %v1583_v16 = vpop.f32.mrf.mxu2  ;;  %v1488_v44 = vpop.f32.mrf.mxu0 }
 0x2d0   :  { %v1584_v47 = vadd.f32 %v1583_v16, %v1535_v51  ;;  %v1632_v26 = vpop.f32.mrf.mxu3  ;;  %v1537_v17 = vpop.f32.mrf.mxu1 }
 0x2d1   :  { %v1538_v40 = vadd.f32 %v1537_v17, %v1488_v44 }
 0x2d2   :  { %v4802_v33 = vadd.f32 %v1632_v26, %v1584_v47  ;;  %1683 = vmatmul.bf16.gmra.mxu0 %v4685_v56 }
 0x2d3   :  { %1732 = vmatmul.bf16.gmra.mxu1 %v4689_v27 }
 0x2d4   :  { %v1851_v35 = vadd.f32 %v1850_v37, %v4802_v33  ;;  %v1907_v25 = vmul.f32 %v4802_v33, %v4802_v33  ;;  %1781 = vmatmul.bf16.gmra.mxu2 %v4693_v14 }
 0x2d5   :  { %1830 = vmatmul.bf16.gmra.mxu3 %v4697_v4 }
 0x2d6   :  { %v1927_v38 = vadd.f32 %v1926_v20, %v1907_v25 }
 0x2d7   :  { %v1586_v2 = vpop.f32.mrf.mxu2  ;;  %v1490_v32 = vpop.f32.mrf.mxu0 }
 0x2d8   :  { %v1587_v42 = vadd.f32 %v1586_v2, %v1538_v40  ;;  %v1635_v21 = vpop.f32.mrf.mxu3  ;;  %v1539_v61 = vpop.f32.mrf.mxu1 }
 0x2d9   :  { %v1540_v56 = vadd.f32 %v1539_v61, %v1490_v32 }
 0x2da   :  { %v4811_v7 = vadd.f32 %v1635_v21, %v1587_v42 }
 0x2dc   :  { %v1852_v34 = vadd.f32 %v1851_v35, %v4811_v7  ;;  %v1909_v43 = vmul.f32 %v4811_v7, %v4811_v7 }
 0x2de   :  { %v1928_v19 = vadd.f32 %v1927_v38, %v1909_v43 }
 0x2df   :  { %v1588_v27 = vpop.f32.mrf.mxu2  ;;  %v1493_v22 = vpop.f32.mrf.mxu0 }
 0x2e0   :  { %v1589_v62 = vadd.f32 %v1588_v27, %v1540_v56  ;;  %v1637_v14 = vpop.f32.mrf.mxu3  ;;  %v1542_v4 = vpop.f32.mrf.mxu1 }
 0x2e1   :  { %v1543_v50 = vadd.f32 %v1542_v4, %v1493_v22 }
 0x2e2   :  { %v4816_v54 = vadd.f32 %v1637_v14, %v1589_v62  ;;  %1688 = vmatmul.bf16.gmra.mxu0 %v4705_v52 }
 0x2e3   :  { %1737 = vmatmul.bf16.gmra.mxu1 %v4709_v15 }
 0x2e4   :  { %v1853_v18 = vadd.f32 %v1852_v34, %v4816_v54  ;;  %v1911_v55 = vmul.f32 %v4816_v54, %v4816_v54  ;;  %1786 = vmatmul.bf16.gmra.mxu2 %v4713_v41 }
 0x2e5   :  { %1835 = vmatmul.bf16.gmra.mxu3 %v4717_v6 }
 0x2e6   :  { %v1929_v0 = vadd.f32 %v1928_v19, %v1911_v55 }
 0x2e7   :  { %v1591_v10 = vpop.f32.mrf.mxu2  ;;  %v1495_v58 = vpop.f32.mrf.mxu0 }
 0x2e8   :  { %v1592_v11 = vadd.f32 %v1591_v10, %v1543_v50  ;;  %v1640_v28 = vpop.f32.mrf.mxu3  ;;  %v1544_v29 = vpop.f32.mrf.mxu1 }
 0x2e9   :  { %v1545_v52 = vadd.f32 %v1544_v29, %v1495_v58 }
 0x2ea   :  { %v4825_v45 = vadd.f32 %v1640_v28, %v1592_v11 }
 0x2ec   :  { %v1854_v1 = vadd.f32 %v1853_v18, %v4825_v45  ;;  %v1913_v23 = vmul.f32 %v4825_v45, %v4825_v45 }
 0x2ee   :  { %v1930_v48 = vadd.f32 %v1929_v0, %v1913_v23 }
 0x2ef   :  { %v1593_v15 = vpop.f32.mrf.mxu2  ;;  %v1654_v46 = vpop.f32.mrf.mxu0 }
 0x2f0   :  { %v1594_v60 = vadd.f32 %v1593_v15, %v1545_v52  ;;  %v1642_v41 = vpop.f32.mrf.mxu3  ;;  %v1703_v6 = vpop.f32.mrf.mxu1 }
 0x2f1   :  { %v1704_v30 = vadd.f32 %v1703_v6, %v1654_v46 }
 0x2f2   :  { %v4830_v24 = vadd.f32 %v1642_v41, %v1594_v60 }
 0x2f4   :  { %v1855_v53 = vadd.f32 %v1854_v1, %v4830_v24  ;;  %v1915_v31 = vmul.f32 %v4830_v24, %v4830_v24 }
 0x2f6   :  { %v1856_v51 = vrot.slane %v1855_v53, 4  ;;  %v1931_v37 = vadd.f32 %v1930_v48, %v1915_v31 }
 0x2f7   :  { %v1752_v8 = vpop.f32.mrf.mxu2  ;;  %v1656_v44 = vpop.f32.mrf.mxu0 }
 0x2f8   :  { %v1857_v20 = vadd.f32 %v1856_v51, %v1855_v53  ;;  %v1932_v16 = vrot.slane %v1931_v37, 4  ;;  %v1753_v47 = vadd.f32 %v1752_v8, %v1704_v30  ;;  %v1801_v26 = vpop.f32.mrf.mxu3  ;;  %v1705_v17 = vpop.f32.mrf.mxu1 }
 0x2f9   :  { %v1706_v38 = vadd.f32 %v1705_v17, %v1656_v44 }
 0x2fa   :  { %v1858_v40 = vrot.slane %v1857_v20, 2  ;;  %v1933_v35 = vadd.f32 %v1932_v16, %v1931_v37  ;;  %v4835_v25 = vadd.f32 %v1801_v26, %v1753_v47 }
 0x2fc   :  { %v1859_v2 = vadd.f32 %v1858_v40, %v1857_v20  ;;  %v1934_v42 = vrot.slane %v1933_v35, 2 }
 0x2fe   :  { %v1860_v21 = vrot.slane %v1859_v2, 1  ;;  %v1935_v32 = vadd.f32 %v1934_v42, %v1933_v35 }
 0x2ff   :  { %v1754_v61 = vpop.f32.mrf.mxu2  ;;  %v1659_v27 = vpop.f32.mrf.mxu0 }
 0x300   :  { %v1861_v56 = vadd.f32 %v1860_v21, %v1859_v2  ;;  %v1936_v34 = vrot.slane %v1935_v32, 1  ;;  %v1755_v43 = vadd.f32 %v1754_v61, %v1706_v38  ;;  %v1803_v19 = vpop.f32.mrf.mxu3  ;;  %v1708_v62 = vpop.f32.mrf.mxu1  ;;  %v5616_v38 = vld [vmem:[#allocation38_spill] sm:$0xff] }
 0x301   :  { %v1709_v50 = vadd.f32 %v1708_v62, %v1659_v27 }
 0x302   :  { %v1883_v14 = vmul.f32 0.0078125, %v1861_v56  ;;  %v1937_v22 = vadd.f32 %v1936_v34, %v1935_v32  ;;  %v4837_v4 = vadd.f32 %v1803_v19, %v1755_v43 }
 0x304   :  { %v1959_v18 = vmul.f32 0.0078125, %v1937_v22  ;;  %v1961_v55 = vmul.f32 %v1883_v14, %v1883_v14 }
 0x306   :  { %v1963_v0 = vsub.f32 %v1959_v18, %v1961_v55 }
 0x307   :  { %v1757_v10 = vpop.f32.mrf.mxu2  ;;  %v1661_v29 = vpop.f32.mrf.mxu0 }
 0x308   :  { %v1965_v11 = vadd.f32 1e-05, %v1963_v0  ;;  %v1758_v28 = vadd.f32 %v1757_v10, %v1709_v50  ;;  %v1806_v58 = vpop.f32.mrf.mxu3  ;;  %v1710_v52 = vpop.f32.mrf.mxu1 }
 0x309   :  { %v1711_v23 = vadd.f32 %v1710_v52, %v1661_v29 }
 0x30a   :  { %3599 = vrsqrt.f32 %v1965_v11  ;;  %v4839_v1 = vadd.f32 %v1806_v58, %v1758_v28  ;;  %vm1973_vm14 = vweird.f32 %v1965_v11 }
 0x30f   :  { %v1759_v48 = vpop.f32.mrf.mxu2  ;;  %v1664_v46 = vpop.f32.mrf.mxu0 }
 0x310   :  { %v3600_v15 = vpop.eup %3599  ;;  %v1760_v60 = vadd.f32 %v1759_v48, %v1711_v23  ;;  %v1808_v41 = vpop.f32.mrf.mxu3 }
 0x311   :  { %v1968_v6 = vmul.f32 %v3600_v15, %v1965_v11  ;;  %v1713_v30 = vpop.f32.mrf.mxu1  ;;  %vm1974_vm13 = vweird.f32 %v3600_v15 }
 0x312   :  { %v4841_v53 = vadd.f32 %v1808_v41, %v1760_v60  ;;  %v1714_v31 = vadd.f32 %v1713_v30, %v1664_v46  ;;  %vm1975_vm15 = vmor %vm1973_vm14, %vm1974_vm13 }
 0x313   :  { %v1969_v51 = vmul.f32 %v3600_v15, %v1968_v6 }
 0x315   :  { %v1970_v37 = vmul.f32 0.5, %v1969_v51 }
 0x317   :  { %v1971_v8 = vsub.f32 1.5, %v1970_v37  ;;  %v1762_v20 = vpop.f32.mrf.mxu2  ;;  %v4843_v26 = vpop.f32.mrf.mxu0 }
 0x318   :  { %v1763_v16 = vadd.f32 %v1762_v20, %v1714_v31  ;;  %v1811_v47 = vpop.f32.mrf.mxu3 }
 0x319   :  { %v1972_v44 = vmul.f32 %v3600_v15, %v1971_v8  ;;  %v4845_v17 = vpop.f32.mrf.mxu1 }
 0x31a   :  { %v4847_v40 = vadd.f32 %v1811_v47, %v1763_v16 }
 0x31b   :  { %v1976_v35 = vsel %vm1975_vm15, %v3600_v15, %v1972_v44 }
 0x31c   :  { %v1987_v2 = vmul.f32 %v1976_v35, %v5616_v38 }
 0x31e   :  { %v1989_v42 = vmul.f32 %v1987_v2, %v1883_v14  ;;  %v1999_v21 = vperm.slane %v1987_v2, 2 }
 0x31f   :  { %v4850_v32 = vpop.f32.mrf.mxu2  ;;  %v1669_v34 = vpop.f32.mrf.mxu0 }
 0x320   :  { %v1993_v61 = vrot.slane %v1989_v42, 7  ;;  %v4852_v56 = vpop.f32.mrf.mxu3  ;;  %v2001_v43 = vmul.f32 %v1999_v21, %v4727_v59  ;;  %v2003_v19 = vmul.f32 %v1999_v21, %v4729_v49  ;;  %v2005_v27 = vmul.f32 %v1999_v21, %v4735_v9 }
 0x321   :  { %v1718_v62 = vpop.f32.mrf.mxu1  ;;  %v2015_v50 = vmul.f32 %v1999_v21, %v4767_v39  ;;  %v2017_v14 = vmul.f32 %v1999_v21, %v4783_v13  ;;  %v2019_v18 = vmul.f32 %v1999_v21, %v4788_v12  ;;  %v2021_v55 = vmul.f32 %v1999_v21, %v4797_v5 }
 0x322   :  { %v1997_v22 = vsub.f32 %v5616_v38, %v1993_v61  ;;  %v2023_v0 = vmul.f32 %v1999_v21, %v4802_v33  ;;  %v2025_v10 = vmul.f32 %v1999_v21, %v4811_v7  ;;  %v2027_v59 = vmul.f32 %v1999_v21, %v4816_v54 }
 0x323   :  { %v2007_v49 = vmul.f32 %v1999_v21, %v4737_v3  ;;  %v2029_v9 = vmul.f32 %v1999_v21, %v4825_v45  ;;  %v2031_v11 = vmul.f32 %v1999_v21, %v4830_v24  ;;  %v2009_v39 = vmul.f32 %v1999_v21, %v4743_v63 }
 0x324   :  { %v2033_v28 = vperm.slane %v1997_v22, 3  ;;  %v2011_v13 = vmul.f32 %v1999_v21, %v4745_v36  ;;  %v2013_v12 = vmul.f32 %v1999_v21, %v4751_v57 }
 0x326   :  { %v4871_v5 = vadd.f32 %v2033_v28, %v2001_v43  ;;  %v4873_v33 = vadd.f32 %v2033_v28, %v2003_v19  ;;  %v4875_v7 = vadd.f32 %v2033_v28, %v2005_v27  ;;  %v4877_v54 = vadd.f32 %v2033_v28, %v2007_v49 }
 0x327   :  { %v4879_v3 = vadd.f32 %v2033_v28, %v2009_v39  ;;  %v4881_v45 = vadd.f32 %v2033_v28, %v2011_v13  ;;  %v4883_v24 = vadd.f32 %v2033_v28, %v2013_v12  ;;  %v4885_v58 = vadd.f32 %v2033_v28, %v2015_v50  ;;  %v1767_v63 = vpop.f32.mrf.mxu2  ;;  %v1671_v48 = vpop.f32.mrf.mxu0 }
 0x328   :  { %v4887_v36 = vadd.f32 %v2033_v28, %v2017_v14  ;;  %v4889_v57 = vadd.f32 %v2033_v28, %v2019_v18  ;;  %v4891_v29 = vadd.f32 %v2033_v28, %v2021_v55  ;;  %v4893_v52 = vadd.f32 %v2033_v28, %v2023_v0  ;;  %v1816_v23 = vpop.f32.mrf.mxu3 }
 0x329   :  { %v4895_v15 = vadd.f32 %v2033_v28, %v2025_v10  ;;  %v4897_v60 = vadd.f32 %v2033_v28, %v2027_v59  ;;  %v4899_v41 = vadd.f32 %v2033_v28, %v2029_v9  ;;  %v4901_v46 = vadd.f32 %v2033_v28, %v2031_v11  ;;  %v1720_v6 = vpop.f32.mrf.mxu1 }
 0x32a   :  { %v1716_v18 = vadd.f32 %v4845_v17, %v4843_v26  ;;  %v1719_v55 = vadd.f32 %v1718_v62, %v1669_v34  ;;  %v1888_v0 = vmul.f32 %v4837_v4, %v4837_v4  ;;  %v1886_v59 = vmul.f32 %v4835_v25, %v4835_v25 }
 0x32b   :  { %5617 = vst [vmem:[#allocation35_spill] sm:$0xff] %v4899_v41  ;;  %v1890_v49 = vmul.f32 %v4839_v1, %v4839_v1  ;;  %v1862_v9 = vadd.f32 %v4837_v4, %v4835_v25  ;;  %v1721_v28 = vadd.f32 %v1720_v6, %v1671_v48 }
 0x32c   :  { %5618 = vst [vmem:[#allocation36_spill] sm:$0xff] %v4901_v46  ;;  %v1765_v10 = vadd.f32 %v4850_v32, %v1716_v18  ;;  %v1768_v11 = vadd.f32 %v1767_v63, %v1719_v55  ;;  %v1938_v26 = vadd.f32 %v1888_v0, %v1886_v59  ;;  %v1892_v32 = vmul.f32 %v4841_v53, %v4841_v53 }
 0x32d   :  { %v1863_v62 = vadd.f32 %v1862_v9, %v4839_v1  ;;  %v1894_v63 = vmul.f32 %v4847_v40, %v4847_v40 }
 0x32e   :  { %v4918_v12 = vadd.f32 %v4852_v56, %v1765_v10  ;;  %v1939_v46 = vadd.f32 %v1938_v26, %v1890_v49  ;;  %v4923_v48 = vadd.f32 %v1816_v23, %v1768_v11 }
 0x32f   :  { %v1769_v30 = vpop.f32.mrf.mxu2  ;;  %v1674_v51 = vpop.f32.mrf.mxu0  ;;  %v1864_v41 = vadd.f32 %v1863_v62, %v4841_v53 }
 0x330   :  { %v1818_v31 = vpop.f32.mrf.mxu3  ;;  %v1770_v18 = vadd.f32 %v1769_v30, %v1721_v28  ;;  %v1940_v55 = vadd.f32 %v1939_v46, %v1892_v32  ;;  %v1896_v56 = vmul.f32 %v4918_v12, %v4918_v12  ;;  %v1898_v9 = vmul.f32 %v4923_v48, %v4923_v48 }
 0x331   :  { %v1723_v37 = vpop.f32.mrf.mxu1  ;;  %v1865_v0 = vadd.f32 %v1864_v41, %v4847_v40 }
 0x332   :  { %v1724_v39 = vadd.f32 %v1723_v37, %v1674_v51  ;;  %v4928_v10 = vadd.f32 %v1818_v31, %v1770_v18  ;;  %v1941_v59 = vadd.f32 %v1940_v55, %v1894_v63 }
 0x333   :  { %v1866_v49 = vadd.f32 %v1865_v0, %v4918_v12 }
 0x334   :  { %v1942_v41 = vadd.f32 %v1941_v59, %v1896_v56  ;;  %v1900_v31 = vmul.f32 %v4928_v10, %v4928_v10 }
 0x336   :  { %v1943_v26 = vadd.f32 %v1942_v41, %v1898_v9 }
 0x337   :  { %v1772_v8 = vpop.f32.mrf.mxu2  ;;  %v1676_v16 = vpop.f32.mrf.mxu0 }
 0x338   :  { %v1821_v20 = vpop.f32.mrf.mxu3  ;;  %v1773_v6 = vadd.f32 %v1772_v8, %v1724_v39  ;;  %v1944_v62 = vadd.f32 %v1943_v26, %v1900_v31 }
 0x339   :  { %v1725_v47 = vpop.f32.mrf.mxu1 }
 0x33a   :  { %v1726_v51 = vadd.f32 %v1725_v47, %v1676_v16  ;;  %v4933_v23 = vadd.f32 %v1821_v20, %v1773_v6 }
 0x33f   :  { %v1774_v44 = vpop.f32.mrf.mxu2  ;;  %v1679_v2 = vpop.f32.mrf.mxu0 }
 0x340   :  { %v1823_v35 = vpop.f32.mrf.mxu3  ;;  %v1775_v30 = vadd.f32 %v1774_v44, %v1726_v51 }
 0x341   :  { %v1728_v42 = vpop.f32.mrf.mxu1 }
 0x342   :  { %v1729_v37 = vadd.f32 %v1728_v42, %v1679_v2  ;;  %v1867_v42 = vadd.f32 %v1866_v49, %v4923_v48  ;;  %v4938_v28 = vadd.f32 %v1823_v35, %v1775_v30 }
 0x344   :  { %v1868_v20 = vadd.f32 %v1867_v42, %v4928_v10  ;;  %v1904_v18 = vmul.f32 %v4938_v28, %v4938_v28 }
 0x346   :  { %v1869_v32 = vadd.f32 %v1868_v20, %v4933_v23 }
 0x347   :  { %v1777_v21 = vpop.f32.mrf.mxu2  ;;  %v1681_v43 = vpop.f32.mrf.mxu0 }
 0x348   :  { %v1826_v61 = vpop.f32.mrf.mxu3  ;;  %v1778_v16 = vadd.f32 %v1777_v21, %v1729_v37  ;;  %v1902_v21 = vmul.f32 %v4933_v23, %v4933_v23  ;;  %v1870_v51 = vadd.f32 %v1869_v32, %v4938_v28 }
 0x349   :  { %v1730_v19 = vpop.f32.mrf.mxu1 }
 0x34a   :  { %v1731_v47 = vadd.f32 %v1730_v19, %v1681_v43  ;;  %v4943_v43 = vadd.f32 %v1826_v61, %v1778_v16  ;;  %v1945_v63 = vadd.f32 %v1944_v62, %v1902_v21 }
 0x34c   :  { %v1906_v61 = vmul.f32 %v4943_v43, %v4943_v43  ;;  %v1871_v55 = vadd.f32 %v1870_v51, %v4943_v43 }
 0x34f   :  { %v1779_v27 = vpop.f32.mrf.mxu2  ;;  %v1684_v50 = vpop.f32.mrf.mxu0 }
 0x350   :  { %v1828_v22 = vpop.f32.mrf.mxu3  ;;  %v1780_v39 = vadd.f32 %v1779_v27, %v1731_v47 }
 0x351   :  { %v1733_v14 = vpop.f32.mrf.mxu1 }
 0x352   :  { %v1734_v46 = vadd.f32 %v1733_v14, %v1684_v50  ;;  %v4948_v35 = vadd.f32 %v1828_v22, %v1780_v39 }
 0x354   :  { %v1908_v0 = vmul.f32 %v4948_v35, %v4948_v35  ;;  %v1872_v49 = vadd.f32 %v1871_v55, %v4948_v35 }
 0x357   :  { %v1782_v13 = vpop.f32.mrf.mxu2  ;;  %v1686_v34 = vpop.f32.mrf.mxu0 }
 0x358   :  { %v1831_v17 = vpop.f32.mrf.mxu3  ;;  %v1783_v19 = vadd.f32 %v1782_v13, %v1734_v46 }
 0x359   :  { %v1735_v38 = vpop.f32.mrf.mxu1 }
 0x35a   :  { %v1736_v50 = vadd.f32 %v1735_v38, %v1686_v34  ;;  %v4953_v37 = vadd.f32 %v1831_v17, %v1783_v19  ;;  %v1946_v34 = vadd.f32 %v1945_v63, %v1904_v18 }
 0x35c   :  { %v1947_v59 = vadd.f32 %v1946_v34, %v1906_v61  ;;  %v1910_v9 = vmul.f32 %v4953_v37, %v4953_v37  ;;  %v1873_v16 = vadd.f32 %v1872_v49, %v4953_v37 }
 0x35f   :  { %v1784_v8 = vpop.f32.mrf.mxu2  ;;  %v1689_v44 = vpop.f32.mrf.mxu0 }
 0x360   :  { %v1833_v2 = vpop.f32.mrf.mxu3  ;;  %v1785_v27 = vadd.f32 %v1784_v8, %v1736_v50  ;;  %v1948_v8 = vadd.f32 %v1947_v59, %v1908_v0 }
 0x361   :  { %v1738_v11 = vpop.f32.mrf.mxu1 }
 0x362   :  { %v1739_v14 = vadd.f32 %v1738_v11, %v1689_v44  ;;  %v4958_v22 = vadd.f32 %v1833_v2, %v1785_v27  ;;  %v1949_v2 = vadd.f32 %v1948_v8, %v1910_v9 }
 0x364   :  { %v1912_v47 = vmul.f32 %v4958_v22, %v4958_v22  ;;  %v1874_v42 = vadd.f32 %v1873_v16, %v4958_v22 }
 0x366   :  { %v1950_v39 = vadd.f32 %v1949_v2, %v1912_v47 }
 0x367   :  { %v1787_v6 = vpop.f32.mrf.mxu2  ;;  %v1691_v56 = vpop.f32.mrf.mxu0 }
 0x368   :  { %v1788_v38 = vadd.f32 %v1787_v6, %v1739_v14  ;;  %v1836_v13 = vpop.f32.mrf.mxu3 }
 0x369   :  { %v1740_v30 = vpop.f32.mrf.mxu1 }
 0x36a   :  { %v4963_v17 = vadd.f32 %v1836_v13, %v1788_v38  ;;  %v1741_v46 = vadd.f32 %v1740_v30, %v1691_v56 }
 0x36c   :  { %v1914_v31 = vmul.f32 %v4963_v17, %v4963_v17  ;;  %v1875_v26 = vadd.f32 %v1874_v42, %v4963_v17  ;;  %v5619_v42 = vld [vmem:[#allocation37_spill] sm:$0xff] }
 0x36e   :  { %v1951_v21 = vadd.f32 %v1950_v39, %v1914_v31 }
 0x36f   :  { %v1789_v41 = vpop.f32.mrf.mxu2 }
 0x370   :  { %v1790_v44 = vadd.f32 %v1789_v41, %v1741_v46  ;;  %v1838_v11 = vpop.f32.mrf.mxu3 }
 0x372   :  { %v1839_v20 = vadd.f32 %v1838_v11, %v1790_v44 }
 0x374   :  { %v1876_v19 = vadd.f32 %v1875_v26, %v1839_v20  ;;  %v1916_v50 = vmul.f32 %v1839_v20, %v1839_v20 }
 0x376   :  { %v1877_v14 = vrot.slane %v1876_v19, 4  ;;  %v1952_v62 = vadd.f32 %v1951_v21, %v1916_v50 }
 0x378   :  { %v1878_v32 = vadd.f32 %v1877_v14, %v1876_v19  ;;  %v1953_v18 = vrot.slane %v1952_v62, 4 }
 0x37a   :  { %v1879_v27 = vrot.slane %v1878_v32, 2  ;;  %v1954_v63 = vadd.f32 %v1953_v18, %v1952_v62 }
 0x37c   :  { %v1880_v6 = vadd.f32 %v1879_v27, %v1878_v32  ;;  %v1955_v51 = vrot.slane %v1954_v63, 2 }
 0x37e   :  { %v1881_v61 = vrot.slane %v1880_v6, 1  ;;  %v1956_v38 = vadd.f32 %v1955_v51, %v1954_v63 }
 0x380   :  { %v1882_v13 = vadd.f32 %v1881_v61, %v1880_v6  ;;  %v1957_v34 = vrot.slane %v1956_v38, 1 }
 0x382   :  { %v1884_v55 = vmul.f32 0.0078125, %v1882_v13  ;;  %v1958_v0 = vadd.f32 %v1957_v34, %v1956_v38 }
 0x384   :  { %v1960_v56 = vmul.f32 0.0078125, %v1958_v0  ;;  %v1962_v30 = vmul.f32 %v1884_v55, %v1884_v55 }
 0x386   :  { %v1964_v59 = vsub.f32 %v1960_v56, %v1962_v30 }
 0x388   :  { %v1966_v49 = vadd.f32 1e-05, %v1964_v59 }
 0x38a   :  { %3601 = vrsqrt.f32 %v1966_v49  ;;  %vm1983_vm1 = vweird.f32 %v1966_v49 }
 0x390   :  { %v3602_v9 = vpop.eup %3601 }
 0x391   :  { %v1978_v8 = vmul.f32 %v3602_v9, %v1966_v49  ;;  %vm1984_vm0 = vweird.f32 %v3602_v9 }
 0x392   :  { %vm1985_vm2 = vmor %vm1983_vm1, %vm1984_vm0 }
 0x393   :  { %v1979_v16 = vmul.f32 %v3602_v9, %v1978_v8 }
 0x395   :  { %v1980_v47 = vmul.f32 0.5, %v1979_v16 }
 0x397   :  { %v1981_v46 = vsub.f32 1.5, %v1980_v47 }
 0x399   :  { %v1982_v41 = vmul.f32 %v3602_v9, %v1981_v46 }
 0x39b   :  { %v1986_v2 = vsel %vm1985_vm2, %v3602_v9, %v1982_v41 }
 0x39c   :  { %v1988_v31 = vmul.f32 %v1986_v2, %v5619_v42 }
 0x39e   :  { %v1990_v44 = vmul.f32 %v1988_v31, %v1884_v55  ;;  %v2000_v11 = vperm.slane %v1988_v31, 2 }
 0x3a0   :  { %v1994_v39 = vrot.slane %v1990_v44, 7  ;;  %v2002_v26 = vmul.f32 %v2000_v11, %v4835_v25  ;;  %v2004_v21 = vmul.f32 %v2000_v11, %v4837_v4  ;;  %v2006_v50 = vmul.f32 %v2000_v11, %v4839_v1 }
 0x3a1   :  { %v2008_v14 = vmul.f32 %v2000_v11, %v4841_v53  ;;  %v2010_v62 = vmul.f32 %v2000_v11, %v4847_v40  ;;  %v2012_v32 = vmul.f32 %v2000_v11, %v4918_v12  ;;  %v2014_v18 = vmul.f32 %v2000_v11, %v4923_v48 }
 0x3a2   :  { %v1998_v19 = vsub.f32 %v5619_v42, %v1994_v39  ;;  %v2016_v27 = vmul.f32 %v2000_v11, %v4928_v10  ;;  %v2018_v63 = vmul.f32 %v2000_v11, %v4933_v23  ;;  %v2020_v25 = vmul.f32 %v2000_v11, %v4938_v28 }
 0x3a3   :  { %v2022_v4 = vmul.f32 %v2000_v11, %v4943_v43  ;;  %v2024_v6 = vmul.f32 %v2000_v11, %v4948_v35  ;;  %v2026_v1 = vmul.f32 %v2000_v11, %v4953_v37  ;;  %v2028_v53 = vmul.f32 %v2000_v11, %v4958_v22 }
 0x3a4   :  { %v2034_v51 = vperm.slane %v1998_v19, 3  ;;  %v2030_v40 = vmul.f32 %v2000_v11, %v4963_v17  ;;  %v2032_v12 = vmul.f32 %v2000_v11, %v1839_v20 }
 0x3a6   :  { %v2036_v61 = vadd.f32 %v2034_v51, %v2002_v26  ;;  %v2038_v48 = vadd.f32 %v2034_v51, %v2004_v21  ;;  %v2040_v38 = vadd.f32 %v2034_v51, %v2006_v50  ;;  %v2042_v10 = vadd.f32 %v2034_v51, %v2008_v14 }
 0x3a7   :  { %v2044_v13 = vadd.f32 %v2034_v51, %v2010_v62  ;;  %v2046_v23 = vadd.f32 %v2034_v51, %v2012_v32  ;;  %v2048_v34 = vadd.f32 %v2034_v51, %v2014_v18  ;;  %v2050_v28 = vadd.f32 %v2034_v51, %v2016_v27 }
 0x3a8   :  { %v2052_v55 = vadd.f32 %v2034_v51, %v2018_v63  ;;  %v2054_v43 = vadd.f32 %v2034_v51, %v2020_v25  ;;  %v4989_v0 = vadd.f32 %v2034_v51, %v2022_v4  ;;  %v2058_v35 = vadd.f32 %v2034_v51, %v2024_v6 }
 0x3a9   :  { %v4991_v56 = vadd.f32 %v2034_v51, %v2026_v1  ;;  %v4993_v37 = vadd.f32 %v2034_v51, %v2028_v53  ;;  %v4995_v22 = vadd.f32 %v2034_v51, %v2030_v40  ;;  %v4997_v17 = vadd.f32 %v2034_v51, %v2032_v12 }
 0x3aa   :  { %3705 = dma.done.wait [#allocation6 + $0x1], 2048 }
 0x3ab   :  { %3706 = vsyncadd [#allocation6 + $0x1], 4294965248  ;;  %v3541_v20 = vld [vmem:[#allocation4 + $0x48] sm:$0xff]  ;;  %v3548_v49 = vld [vmem:[#allocation4 + $0x78] sm:$0xff]  ;;  %v2071_v26 = vpack.c.bf16 %v4873_v33, %v4871_v5  ;;  %v2072_v21 = vpack.c.bf16 %v2038_v48, %v2036_v61  ;;  %v2073_v19 = vpack.c.bf16 %v4877_v54, %v4875_v7  ;;  %v2074_v50 = vpack.c.bf16 %v2042_v10, %v2040_v38 }
 0x3ac   :  { %v3549_v30 = vld [vmem:[#allocation4 + $0x28] sm:$0xff]  ;;  %2215 = vmatpush.bf16.msrb.mxu0 %v3541_v20  ;;  %v3547_v8 = vld [vmem:[#allocation4 + $0x70] sm:$0xff]  ;;  %v3546_v47 = vld [vmem:[#allocation4 + $0x60] sm:$0xff]  ;;  %v2075_v14 = vpack.c.bf16 %v4881_v45, %v4879_v3  ;;  %v2076_v62 = vpack.c.bf16 %v2046_v23, %v2044_v13  ;;  %v2077_v5 = vpack.c.bf16 %v4885_v58, %v4883_v24  ;;  %v2078_v33 = vpack.c.bf16 %v2050_v28, %v2048_v34 }
 0x3ad   :  { %2264 = vmatpush.bf16.msrb.mxu1 %v3549_v30  ;;  %v3540_v59 = vld [vmem:[#allocation4 + $0x8] sm:$0xff]  ;;  %v3538_v16 = vld [vmem:[#allocation4 + $0x50] sm:$0xff]  ;;  %v3537_v46 = vld [vmem:[#allocation4 + $0x18] sm:$0xff]  ;;  %v2079_v32 = vpack.c.bf16 %v4889_v57, %v4887_v36  ;;  %v2080_v18 = vpack.c.bf16 %v2054_v43, %v2052_v55  ;;  %v2081_v7 = vpack.c.bf16 %v4893_v52, %v4891_v29  ;;  %v2082_v54 = vpack.c.bf16 %v2058_v35, %v4989_v0 }
 0x3ae   :  { %v3539_v9 = vld [vmem:[#allocation4 + $0x68] sm:$0xff]  ;;  %v3545_v41 = vld [vmem:[#allocation4 + $0x38] sm:$0xff]  ;;  %v3544_v42 = vld [vmem:[#allocation4 + $0x10] sm:$0xff]  ;;  %v2083_v3 = vpack.c.bf16 %v4897_v60, %v4895_v15  ;;  %v2084_v45 = vpack.c.bf16 %v4993_v37, %v4991_v56  ;;  %v2086_v57 = vpack.c.bf16 %v4997_v17, %v4995_v22 }
 0x3af   :  { %v3536_v2 = vld [vmem:[#allocation4 + $0x58] sm:$0xff]  ;;  %v3535_v31 = vld [vmem:[#allocation4] sm:$0xff]  ;;  %v3534_v11 = vld [vmem:[#allocation4 + $0x30] sm:$0xff] }
 0x3b0   :  { %2216 = vmatpush.bf16.msrb.mxu0 %v3540_v59  ;;  %v3543_v44 = vld [vmem:[#allocation4 + $0x20] sm:$0xff]  ;;  %v5621_v58 = vld [vmem:[#allocation36_spill] sm:$0xff] }
 0x3b1   :  { %2265 = vmatpush.bf16.msrb.mxu1 %v3548_v49  ;;  %v3542_v39 = vld [vmem:[#allocation4 + $0x40] sm:$0xff] }
 0x3b2   :  { %v5620_v24 = vld [vmem:[#allocation35_spill] sm:$0xff] }
 0x3b3   :  { %v2085_v36 = vpack.c.bf16 %v5621_v58, %v5620_v24 }
 0x3b4   :  { %2217 = vmatpush.bf16.msrb.mxu0 %v3539_v9 }
 0x3b5   :  { %2266 = vmatpush.bf16.msrb.mxu1 %v3547_v8 }
 0x3b8   :  { %2218 = vmatpush.bf16.msrb.mxu0 %v3538_v16 }
 0x3b9   :  { %2267 = vmatpush.bf16.msrb.mxu1 %v3546_v47 }
 0x3bc   :  { %2219 = vmatpush.bf16.msrb.mxu0 %v3537_v46 }
 0x3bd   :  { %2268 = vmatpush.bf16.msrb.mxu1 %v3545_v41 }
 0x3c0   :  { %2220 = vmatpush.bf16.msrb.mxu0 %v3536_v2 }
 0x3c1   :  { %2269 = vmatpush.bf16.msrb.mxu1 %v3544_v42 }
 0x3c4   :  { %2221 = vmatpush.bf16.msrb.mxu0 %v3535_v31 }
 0x3c5   :  { %2270 = vmatpush.bf16.msrb.mxu1 %v3543_v44 }
 0x3c8   :  { %2222 = vmatpush.bf16.msrb.mxu0 %v3534_v11 }
 0x3c9   :  { %2271 = vmatpush.bf16.msrb.mxu1 %v3542_v39 }
 0x3cb   :  { %2223 = vmatmul.bf16.vlgmr.msrb.gmra.mxu0 %v2071_v26 }
 0x3cc   :  { %2272 = vmatmul.bf16.vlgmr.msrb.gmra.mxu1 %v2072_v21 }
 0x3db   :  { %2228 = vmatmul.bf16.gmra.mxu0 %v2073_v19 }
 0x3dc   :  { %2277 = vmatmul.bf16.gmra.mxu1 %v2074_v50 }
 0x3eb   :  { %2233 = vmatmul.bf16.gmra.mxu0 %v2075_v14 }
 0x3ec   :  { %2282 = vmatmul.bf16.gmra.mxu1 %v2076_v62 }
 0x3fb   :  { %2238 = vmatmul.bf16.gmra.mxu0 %v2077_v5 }
 0x3fc   :  { %2287 = vmatmul.bf16.gmra.mxu1 %v2078_v33 }
 0x40b   :  { %2243 = vmatmul.bf16.gmra.mxu0 %v2079_v32 }
 0x40c   :  { %2292 = vmatmul.bf16.gmra.mxu1 %v2080_v18 }
 0x41b   :  { %2248 = vmatmul.bf16.gmra.mxu0 %v2081_v7 }
 0x41c   :  { %2297 = vmatmul.bf16.gmra.mxu1 %v2082_v54 }
 0x42b   :  { %2253 = vmatmul.bf16.gmra.mxu0 %v2083_v3 }
 0x42c   :  { %2302 = vmatmul.bf16.gmra.mxu1 %v2084_v45 }
 0x43b   :  { %2258 = vmatmul.bf16.gmra.mxu0 %v2085_v36 }
 0x43c   :  { %2307 = vmatmul.bf16.gmra.mxu1 %v2086_v57 }
 0x448   :  { %v2224_v29 = vpop.f32.mrf.mxu0 }
 0x449   :  { %v2273_v52 = vpop.f32.mrf.mxu1 }
 0x44a   :  { %v5020_v27 = vadd.f32 %v2273_v52, %v2224_v29 }
 0x44c   :  { %v2335_v20 = vmul.f32 %v5020_v27, %v5020_v27 }
 0x450   :  { %v2226_v63 = vpop.f32.mrf.mxu0 }
 0x451   :  { %v2275_v25 = vpop.f32.mrf.mxu1 }
 0x452   :  { %v5022_v15 = vadd.f32 %v2275_v25, %v2226_v63 }
 0x454   :  { %v2336_v17 = vmul.f32 %v5022_v15, %v5022_v15  ;;  %v2313_v30 = vadd.f32 %v5022_v15, %v5020_v27 }
 0x456   :  { %v2351_v8 = vadd.f32 %v2336_v17, %v2335_v20 }
 0x458   :  { %v2229_v60 = vpop.f32.mrf.mxu0 }
 0x459   :  { %v2278_v4 = vpop.f32.mrf.mxu1 }
 0x45a   :  { %v5024_v6 = vadd.f32 %v2278_v4, %v2229_v60 }
 0x45c   :  { %v2337_v59 = vmul.f32 %v5024_v6, %v5024_v6  ;;  %v2314_v16 = vadd.f32 %v2313_v30, %v5024_v6 }
 0x45e   :  { %v2352_v41 = vadd.f32 %v2351_v8, %v2337_v59 }
 0x460   :  { %v2231_v51 = vpop.f32.mrf.mxu0 }
 0x461   :  { %v2280_v1 = vpop.f32.mrf.mxu1 }
 0x462   :  { %v5026_v53 = vadd.f32 %v2280_v1, %v2231_v51 }
 0x464   :  { %v2338_v47 = vmul.f32 %v5026_v53, %v5026_v53  ;;  %v2315_v2 = vadd.f32 %v2314_v16, %v5026_v53 }
 0x466   :  { %v2353_v44 = vadd.f32 %v2352_v41, %v2338_v47 }
 0x468   :  { %v2234_v40 = vpop.f32.mrf.mxu0 }
 0x469   :  { %v2283_v12 = vpop.f32.mrf.mxu1 }
 0x46a   :  { %v5028_v61 = vadd.f32 %v2283_v12, %v2234_v40 }
 0x46c   :  { %v2339_v42 = vmul.f32 %v5028_v61, %v5028_v61  ;;  %v2316_v11 = vadd.f32 %v2315_v2, %v5028_v61 }
 0x46e   :  { %v2354_v21 = vadd.f32 %v2353_v44, %v2339_v42 }
 0x470   :  { %v2236_v48 = vpop.f32.mrf.mxu0 }
 0x471   :  { %v2285_v38 = vpop.f32.mrf.mxu1 }
 0x472   :  { %v5041_v46 = vadd.f32 %v2285_v38, %v2236_v48 }
 0x474   :  { %v2340_v39 = vmul.f32 %v5041_v46, %v5041_v46  ;;  %v2317_v19 = vadd.f32 %v2316_v11, %v5041_v46 }
 0x476   :  { %v2355_v33 = vadd.f32 %v2354_v21, %v2340_v39 }
 0x478   :  { %v2239_v10 = vpop.f32.mrf.mxu0 }
 0x479   :  { %v2288_v13 = vpop.f32.mrf.mxu1 }
 0x47a   :  { %v5046_v31 = vadd.f32 %v2288_v13, %v2239_v10 }
 0x47c   :  { %v2341_v50 = vmul.f32 %v5046_v31, %v5046_v31  ;;  %v2318_v32 = vadd.f32 %v2317_v19, %v5046_v31 }
 0x47e   :  { %v2356_v54 = vadd.f32 %v2355_v33, %v2341_v50 }
 0x480   :  { %v2241_v23 = vpop.f32.mrf.mxu0 }
 0x481   :  { %v2290_v34 = vpop.f32.mrf.mxu1 }
 0x482   :  { %v5051_v26 = vadd.f32 %v2290_v34, %v2241_v23 }
 0x484   :  { %v2342_v18 = vmul.f32 %v5051_v26, %v5051_v26  ;;  %v2319_v3 = vadd.f32 %v2318_v32, %v5051_v26 }
 0x486   :  { %v2357_v58 = vadd.f32 %v2356_v54, %v2342_v18 }
 0x488   :  { %v2244_v28 = vpop.f32.mrf.mxu0 }
 0x489   :  { %v2293_v55 = vpop.f32.mrf.mxu1 }
 0x48a   :  { %v5056_v14 = vadd.f32 %v2293_v55, %v2244_v28 }
 0x48c   :  { %v2343_v45 = vmul.f32 %v5056_v14, %v5056_v14  ;;  %v2320_v36 = vadd.f32 %v2319_v3, %v5056_v14 }
 0x48e   :  { %v2358_v52 = vadd.f32 %v2357_v58, %v2343_v45 }
 0x490   :  { %v2246_v43 = vpop.f32.mrf.mxu0 }
 0x491   :  { %v2295_v0 = vpop.f32.mrf.mxu1 }
 0x492   :  { %v5061_v7 = vadd.f32 %v2295_v0, %v2246_v43 }
 0x494   :  { %v2344_v57 = vmul.f32 %v5061_v7, %v5061_v7  ;;  %v2321_v63 = vadd.f32 %v2320_v36, %v5061_v7 }
 0x496   :  { %v2359_v1 = vadd.f32 %v2358_v52, %v2344_v57 }
 0x498   :  { %v2249_v35 = vpop.f32.mrf.mxu0 }
 0x499   :  { %v2298_v56 = vpop.f32.mrf.mxu1 }
 0x49a   :  { %v5066_v24 = vadd.f32 %v2298_v56, %v2249_v35 }
 0x49c   :  { %v2345_v25 = vmul.f32 %v5066_v24, %v5066_v24  ;;  %v2322_v40 = vadd.f32 %v2321_v63, %v5066_v24  ;;  %v5622_v63 = vld [vmem:[#allocation38_spill] sm:$0xff] }
 0x49e   :  { %v2360_v38 = vadd.f32 %v2359_v1, %v2345_v25 }
 0x4a0   :  { %v2251_v37 = vpop.f32.mrf.mxu0 }
 0x4a1   :  { %v2300_v22 = vpop.f32.mrf.mxu1 }
 0x4a2   :  { %v5071_v29 = vadd.f32 %v2300_v22, %v2251_v37 }
 0x4a4   :  { %v2346_v12 = vmul.f32 %v5071_v29, %v5071_v29  ;;  %v2323_v10 = vadd.f32 %v2322_v40, %v5071_v29 }
 0x4a6   :  { %v2361_v34 = vadd.f32 %v2360_v38, %v2346_v12 }
 0x4a8   :  { %v2254_v49 = vpop.f32.mrf.mxu0 }
 0x4a9   :  { %v2303_v9 = vpop.f32.mrf.mxu1 }
 0x4aa   :  { %v5076_v60 = vadd.f32 %v2303_v9, %v2254_v49 }
 0x4ac   :  { %v2347_v13 = vmul.f32 %v5076_v60, %v5076_v60  ;;  %v2324_v28 = vadd.f32 %v2323_v10, %v5076_v60 }
 0x4ae   :  { %v2362_v43 = vadd.f32 %v2361_v34, %v2347_v13 }
 0x4b0   :  { %v2256_v62 = vpop.f32.mrf.mxu0 }
 0x4b1   :  { %v2305_v5 = vpop.f32.mrf.mxu1 }
 0x4b2   :  { %v5081_v48 = vadd.f32 %v2305_v5, %v2256_v62 }
 0x4b4   :  { %v2348_v55 = vmul.f32 %v5081_v48, %v5081_v48  ;;  %v2325_v0 = vadd.f32 %v2324_v28, %v5081_v48 }
 0x4b6   :  { %v2363_v22 = vadd.f32 %v2362_v43, %v2348_v55 }
 0x4b8   :  { %v2259_v4 = vpop.f32.mrf.mxu0 }
 0x4b9   :  { %v2308_v51 = vpop.f32.mrf.mxu1 }
 0x4ba   :  { %v5086_v23 = vadd.f32 %v2308_v51, %v2259_v4 }
 0x4bc   :  { %v2349_v35 = vmul.f32 %v5086_v23, %v5086_v23  ;;  %v2326_v17 = vadd.f32 %v2325_v0, %v5086_v23 }
 0x4be   :  { %v2364_v30 = vadd.f32 %v2363_v22, %v2349_v35 }
 0x4c0   :  { %v2261_v56 = vpop.f32.mrf.mxu0 }
 0x4c1   :  { %v2310_v37 = vpop.f32.mrf.mxu1 }
 0x4c2   :  { %v2311_v20 = vadd.f32 %v2310_v37, %v2261_v56 }
 0x4c4   :  { %v2327_v59 = vadd.f32 %v2326_v17, %v2311_v20  ;;  %v2350_v49 = vmul.f32 %v2311_v20, %v2311_v20 }
 0x4c6   :  { %v2328_v9 = vrot.slane %v2327_v59, 4  ;;  %v2365_v8 = vadd.f32 %v2364_v30, %v2350_v49 }
 0x4c8   :  { %v2329_v16 = vadd.f32 %v2328_v9, %v2327_v59  ;;  %v2366_v47 = vrot.slane %v2365_v8, 4 }
 0x4ca   :  { %v2330_v41 = vrot.slane %v2329_v16, 2  ;;  %v2367_v2 = vadd.f32 %v2366_v47, %v2365_v8 }
 0x4cc   :  { %v2331_v42 = vadd.f32 %v2330_v41, %v2329_v16  ;;  %v2368_v44 = vrot.slane %v2367_v2, 2 }
 0x4ce   :  { %v2332_v11 = vrot.slane %v2331_v42, 1  ;;  %v2369_v39 = vadd.f32 %v2368_v44, %v2367_v2 }
 0x4d0   :  { %v2333_v21 = vadd.f32 %v2332_v11, %v2331_v42  ;;  %v2370_v19 = vrot.slane %v2369_v39, 1 }
 0x4d2   :  { %v2334_v50 = vmul.f32 0.0078125, %v2333_v21  ;;  %v2371_v62 = vadd.f32 %v2370_v19, %v2369_v39 }
 0x4d4   :  { %v2372_v5 = vmul.f32 0.0078125, %v2371_v62  ;;  %v2373_v33 = vmul.f32 %v2334_v50, %v2334_v50 }
 0x4d6   :  { %v2374_v32 = vsub.f32 %v2372_v5, %v2373_v33 }
 0x4d8   :  { %v2375_v18 = vadd.f32 1e-05, %v2374_v32 }
 0x4da   :  { %3603 = vrsqrt.f32 %v2375_v18  ;;  %vm2382_vm4 = vweird.f32 %v2375_v18 }
 0x4e0   :  { %v3604_v54 = vpop.eup %3603 }
 0x4e1   :  { %v2377_v3 = vmul.f32 %v3604_v54, %v2375_v18  ;;  %vm2383_vm3 = vweird.f32 %v3604_v54 }
 0x4e2   :  { %vm2384_vm5 = vmor %vm2382_vm4, %vm2383_vm3 }
 0x4e3   :  { %v2378_v45 = vmul.f32 %v3604_v54, %v2377_v3 }
 0x4e5   :  { %v2379_v58 = vmul.f32 0.5, %v2378_v45 }
 0x4e7   :  { %v2380_v36 = vsub.f32 1.5, %v2379_v58 }
 0x4e9   :  { %v2381_v57 = vmul.f32 %v3604_v54, %v2380_v36 }
 0x4eb   :  { %v2385_v52 = vsel %vm2384_vm5, %v3604_v54, %v2381_v57 }
 0x4ec   :  { %v2386_v25 = vmul.f32 %v2385_v52, %v5622_v63 }
 0x4ee   :  { %v2387_v4 = vmul.f32 %v2386_v25, %v2334_v50  ;;  %v2392_v51 = vperm.slane %v2386_v25, 4 }
 0x4f0   :  { %v2389_v1 = vrot.slane %v2387_v4, 7  ;;  %v2393_v40 = vmul.f32 %v2392_v51, %v5020_v27  ;;  %v2394_v12 = vmul.f32 %v2392_v51, %v5022_v15  ;;  %v2395_v10 = vmul.f32 %v2392_v51, %v5024_v6 }
 0x4f1   :  { %v2396_v13 = vmul.f32 %v2392_v51, %v5026_v53  ;;  %v2397_v34 = vmul.f32 %v2392_v51, %v5028_v61  ;;  %v2398_v28 = vmul.f32 %v2392_v51, %v5041_v46  ;;  %v2399_v55 = vmul.f32 %v2392_v51, %v5046_v31 }
 0x4f2   :  { %v2391_v38 = vsub.f32 %v5622_v63, %v2389_v1  ;;  %v2400_v43 = vmul.f32 %v2392_v51, %v5051_v26  ;;  %v2401_v0 = vmul.f32 %v2392_v51, %v5056_v14  ;;  %v2402_v27 = vmul.f32 %v2392_v51, %v5061_v7 }
 0x4f3   :  { %v2403_v15 = vmul.f32 %v2392_v51, %v5066_v24  ;;  %v2404_v35 = vmul.f32 %v2392_v51, %v5071_v29  ;;  %v2405_v6 = vmul.f32 %v2392_v51, %v5076_v60  ;;  %v2406_v53 = vmul.f32 %v2392_v51, %v5081_v48 }
 0x4f4   :  { %v2409_v56 = vperm.slane %v2391_v38, 5  ;;  %v2407_v61 = vmul.f32 %v2392_v51, %v5086_v23  ;;  %v2408_v46 = vmul.f32 %v2392_v51, %v2311_v20 }
 0x4f6   :  { %v2410_v37 = vadd.f32 %v2409_v56, %v2393_v40  ;;  %v2411_v31 = vadd.f32 %v2409_v56, %v2394_v12  ;;  %v2412_v22 = vadd.f32 %v2409_v56, %v2395_v10  ;;  %v2413_v26 = vadd.f32 %v2409_v56, %v2396_v13 }
 0x4f7   :  { %v2414_v17 = vadd.f32 %v2409_v56, %v2397_v34  ;;  %v2415_v14 = vadd.f32 %v2409_v56, %v2398_v28  ;;  %v2416_v30 = vadd.f32 %v2409_v56, %v2399_v55  ;;  %v2417_v7 = vadd.f32 %v2409_v56, %v2400_v43 }
 0x4f8   :  { %v2418_v59 = vadd.f32 %v2409_v56, %v2401_v0  ;;  %v2419_v24 = vadd.f32 %v2409_v56, %v2402_v27  ;;  %v2420_v49 = vadd.f32 %v2409_v56, %v2403_v15  ;;  %v2421_v29 = vadd.f32 %v2409_v56, %v2404_v35 }
 0x4f9   :  { %v2422_v9 = vadd.f32 %v2409_v56, %v2405_v6  ;;  %v2423_v8 = vadd.f32 %v2409_v56, %v2406_v53  ;;  %v2424_v60 = vadd.f32 %v2409_v56, %v2407_v61  ;;  %v2425_v16 = vadd.f32 %v2409_v56, %v2408_v46 }
 0x4fa   :  { %3707 = dma.done.wait [#allocation6 + $0x2], 1024 }
 0x4fb   :  { %3708 = vsyncadd [#allocation6 + $0x2], 4294966272  ;;  %v3557_v48 = vld [vmem:[#allocation5 + $0x38] sm:$0xff]  ;;  %v3556_v23 = vld [vmem:[#allocation5 + $0x30] sm:$0xff]  ;;  %v2430_v11 = vpack.c.bf16 %v2411_v31, %v2410_v37  ;;  %v2431_v39 = vpack.c.bf16 %v2413_v26, %v2412_v22  ;;  %v2432_v21 = vpack.c.bf16 %v2415_v14, %v2414_v17  ;;  %v2433_v19 = vpack.c.bf16 %v2417_v7, %v2416_v30  ;;  %s3717_s5 = smov [#allocation10]   ;;  %s2914_s1 = sshll.u32 %s5511_s6, 4  ;;  %s2915_s1 = int_to_ptr.hbm [resolvable:$true] %s2914_s1 }
 0x4fc   :  { %2503 = vmatpush.bf16.msrb.mxu2 %v3557_v48  ;;  %v3555_v20 = vld [vmem:[#allocation5 + $0x28] sm:$0xff]  ;;  %v3554_v47 = vld [vmem:[#allocation5 + $0x20] sm:$0xff]  ;;  %v3553_v41 = vld [vmem:[#allocation5 + $0x18] sm:$0xff]  ;;  %v2434_v50 = vpack.c.bf16 %v2419_v24, %v2418_v59  ;;  %v2435_v62 = vpack.c.bf16 %v2421_v29, %v2420_v49  ;;  %v2436_v5 = vpack.c.bf16 %v2423_v8, %v2422_v9  ;;  %v2437_v33 = vpack.c.bf16 %v2425_v16, %v2424_v60  ;;  %s2912_s11 = sshll.u32 %s3717_s5, 4  ;;  %s3718_s14 = smov 128   ;;  %s2913_s11 = int_to_ptr.vmem [resolvable:$true] %s2912_s11 }
 0x4fd   :  { %v3552_v2 = vld [vmem:[#allocation5 + $0x10] sm:$0xff]  ;;  %v3551_v42 = vld [vmem:[#allocation5 + $0x8] sm:$0xff]  ;;  %v3550_v44 = vld [vmem:[#allocation5] sm:$0xff]  ;;  %v2584_v32 = vlaneseq  ;;  %v5113_v18 = vperm.slane %v5622_v63, 6  ;;  %s3719_s15 = smov 8  }
 0x4ff   :  { %v5115_v54 = vand.u32 127, %v2584_v32 }
 0x500   :  { %2504 = vmatpush.bf16.msrb.mxu2 %v3556_v23 }
 0x501   :  { %vm2586_vm6 = vcmp.lt.s32.totalorder %v5115_v54, 12 }
 0x504   :  { %2505 = vmatpush.bf16.msrb.mxu2 %v3555_v20 }
 0x508   :  { %2506 = vmatpush.bf16.msrb.mxu2 %v3554_v47 }
 0x50c   :  { %2507 = vmatpush.bf16.msrb.mxu2 %v3553_v41 }
 0x510   :  { %2508 = vmatpush.bf16.msrb.mxu2 %v3552_v2 }
 0x514   :  { %2509 = vmatpush.bf16.msrb.mxu2 %v3551_v42 }
 0x518   :  { %2510 = vmatpush.bf16.msrb.mxu2 %v3550_v44 }
 0x51b   :  { %2511 = vmatmul.bf16.vlgmr.msrb.gmra.mxu2 %v2430_v11 }
 0x52b   :  { %2516 = vmatmul.bf16.gmra.mxu2 %v2431_v39 }
 0x53b   :  { %2521 = vmatmul.bf16.gmra.mxu2 %v2432_v21 }
 0x54b   :  { %2526 = vmatmul.bf16.gmra.mxu2 %v2433_v19 }
 0x55b   :  { %2531 = vmatmul.bf16.gmra.mxu2 %v2434_v50 }
 0x56b   :  { %2536 = vmatmul.bf16.gmra.mxu2 %v2435_v62 }
 0x57b   :  { %2541 = vmatmul.bf16.gmra.mxu2 %v2436_v5 }
 0x58b   :  { %2546 = vmatmul.bf16.gmra.mxu2 %v2437_v33 }
 0x59e   :  { %v2512_v3 = vpop.f32.mrf.mxu2 }
 0x59f   :  { %v2513_v45 = vadd.f32 %v2512_v3, %v5113_v18 }
 0x5a1   :  { %v2552_v58 = vmax.f32 %v2513_v45, 0.0 }
 0x5a3   :  { %2568 = vst [vmem:[#allocation10] sm:$0xff] %v2552_v58  ;;  %v5121_v36 = vsel %vm2586_vm6, %v2552_v58, -inf }
 0x5a4   :  { %2603 = vmax.xlane.f32.xlu0 %v5121_v36 }
 0x5a6   :  { %v2514_v57 = vpop.f32.mrf.mxu2 }
 0x5a7   :  { %v2515_v52 = vadd.f32 %v2514_v57, %v5113_v18 }
 0x5a9   :  { %v2553_v63 = vmax.f32 %v2515_v52, 0.0 }
 0x5ab   :  { %2569 = vst [vmem:[#allocation10 + $0x8] sm:$0xff] %v2553_v63  ;;  %v5127_v25 = vsel %vm2586_vm6, %v2553_v63, -inf }
 0x5ac   :  { %2605 = vmax.xlane.f32.xlu0 %v5127_v25 }
 0x5ae   :  { %v2517_v4 = vpop.f32.mrf.mxu2 }
 0x5af   :  { %v2518_v51 = vadd.f32 %v2517_v4, %v5113_v18 }
 0x5b1   :  { %v2554_v1 = vmax.f32 %v2518_v51, 0.0 }
 0x5b3   :  { %2570 = vst [vmem:[#allocation10 + $0x10] sm:$0xff] %v2554_v1  ;;  %v5133_v40 = vsel %vm2586_vm6, %v2554_v1, -inf }
 0x5b4   :  { %2607 = vmax.xlane.f32.xlu1 %v5133_v40 }
 0x5b6   :  { %v2519_v12 = vpop.f32.mrf.mxu2 }
 0x5b7   :  { %v2520_v38 = vadd.f32 %v2519_v12, %v5113_v18 }
 0x5b9   :  { %v2555_v10 = vmax.f32 %v2520_v38, 0.0 }
 0x5bb   :  { %2571 = vst [vmem:[#allocation10 + $0x18] sm:$0xff] %v2555_v10  ;;  %v5139_v13 = vsel %vm2586_vm6, %v2555_v10, -inf }
 0x5bc   :  { %2609 = vmax.xlane.f32.xlu1 %v5139_v13 }
 0x5be   :  { %v2522_v34 = vpop.f32.mrf.mxu2 }
 0x5bf   :  { %v2523_v28 = vadd.f32 %v2522_v34, %v5113_v18 }
 0x5c1   :  { %v2556_v55 = vmax.f32 %v2523_v28, 0.0 }
 0x5c3   :  { %2572 = vst [vmem:[#allocation10 + $0x20] sm:$0xff] %v2556_v55  ;;  %v5145_v43 = vsel %vm2586_vm6, %v2556_v55, -inf }
 0x5c4   :  { %2611 = vmax.xlane.f32.xlu2 %v5145_v43 }
 0x5c6   :  { %v2524_v0 = vpop.f32.mrf.mxu2 }
 0x5c7   :  { %v2525_v27 = vadd.f32 %v2524_v0, %v5113_v18 }
 0x5c9   :  { %v2557_v15 = vmax.f32 %v2525_v27, 0.0 }
 0x5cb   :  { %2573 = vst [vmem:[#allocation10 + $0x28] sm:$0xff] %v2557_v15  ;;  %v5151_v35 = vsel %vm2586_vm6, %v2557_v15, -inf }
 0x5cc   :  { %2613 = vmax.xlane.f32.xlu2 %v5151_v35 }
 0x5ce   :  { %v2527_v56 = vpop.f32.mrf.mxu2 }
 0x5cf   :  { %v2528_v6 = vadd.f32 %v2527_v56, %v5113_v18 }
 0x5d1   :  { %v2558_v53 = vmax.f32 %v2528_v6, 0.0 }
 0x5d3   :  { %2574 = vst [vmem:[#allocation10 + $0x30] sm:$0xff] %v2558_v53  ;;  %v5157_v61 = vsel %vm2586_vm6, %v2558_v53, -inf }
 0x5d4   :  { %2615 = vmax.xlane.f32.xlu0 %v5157_v61 }
 0x5d6   :  { %v2529_v46 = vpop.f32.mrf.mxu2 }
 0x5d7   :  { %v2530_v37 = vadd.f32 %v2529_v46, %v5113_v18 }
 0x5d9   :  { %v2559_v31 = vmax.f32 %v2530_v37, 0.0 }
 0x5db   :  { %2575 = vst [vmem:[#allocation10 + $0x38] sm:$0xff] %v2559_v31  ;;  %v5163_v22 = vsel %vm2586_vm6, %v2559_v31, -inf }
 0x5dc   :  { %2617 = vmax.xlane.f32.xlu1 %v5163_v22 }
 0x5de   :  { %v2532_v26 = vpop.f32.mrf.mxu2 }
 0x5df   :  { %v2533_v17 = vadd.f32 %v2532_v26, %v5113_v18 }
 0x5e1   :  { %v2560_v14 = vmax.f32 %v2533_v17, 0.0 }
 0x5e3   :  { %2576 = vst [vmem:[#allocation10 + $0x40] sm:$0xff] %v2560_v14  ;;  %v5169_v30 = vsel %vm2586_vm6, %v2560_v14, -inf }
 0x5e4   :  { %2619 = vmax.xlane.f32.xlu2 %v5169_v30 }
 0x5e6   :  { %v2534_v7 = vpop.f32.mrf.mxu2 }
 0x5e7   :  { %v2535_v59 = vadd.f32 %v2534_v7, %v5113_v18 }
 0x5e9   :  { %v2561_v24 = vmax.f32 %v2535_v59, 0.0 }
 0x5eb   :  { %2577 = vst [vmem:[#allocation10 + $0x48] sm:$0xff] %v2561_v24  ;;  %v5175_v49 = vsel %vm2586_vm6, %v2561_v24, -inf }
 0x5ec   :  { %2621 = vmax.xlane.f32.xlu0 %v5175_v49 }
 0x5ee   :  { %v2537_v29 = vpop.f32.mrf.mxu2 }
 0x5ef   :  { %v2538_v9 = vadd.f32 %v2537_v29, %v5113_v18 }
 0x5f1   :  { %v2562_v8 = vmax.f32 %v2538_v9, 0.0 }
 0x5f3   :  { %2578 = vst [vmem:[#allocation10 + $0x50] sm:$0xff] %v2562_v8  ;;  %v5181_v60 = vsel %vm2586_vm6, %v2562_v8, -inf }
 0x5f4   :  { %2623 = vmax.xlane.f32.xlu1 %v5181_v60 }
 0x5f6   :  { %v2539_v16 = vpop.f32.mrf.mxu2 }
 0x5f7   :  { %v2540_v48 = vadd.f32 %v2539_v16, %v5113_v18 }
 0x5f9   :  { %v2563_v23 = vmax.f32 %v2540_v48, 0.0 }
 0x5fb   :  { %2579 = vst [vmem:[#allocation10 + $0x58] sm:$0xff] %v2563_v23  ;;  %v5187_v20 = vsel %vm2586_vm6, %v2563_v23, -inf }
 0x5fc   :  { %2625 = vmax.xlane.f32.xlu2 %v5187_v20 }
 0x5fe   :  { %v2542_v47 = vpop.f32.mrf.mxu2 }
 0x5ff   :  { %v2543_v41 = vadd.f32 %v2542_v47, %v5113_v18 }
 0x601   :  { %v2564_v2 = vmax.f32 %v2543_v41, 0.0 }
 0x603   :  { %2580 = vst [vmem:[#allocation10 + $0x60] sm:$0xff] %v2564_v2  ;;  %v5193_v42 = vsel %vm2586_vm6, %v2564_v2, -inf }
 0x604   :  { %2627 = vmax.xlane.f32.xlu0 %v5193_v42 }
 0x606   :  { %v2544_v44 = vpop.f32.mrf.mxu2 }
 0x607   :  { %v2545_v11 = vadd.f32 %v2544_v44, %v5113_v18 }
 0x609   :  { %v2565_v39 = vmax.f32 %v2545_v11, 0.0 }
 0x60b   :  { %2581 = vst [vmem:[#allocation10 + $0x68] sm:$0xff] %v2565_v39  ;;  %v5199_v21 = vsel %vm2586_vm6, %v2565_v39, -inf }
 0x60c   :  { %2629 = vmax.xlane.f32.xlu1 %v5199_v21 }
 0x60e   :  { %v2547_v19 = vpop.f32.mrf.mxu2 }
 0x60f   :  { %v2548_v50 = vadd.f32 %v2547_v19, %v5113_v18 }
 0x611   :  { %v2566_v62 = vmax.f32 %v2548_v50, 0.0 }
 0x613   :  { %2582 = vst [vmem:[#allocation10 + $0x70] sm:$0xff] %v2566_v62  ;;  %v5205_v5 = vsel %vm2586_vm6, %v2566_v62, -inf }
 0x614   :  { %2631 = vmax.xlane.f32.xlu2 %v5205_v5 }
 0x616   :  { %v2549_v33 = vpop.f32.mrf.mxu2 }
 0x617   :  { %v2550_v32 = vadd.f32 %v2549_v33, %v5113_v18  ;;  %v2604_v3 = vpop.xlane.xlu0 %2603 }
 0x618   :  { %vm2635_vm7 = vcmp.eq.f32.partialorder %v5121_v36, %v2604_v3 }
 0x619   :  { %v2567_v45 = vmax.f32 %v2550_v32, 0.0  ;;  %v5211_v58 = vsel %vm2635_vm7, %v5115_v54, 128 }
 0x61a   :  { %v2668_v57 = vshra.s32 %v5211_v58, 16 }
 0x61b   :  { %2583 = vst [vmem:[#allocation10 + $0x78] sm:$0xff] %v2567_v45  ;;  %v5216_v52 = vsel %vm2586_vm6, %v2567_v45, -inf }
 0x61c   :  { %2633 = vmax.xlane.f32.xlu0 %v5216_v52  ;;  %v5219_v63 = vcvt.s32.f32 %v2668_v57  ;;  %2920 = dma.vmem_to_hbm [thread:$0]  %s2913_s11, 2048, %s2915_s1, [#allocation9], %s3718_s14, %s3718_s14, %s3719_s15  }
 0x61e   :  { %2671 = vmin.xlane.f32.xlu1 %v5219_v63 }
 0x61f   :  { %v2606_v18 = vpop.xlane.xlu0 %2605 }
 0x620   :  { %vm2636_vm8 = vcmp.eq.f32.partialorder %v5127_v25, %v2606_v18 }
 0x621   :  { %v5224_v36 = vsel %vm2636_vm8, %v5115_v54, 128 }
 0x622   :  { %v2682_v4 = vshra.s32 %v5224_v36, 16 }
 0x624   :  { %v5227_v51 = vcvt.s32.f32 %v2682_v4 }
 0x626   :  { %2685 = vmin.xlane.f32.xlu0 %v5227_v51 }
 0x627   :  { %v2608_v1 = vpop.xlane.xlu1 %2607 }
 0x628   :  { %vm2637_vm9 = vcmp.eq.f32.partialorder %v5133_v40, %v2608_v1 }
 0x629   :  { %v5232_v12 = vsel %vm2637_vm9, %v5115_v54, 128 }
 0x62a   :  { %v2696_v38 = vshra.s32 %v5232_v12, 16 }
 0x62c   :  { %v5235_v10 = vcvt.s32.f32 %v2696_v38  ;;  %v2681_v38 = vand.u32 65535, %v5224_v36 }
 0x62e   :  { %2699 = vmin.xlane.f32.xlu2 %v5235_v10 }
 0x62f   :  { %v2610_v25 = vpop.xlane.xlu1 %2609 }
 0x630   :  { %vm2638_vm10 = vcmp.eq.f32.partialorder %v5139_v13, %v2610_v25 }
 0x631   :  { %v5240_v34 = vsel %vm2638_vm10, %v5115_v54, 128 }
 0x632   :  { %v2710_v28 = vshra.s32 %v5240_v34, 16 }
 0x634   :  { %v5243_v55 = vcvt.s32.f32 %v2710_v28 }
 0x636   :  { %2713 = vmin.xlane.f32.xlu0 %v5243_v55 }
 0x637   :  { %v2612_v40 = vpop.xlane.xlu2 %2611 }
 0x638   :  { %vm2639_vm11 = vcmp.eq.f32.partialorder %v5145_v43, %v2612_v40 }
 0x639   :  { %v5248_v0 = vsel %vm2639_vm11, %v5115_v54, 128 }
 0x63a   :  { %v2724_v27 = vshra.s32 %v5248_v0, 16 }
 0x63c   :  { %v5251_v15 = vcvt.s32.f32 %v2724_v27  ;;  %v2709_v27 = vand.u32 65535, %v5240_v34 }
 0x63e   :  { %2727 = vmin.xlane.f32.xlu1 %v5251_v15 }
 0x63f   :  { %v2614_v13 = vpop.xlane.xlu2 %2613 }
 0x640   :  { %vm2640_vm12 = vcmp.eq.f32.partialorder %v5151_v35, %v2614_v13 }
 0x641   :  { %v5256_v56 = vsel %vm2640_vm12, %v5115_v54, 128 }
 0x642   :  { %v2738_v6 = vshra.s32 %v5256_v56, 16  ;;  %v2737_v34 = vand.u32 65535, %v5256_v56 }
 0x644   :  { %v5259_v53 = vcvt.s32.f32 %v2738_v6  ;;  %v2711_v6 = vcvt.s32.f32 %v2709_v27 }
 0x646   :  { %2741 = vmin.xlane.f32.xlu2 %v5259_v53 }
 0x647   :  { %v2616_v43 = vpop.xlane.xlu0 %2615 }
 0x648   :  { %vm2641_vm13 = vcmp.eq.f32.partialorder %v5157_v61, %v2616_v43 }
 0x649   :  { %v5264_v46 = vsel %vm2641_vm13, %v5115_v54, 128 }
 0x64a   :  { %v2752_v37 = vshra.s32 %v5264_v46, 16 }
 0x64c   :  { %v5267_v31 = vcvt.s32.f32 %v2752_v37 }
 0x64e   :  { %2755 = vmin.xlane.f32.xlu0 %v5267_v31 }
 0x64f   :  { %v2618_v35 = vpop.xlane.xlu1 %2617 }
 0x650   :  { %vm2642_vm14 = vcmp.eq.f32.partialorder %v5163_v22, %v2618_v35 }
 0x651   :  { %v5272_v26 = vsel %vm2642_vm14, %v5115_v54, 128 }
 0x652   :  { %v2766_v17 = vshra.s32 %v5272_v26, 16  ;;  %v2765_v56 = vand.u32 65535, %v5272_v26 }
 0x654   :  { %v5275_v14 = vcvt.s32.f32 %v2766_v17  ;;  %v2739_v17 = vcvt.s32.f32 %v2737_v34 }
 0x656   :  { %2769 = vmin.xlane.f32.xlu1 %v5275_v14 }
 0x657   :  { %v2620_v61 = vpop.xlane.xlu2 %2619 }
 0x658   :  { %vm2643_vm15 = vcmp.eq.f32.partialorder %v5169_v30, %v2620_v61 }
 0x659   :  { %v5280_v7 = vsel %vm2643_vm15, %v5115_v54, 128 }
 0x65a   :  { %v2780_v59 = vshra.s32 %v5280_v7, 16 }
 0x65c   :  { %v5283_v24 = vcvt.s32.f32 %v2780_v59 }
 0x65e   :  { %2783 = vmin.xlane.f32.xlu2 %v5283_v24 }
 0x65f   :  { %v2622_v22 = vpop.xlane.xlu0 %2621 }
 0x660   :  { %vm2644_vm0 = vcmp.eq.f32.partialorder %v5175_v49, %v2622_v22 }
 0x661   :  { %v5288_v29 = vsel %vm2644_vm0, %v5115_v54, 128 }
 0x662   :  { %v2794_v9 = vshra.s32 %v5288_v29, 16  ;;  %v2793_v26 = vand.u32 65535, %v5288_v29 }
 0x664   :  { %v5291_v8 = vcvt.s32.f32 %v2794_v9  ;;  %v2767_v9 = vcvt.s32.f32 %v2765_v56 }
 0x666   :  { %2797 = vmin.xlane.f32.xlu0 %v5291_v8 }
 0x667   :  { %v2624_v30 = vpop.xlane.xlu1 %2623 }
 0x668   :  { %vm2645_vm1 = vcmp.eq.f32.partialorder %v5181_v60, %v2624_v30 }
 0x669   :  { %v5296_v16 = vsel %vm2645_vm1, %v5115_v54, 128 }
 0x66a   :  { %v2808_v48 = vshra.s32 %v5296_v16, 16 }
 0x66c   :  { %v5299_v23 = vcvt.s32.f32 %v2808_v48 }
 0x66e   :  { %2811 = vmin.xlane.f32.xlu1 %v5299_v23 }
 0x66f   :  { %v2626_v49 = vpop.xlane.xlu2 %2625 }
 0x670   :  { %vm2646_vm2 = vcmp.eq.f32.partialorder %v5187_v20, %v2626_v49 }
 0x671   :  { %v5304_v47 = vsel %vm2646_vm2, %v5115_v54, 128 }
 0x672   :  { %v2822_v41 = vshra.s32 %v5304_v47, 16  ;;  %v2821_v29 = vand.u32 65535, %v5304_v47 }
 0x674   :  { %v5307_v2 = vcvt.s32.f32 %v2822_v41  ;;  %v2795_v41 = vcvt.s32.f32 %v2793_v26 }
 0x676   :  { %2825 = vmin.xlane.f32.xlu2 %v5307_v2 }
 0x677   :  { %v2628_v60 = vpop.xlane.xlu0 %2627 }
 0x678   :  { %vm2647_vm3 = vcmp.eq.f32.partialorder %v5193_v42, %v2628_v60 }
 0x679   :  { %v5312_v44 = vsel %vm2647_vm3, %v5115_v54, 128 }
 0x67a   :  { %v2836_v11 = vshra.s32 %v5312_v44, 16 }
 0x67c   :  { %v5315_v39 = vcvt.s32.f32 %v2836_v11 }
 0x67e   :  { %2839 = vmin.xlane.f32.xlu0 %v5315_v39 }
 0x67f   :  { %v2630_v20 = vpop.xlane.xlu1 %2629 }
 0x680   :  { %vm2648_vm4 = vcmp.eq.f32.partialorder %v5199_v21, %v2630_v20  ;;  %v2667_v21 = vand.u32 65535, %v5211_v58 }
 0x681   :  { %v5320_v19 = vsel %vm2648_vm4, %v5115_v54, 128 }
 0x682   :  { %v2850_v50 = vshra.s32 %v5320_v19, 16  ;;  %v2669_v4 = vcvt.s32.f32 %v2667_v21  ;;  %v2849_v47 = vand.u32 65535, %v5320_v19 }
 0x684   :  { %v5323_v62 = vcvt.s32.f32 %v2850_v50  ;;  %v2823_v50 = vcvt.s32.f32 %v2821_v29 }
 0x686   :  { %2853 = vmin.xlane.f32.xlu1 %v5323_v62 }
 0x687   :  { %v2632_v42 = vpop.xlane.xlu2 %2631 }
 0x688   :  { %vm2649_vm5 = vcmp.eq.f32.partialorder %v5205_v5, %v2632_v42 }
 0x689   :  { %v5328_v33 = vsel %vm2649_vm5, %v5115_v54, 128 }
 0x68a   :  { %v2864_v32 = vshra.s32 %v5328_v33, 16 }
 0x68c   :  { %v5331_v3 = vcvt.s32.f32 %v2864_v32 }
 0x68e   :  { %2867 = vmin.xlane.f32.xlu2 %v5331_v3 }
 0x68f   :  { %v2634_v45 = vpop.xlane.xlu0 %2633 }
 0x690   :  { %vm2650_vm6 = vcmp.eq.f32.partialorder %v5216_v52, %v2634_v45  ;;  %v2851_v45 = vcvt.s32.f32 %v2849_v47 }
 0x691   :  { %v5337_v57 = vsel %vm2650_vm6, %v5115_v54, 128  ;;  %v5339_v18 = vpop.xlane.xlu1 %2671  ;;  %v2683_v54 = vcvt.s32.f32 %v2681_v38 }
 0x692   :  { %vm2673_vm7 = vcmp.eq.f32.partialorder %v5219_v63, %v5339_v18  ;;  %v2878_v5 = vshra.s32 %v5337_v57, 16  ;;  %v2695_v63 = vand.u32 65535, %v5232_v12  ;;  %v2723_v12 = vand.u32 65535, %v5248_v0 }
 0x693   :  { %v2674_v25 = vsel %vm2673_vm7, %v2669_v4, inf  ;;  %v2751_v0 = vand.u32 65535, %v5264_v46  ;;  %v2779_v46 = vand.u32 65535, %v5280_v7  ;;  %v2807_v7 = vand.u32 65535, %v5296_v16 }
 0x694   :  { %v5344_v1 = vcvt.s32.f32 %v2878_v5  ;;  %v2697_v40 = vcvt.s32.f32 %v2695_v63  ;;  %v2725_v37 = vcvt.s32.f32 %v2723_v12  ;;  %v2835_v16 = vand.u32 65535, %v5312_v44 }
 0x695   :  { %v2753_v59 = vcvt.s32.f32 %v2751_v0  ;;  %v2781_v48 = vcvt.s32.f32 %v2779_v46  ;;  %v2809_v11 = vcvt.s32.f32 %v2807_v7  ;;  %v2863_v44 = vand.u32 65535, %v5328_v33 }
 0x696   :  { %2675 = vmin.xlane.f32.xlu2 %v2674_v25  ;;  %2881 = vmin.xlane.f32.xlu0 %v5344_v1  ;;  %v2837_v32 = vcvt.s32.f32 %v2835_v16  ;;  %v2877_v19 = vand.u32 65535, %v5337_v57  ;;  %vm2891_vm7 = vcmask 7168  }
 0x697   :  { %v2865_v4 = vcvt.s32.f32 %v2863_v44 }
 0x699   :  { %v5348_v58 = vpop.xlane.xlu0 %2685 }
 0x69a   :  { %vm2687_vm8 = vcmp.eq.f32.partialorder %v5227_v51, %v5348_v58  ;;  %v2692_v63 = vcvt.f32.s32 %v5348_v58 }
 0x69b   :  { %v2688_v52 = vsel %vm2687_vm8, %v2683_v54, inf }
 0x69c   :  { %2689 = vmin.xlane.f32.xlu1 %v2688_v52 }
 0x6a1   :  { %v5353_v28 = vpop.xlane.xlu2 %2699 }
 0x6a2   :  { %vm2701_vm9 = vcmp.eq.f32.partialorder %v5235_v10, %v5353_v28 }
 0x6a3   :  { %v2702_v36 = vsel %vm2701_vm9, %v2697_v40, inf }
 0x6a4   :  { %2703 = vmin.xlane.f32.xlu1 %v2702_v36 }
 0x6a9   :  { %v5358_v13 = vpop.xlane.xlu0 %2713 }
 0x6aa   :  { %vm2715_vm10 = vcmp.eq.f32.partialorder %v5243_v55, %v5358_v13 }
 0x6ab   :  { %v2716_v51 = vsel %vm2715_vm10, %v2711_v6, inf  ;;  %v2706_v6 = vcvt.f32.s32 %v5353_v28 }
 0x6ac   :  { %2717 = vmin.xlane.f32.xlu2 %v2716_v51 }
 0x6ad   :  { %v2707_v58 = vshll.u32 %v2706_v6, 16 }
 0x6b1   :  { %v5363_v43 = vpop.xlane.xlu1 %2727 }
 0x6b2   :  { %vm2729_vm11 = vcmp.eq.f32.partialorder %v5251_v15, %v5363_v43 }
 0x6b3   :  { %v2730_v10 = vsel %vm2729_vm11, %v2725_v37, inf  ;;  %v2720_v37 = vcvt.f32.s32 %v5358_v13 }
 0x6b4   :  { %2731 = vmin.xlane.f32.xlu0 %v2730_v10 }
 0x6b5   :  { %v2721_v34 = vshll.u32 %v2720_v37, 16 }
 0x6b9   :  { %v5368_v35 = vpop.xlane.xlu2 %2741 }
 0x6ba   :  { %vm2743_vm12 = vcmp.eq.f32.partialorder %v5259_v53, %v5368_v35  ;;  %v2748_v56 = vcvt.f32.s32 %v5368_v35 }
 0x6bb   :  { %v2744_v55 = vsel %vm2743_vm12, %v2739_v17, inf }
 0x6bc   :  { %2745 = vmin.xlane.f32.xlu1 %v2744_v55  ;;  %v2734_v55 = vcvt.f32.s32 %v5363_v43 }
 0x6c1   :  { %v5373_v61 = vpop.xlane.xlu0 %2755 }
 0x6c2   :  { %vm2757_vm13 = vcmp.eq.f32.partialorder %v5267_v31, %v5373_v61 }
 0x6c3   :  { %v2758_v15 = vsel %vm2757_vm13, %v2753_v59, inf  ;;  %v2735_v59 = vshll.u32 %v2734_v55, 16 }
 0x6c4   :  { %2759 = vmin.xlane.f32.xlu2 %v2758_v15 }
 0x6c9   :  { %v5378_v22 = vpop.xlane.xlu1 %2769 }
 0x6ca   :  { %vm2771_vm14 = vcmp.eq.f32.partialorder %v5275_v14, %v5378_v22 }
 0x6cb   :  { %v2772_v53 = vsel %vm2771_vm14, %v2767_v9, inf }
 0x6cc   :  { %2773 = vmin.xlane.f32.xlu0 %v2772_v53  ;;  %v2749_v53 = vshll.u32 %v2748_v56, 16 }
 0x6d1   :  { %v5383_v30 = vpop.xlane.xlu2 %2783 }
 0x6d2   :  { %vm2785_vm15 = vcmp.eq.f32.partialorder %v5283_v24, %v5383_v30  ;;  %v2790_v29 = vcvt.f32.s32 %v5383_v30 }
 0x6d3   :  { %v2786_v31 = vsel %vm2785_vm15, %v2781_v48, inf  ;;  %v2762_v48 = vcvt.f32.s32 %v5373_v61 }
 0x6d4   :  { %2787 = vmin.xlane.f32.xlu1 %v2786_v31 }
 0x6d5   :  { %v2763_v26 = vshll.u32 %v2762_v48, 16 }
 0x6d9   :  { %v5388_v49 = vpop.xlane.xlu0 %2797 }
 0x6da   :  { %vm2799_vm0 = vcmp.eq.f32.partialorder %v5291_v8, %v5388_v49 }
 0x6db   :  { %v2800_v14 = vsel %vm2799_vm0, %v2795_v41, inf }
 0x6dc   :  { %2801 = vmin.xlane.f32.xlu2 %v2800_v14  ;;  %v2776_v14 = vcvt.f32.s32 %v5378_v22 }
 0x6e1   :  { %v5393_v60 = vpop.xlane.xlu1 %2811 }
 0x6e2   :  { %vm2813_vm1 = vcmp.eq.f32.partialorder %v5299_v23, %v5393_v60 }
 0x6e3   :  { %v2814_v24 = vsel %vm2813_vm1, %v2809_v11, inf  ;;  %v2777_v11 = vshll.u32 %v2776_v14, 16 }
 0x6e4   :  { %2815 = vmin.xlane.f32.xlu0 %v2814_v24 }
 0x6e9   :  { %v5398_v20 = vpop.xlane.xlu2 %2825 }
 0x6ea   :  { %vm2827_vm2 = vcmp.eq.f32.partialorder %v5307_v2, %v5398_v20 }
 0x6eb   :  { %v2828_v8 = vsel %vm2827_vm2, %v2823_v50, inf }
 0x6ec   :  { %2829 = vmin.xlane.f32.xlu1 %v2828_v8  ;;  %v2791_v8 = vshll.u32 %v2790_v29, 16 }
 0x6f1   :  { %v5403_v42 = vpop.xlane.xlu0 %2839 }
 0x6f2   :  { %vm2841_vm3 = vcmp.eq.f32.partialorder %v5315_v39, %v5403_v42 }
 0x6f3   :  { %v2842_v23 = vsel %vm2841_vm3, %v2837_v32, inf  ;;  %v2804_v32 = vcvt.f32.s32 %v5388_v49 }
 0x6f4   :  { %2843 = vmin.xlane.f32.xlu2 %v2842_v23 }
 0x6f5   :  { %v2805_v47 = vshll.u32 %v2804_v32, 16 }
 0x6f9   :  { %v5408_v21 = vpop.xlane.xlu1 %2853 }
 0x6fa   :  { %vm2855_vm4 = vcmp.eq.f32.partialorder %v5323_v62, %v5408_v21  ;;  %v2678_v62 = vcvt.f32.s32 %v5339_v18  ;;  %v2693_v18 = vshll.u32 %v2692_v63, 16 }
 0x6fb   :  { %v2856_v2 = vsel %vm2855_vm4, %v2851_v45, inf }
 0x6fc   :  { %2857 = vmin.xlane.f32.xlu0 %v2856_v2  ;;  %v2679_v25 = vshll.u32 %v2678_v62, 16  ;;  %v2818_v2 = vcvt.f32.s32 %v5393_v60 }
 0x701   :  { %v5413_v5 = vpop.xlane.xlu2 %2867 }
 0x702   :  { %vm2869_vm5 = vcmp.eq.f32.partialorder %v5331_v3, %v5413_v5  ;;  %v2879_v3 = vcvt.s32.f32 %v2877_v19  ;;  %v2832_v19 = vcvt.f32.s32 %v5398_v20 }
 0x703   :  { %v2870_v39 = vsel %vm2869_vm5, %v2865_v4, inf  ;;  %v2819_v4 = vshll.u32 %v2818_v2, 16 }
 0x704   :  { %2871 = vmin.xlane.f32.xlu1 %v2870_v39 }
 0x709   :  { %v2676_v33 = vpop.xlane.xlu2 %2675  ;;  %v5422_v38 = vpop.xlane.xlu0 %2881 }
 0x70a   :  { %v2677_v54 = vcvt.f32.s32 %v2676_v33  ;;  %vm2883_vm6 = vcmp.eq.f32.partialorder %v5344_v1, %v5422_v38  ;;  %v2833_v33 = vshll.u32 %v2832_v19, 16 }
 0x70b   :  { %v2884_v52 = vsel %vm2883_vm6, %v2879_v3, inf }
 0x70c   :  { %v2680_v40 = vadd.s32 %v2679_v25, %v2677_v54  ;;  %2885 = vmin.xlane.f32.xlu2 %v2884_v52  ;;  %v2846_v25 = vcvt.f32.s32 %v5403_v42 }
 0x70e   :  { %2892 = vst.msk [vmem:[%s5512_s7] sm:$0xff] %vm2891_vm7, %v2680_v40  ;;  %v2847_v52 = vshll.u32 %v2846_v25, 16  ;;  %v2860_v40 = vcvt.f32.s32 %v5408_v21 }
 0x70f   :  { %v2690_v57 = vpop.xlane.xlu1 %2689 }
 0x710   :  { %v2691_v36 = vcvt.f32.s32 %v2690_v57 }
 0x712   :  { %v2694_v27 = vadd.s32 %v2693_v18, %v2691_v36  ;;  %v2861_v18 = vshll.u32 %v2860_v40, 16 }
 0x714   :  { %2893 = vst.msk [vmem:[%s5512_s7 + $0x8] sm:$0xff] %vm2891_vm7, %v2694_v27  ;;  %v2874_v27 = vcvt.f32.s32 %v5413_v5 }
 0x717   :  { %v2704_v1 = vpop.xlane.xlu1 %2703 }
 0x718   :  { %v2705_v51 = vcvt.f32.s32 %v2704_v1  ;;  %v2875_v1 = vshll.u32 %v2874_v27, 16 }
 0x71a   :  { %v2708_v12 = vadd.s32 %v2707_v58, %v2705_v51  ;;  %v2888_v51 = vcvt.f32.s32 %v5422_v38 }
 0x71c   :  { %2894 = vst.msk [vmem:[%s5512_s7 + $0x10] sm:$0xff] %vm2891_vm7, %v2708_v12  ;;  %v2889_v37 = vshll.u32 %v2888_v51, 16 }
 0x71f   :  { %v2718_v10 = vpop.xlane.xlu2 %2717 }
 0x720   :  { %v2719_v17 = vcvt.f32.s32 %v2718_v10 }
 0x722   :  { %v2722_v28 = vadd.s32 %v2721_v34, %v2719_v17 }
 0x724   :  { %2895 = vst.msk [vmem:[%s5512_s7 + $0x18] sm:$0xff] %vm2891_vm7, %v2722_v28 }
 0x727   :  { %v2732_v0 = vpop.xlane.xlu0 %2731 }
 0x728   :  { %v2733_v15 = vcvt.f32.s32 %v2732_v0 }
 0x72a   :  { %v2736_v13 = vadd.s32 %v2735_v59, %v2733_v15 }
 0x72c   :  { %2896 = vst.msk [vmem:[%s5512_s7 + $0x20] sm:$0xff] %vm2891_vm7, %v2736_v13 }
 0x72f   :  { %v2746_v9 = vpop.xlane.xlu1 %2745 }
 0x730   :  { %v2747_v46 = vcvt.f32.s32 %v2746_v9 }
 0x732   :  { %v2750_v43 = vadd.s32 %v2749_v53, %v2747_v46 }
 0x734   :  { %2897 = vst.msk [vmem:[%s5512_s7 + $0x28] sm:$0xff] %vm2891_vm7, %v2750_v43 }
 0x737   :  { %v2760_v31 = vpop.xlane.xlu2 %2759 }
 0x738   :  { %v2761_v41 = vcvt.f32.s32 %v2760_v31 }
 0x73a   :  { %v2764_v35 = vadd.s32 %v2763_v26, %v2761_v41 }
 0x73c   :  { %2898 = vst.msk [vmem:[%s5512_s7 + $0x30] sm:$0xff] %vm2891_vm7, %v2764_v35 }
 0x73f   :  { %v2774_v7 = vpop.xlane.xlu0 %2773 }
 0x740   :  { %v2775_v24 = vcvt.f32.s32 %v2774_v7 }
 0x742   :  { %v2778_v61 = vadd.s32 %v2777_v11, %v2775_v24 }
 0x744   :  { %2899 = vst.msk [vmem:[%s5512_s7 + $0x38] sm:$0xff] %vm2891_vm7, %v2778_v61 }
 0x747   :  { %v2788_v50 = vpop.xlane.xlu1 %2787 }
 0x748   :  { %v2789_v16 = vcvt.f32.s32 %v2788_v50 }
 0x74a   :  { %v2792_v22 = vadd.s32 %v2791_v8, %v2789_v16 }
 0x74c   :  { %2900 = vst.msk [vmem:[%s5512_s7 + $0x40] sm:$0xff] %vm2891_vm7, %v2792_v22 }
 0x74f   :  { %v2802_v23 = vpop.xlane.xlu2 %2801 }
 0x750   :  { %v2803_v45 = vcvt.f32.s32 %v2802_v23 }
 0x752   :  { %v2806_v30 = vadd.s32 %v2805_v47, %v2803_v45 }
 0x754   :  { %2901 = vst.msk [vmem:[%s5512_s7 + $0x48] sm:$0xff] %vm2891_vm7, %v2806_v30 }
 0x757   :  { %v2816_v44 = vpop.xlane.xlu0 %2815 }
 0x758   :  { %v2817_v39 = vcvt.f32.s32 %v2816_v44 }
 0x75a   :  { %v2820_v49 = vadd.s32 %v2819_v4, %v2817_v39 }
 0x75c   :  { %2902 = vst.msk [vmem:[%s5512_s7 + $0x50] sm:$0xff] %vm2891_vm7, %v2820_v49 }
 0x75f   :  { %v2830_v62 = vpop.xlane.xlu1 %2829 }
 0x760   :  { %v2831_v3 = vcvt.f32.s32 %v2830_v62 }
 0x762   :  { %v2834_v60 = vadd.s32 %v2833_v33, %v2831_v3 }
 0x764   :  { %2903 = vst.msk [vmem:[%s5512_s7 + $0x58] sm:$0xff] %vm2891_vm7, %v2834_v60 }
 0x767   :  { %v2844_v54 = vpop.xlane.xlu2 %2843 }
 0x768   :  { %v2845_v63 = vcvt.f32.s32 %v2844_v54 }
 0x76a   :  { %v2848_v20 = vadd.s32 %v2847_v52, %v2845_v63 }
 0x76c   :  { %2904 = vst.msk [vmem:[%s5512_s7 + $0x60] sm:$0xff] %vm2891_vm7, %v2848_v20 }
 0x76f   :  { %v2858_v57 = vpop.xlane.xlu0 %2857 }
 0x770   :  { %v2859_v36 = vcvt.f32.s32 %v2858_v57 }
 0x772   :  { %v2862_v42 = vadd.s32 %v2861_v18, %v2859_v36 }
 0x774   :  { %2905 = vst.msk [vmem:[%s5512_s7 + $0x68] sm:$0xff] %vm2891_vm7, %v2862_v42 }
 0x777   :  { %v2872_v6 = vpop.xlane.xlu1 %2871 }
 0x778   :  { %v2873_v58 = vcvt.f32.s32 %v2872_v6 }
 0x77a   :  { %v2876_v21 = vadd.s32 %v2875_v1, %v2873_v58 }
 0x77c   :  { %2906 = vst.msk [vmem:[%s5512_s7 + $0x70] sm:$0xff] %vm2891_vm7, %v2876_v21 }
 0x77f   :  { %v2886_v12 = vpop.xlane.xlu2 %2885 }
 0x780   :  { %v2887_v10 = vcvt.f32.s32 %v2886_v12 }
 0x782   :  { %v2890_v5 = vadd.s32 %v2889_v37, %v2887_v10 }
 0x784   :  { %2907 = vst.msk [vmem:[%s5512_s7 + $0x78] sm:$0xff] %vm2891_vm7, %v2890_v5 }
 0x785   :  { %3709 = dma.done.wait [#allocation9], 2048  }
 0x786   :  { %3710 = vsyncadd [#allocation9], 4294965248 }
 0x787   :  { %2929 = vsyncpa [#allocation8], 1 }
 0x788   :  { %2930 = vsyncpa [#allocation9], 1 }
 0x789   :  { %2931 = vsyncmov [#allocation6] }
 0x78c   :  { %s2932_s17 = vpop.sfrf %2931 }
 0x78d   :  { %p3435_p0 = scmp.ne.s32.totalorder %s2932_s17, 0 }
 0x78f   :  { %2936 = shalt.err (%p3435_p0)  }
 0x790   :  { %2938 = vsyncmov [#allocation6 + $0x1] }
 0x793   :  { %s2939_s18 = vpop.sfrf %2938 }
 0x794   :  { %p3436_p1 = scmp.ne.s32.totalorder %s2939_s18, 0 }
 0x796   :  { %2943 = shalt.err (%p3436_p1)  }
 0x797   :  { %2945 = vsyncmov [#allocation6 + $0x2] }
 0x79a   :  { %s2946_s3 = vpop.sfrf %2945 }
 0x79b   :  { %p3437_p2 = scmp.ne.s32.totalorder %s2946_s3, 0 }
 0x79d   :  { %2950 = shalt.err (%p3437_p2)  }

</bundles_post_ra>
